<compile_context>
chip_gen: v5e
topology: v5e:2x2
jax: 0.10.0
libtpu: 0.0.40
codegen_flags: <defaults>
</compile_context>

<pallas_src>
from functools import partial

import jax
import jax.numpy as jnp
from jax import lax
from jax.experimental import pallas as pl
from jax.experimental.pallas import tpu as pltpu


# ------------------------------ Pallas kernel ------------------------------ #

def _make_fused_lstm_kernel(num_layers, T, B, H):
    """Kernel running `num_layers` stacked LSTM layers over T steps.

    Refs (in order):
      inputs : gx0  (T, B, 4H)  layer-0 input projection x @ W_ih^T + b (precomputed)
               whh0 (H, 4H)     layer-0 recurrent weight (transposed, gate-padded)
               for each layer l >= 1: wih_l (H, 4H), whh_l (H, 4H), b_l (1, 4H)
      output : y (T, B, H)
      scratch: gx (T, B, 4H)    only if num_layers > 1
    H here is the PADDED hidden size (multiple of 128); gate order is (i,f,o,g)
    with each gate occupying H lanes -> all gate slices are 128-lane aligned.
    """
    n_in = 2 + 3 * (num_layers - 1)
    unroll = True if T <= 16 else 4

    def kernel(*refs):
        gx0_ref = refs[0]
        whh0_ref = refs[1]
        deep_refs = refs[2:n_in]
        y_ref = refs[n_in]
        gx_sc = refs[n_in + 1] if num_layers > 1 else None

        def run_layer(gx_ref, whh_ref):
            """Sequential recurrence; h/c live in vregs (loop carry), only the
            per-step h @ W_hh^T + precomputed gates sits on the serial chain."""
            whh = whh_ref[...]                                   # (H, 4H), loaded once
            h0 = jnp.zeros((B, H), jnp.float32)
            c0 = jnp.zeros((B, H), jnp.float32)

            def step(t, carry):
                h, c = carry
                gates = gx_ref[t] + jnp.dot(
                    h, whh, preferred_element_type=jnp.float32)  # (B, 4H)
                # Gate layout: [ i | f | o | g ], each exactly H (=128k) lanes.
                sig = jax.nn.sigmoid(gates[:, : 3 * H])          # one contiguous sigmoid
                g_g = jnp.tanh(gates[:, 3 * H:])                 # one contiguous tanh
                i_g = sig[:, :H]
                f_g = sig[:, H: 2 * H]
                o_g = sig[:, 2 * H:]
                c_new = f_g * c + i_g * g_g
                h_new = o_g * jnp.tanh(c_new)
                y_ref[t] = h_new                                 # full-width vst; slab
                return (h_new, c_new)                            # DMA'd back at the end

            lax.fori_loop(0, T, step, (h0, c0), unroll=unroll)

        # ---- layer 0: input projection precomputed in the wrapper ----
        run_layer(gx0_ref, whh0_ref)

        # ---- layers 1 .. L-1 ----
        for l in range(num_layers - 1):
            wih_ref, whh_ref, b_ref = deep_refs[3 * l: 3 * l + 3]
            # Hoisted (non-recurrent) projection of the previous layer's outputs:
            # one batched (T*B, H) @ (H, 4H) matmul + one bias broadcast.
            y_all = y_ref[...].reshape(T * B, H)
            gx = jnp.dot(y_all, wih_ref[...],
                         preferred_element_type=jnp.float32) + b_ref[...]
            gx_sc[...] = gx.reshape(T, B, 4 * H)
            run_layer(gx_sc, whh_ref)

    return kernel


# --------------------------- Parameter preparation -------------------------- #

def init_raw_lstm_params(key, time_steps, num_layers, lstm_hs):
    """Raw nn.LSTM-shaped params: gate row order (i, f, g, o), U(-1/sqrt(H), 1/sqrt(H))."""
    H = lstm_hs
    bound = 1.0 / (H ** 0.5)
    params = []
    for layer in range(num_layers):
        in_size = time_steps if layer == 0 else H
        key, k1, k2, k3, k4 = jax.random.split(key, 5)
        params.append({
            "w_ih": jax.random.uniform(k1, (4 * H, in_size), jnp.float32, -bound, bound),
            "w_hh": jax.random.uniform(k2, (4 * H, H), jnp.float32, -bound, bound),
            "b_ih": jax.random.uniform(k3, (4 * H,), jnp.float32, -bound, bound),
            "b_hh": jax.random.uniform(k4, (4 * H,), jnp.float32, -bound, bound),
        })
    return params


def _pad_gate_cols(a, H, Hp):
    """(..., 4H) gate-ordered (i,f,o,g) -> (..., 4Hp), zero-padding each gate to Hp lanes."""
    lead = a.shape[:-1]
    a = a.reshape(lead + (4, H))
    pad = [(0, 0)] * len(lead) + [(0, 0), (0, Hp - H)]
    return jnp.pad(a, pad).reshape(lead + (4 * Hp,))


def prepare_kernel_params(raw_params, lstm_hs):
    """Transpose, permute gates (i,f,g,o)->(i,f,o,g), and pad H to a multiple of 128.

    Pure re-parameterization (exact): padded weight rows/cols and biases are
    zero, so padded hidden lanes remain identically zero.  A real PyTorch
    checkpoint would be transformed identically at load time.
    """
    H = lstm_hs
    Hp = ((H + 127) // 128) * 128
    perm = jnp.concatenate([jnp.arange(0, 2 * H),        # i, f
                            jnp.arange(3 * H, 4 * H),    # o
                            jnp.arange(2 * H, 3 * H)])   # g
    prepped = []
    for layer, p in enumerate(raw_params):
        w_ih_t = p["w_ih"].T[:, perm]                    # (in, 4H), gates (i,f,o,g)
        w_hh_t = p["w_hh"].T[:, perm]                    # (H,  4H)
        b = (p["b_ih"] + p["b_hh"])[perm].reshape(1, 4 * H)
        w_ih_t = _pad_gate_cols(w_ih_t, H, Hp)           # (in, 4Hp)
        w_hh_t = _pad_gate_cols(w_hh_t, H, Hp)           # (H,  4Hp)
        b = _pad_gate_cols(b, H, Hp)                     # (1,  4Hp)
        w_hh_t = jnp.pad(w_hh_t, ((0, Hp - H), (0, 0)))  # pad contraction rows
        if layer > 0:
            w_ih_t = jnp.pad(w_ih_t, ((0, Hp - H), (0, 0)))
        prepped.append({"w_ih_t": w_ih_t, "w_hh_t": w_hh_t, "b": b})
    return prepped


# ------------------------------ Module wrapper ------------------------------ #

@partial(jax.jit, static_argnums=(2,))
def block_lstm_forward(x, kparams, H):
    """x: (batch, seq_len, time_steps) -> y: (seq_len, batch, lstm_hs)."""
    x = x.astype(jnp.float32)
    B0, T, _ = x.shape
    Hp = kparams[0]["w_hh_t"].shape[0]
    L = len(kparams)
    Bp = ((max(B0, 8) + 7) // 8) * 8                     # fill f32 sublanes

    # Hoisted layer-0 input projection; the (0,1) transpose is folded into the
    # einsum output layout instead of materializing a transposed copy of x.
    gx0 = jnp.einsum("bsf,fg->sbg", x, kparams[0]["w_ih_t"],
                     preferred_element_type=jnp.float32) + kparams[0]["b"]
    if Bp != B0:
        gx0 = jnp.pad(gx0, ((0, 0), (0, Bp - B0), (0, 0)))

    inputs = [gx0, kparams[0]["w_hh_t"]]
    for p in kparams[1:]:
        inputs += [p["w_ih_t"], p["w_hh_t"], p["b"]]

    scratch = []
    if L > 1:
        scratch.append(pltpu.VMEM((T, Bp, 4 * Hp), jnp.float32))

    flops = int(2 * T * Bp * Hp * 4 * Hp * (2 * L - 1))      # recurrent + deep projections
    transcendentals = int(L * T * Bp * 5 * Hp)               # 3 sigmoid + 2 tanh gates/step
    bytes_accessed = int(sum(a.size for a in inputs) * 4 + T * Bp * Hp * 4)

    kernel = _make_fused_lstm_kernel(L, T, Bp, Hp)
    y = pl.pallas_call(
        kernel,
        out_shape=jax.ShapeDtypeStruct((T, Bp, Hp), jnp.float32),
        in_specs=[pl.BlockSpec(memory_space=pltpu.MemorySpace.VMEM)] * len(inputs),
        out_specs=pl.BlockSpec(memory_space=pltpu.MemorySpace.VMEM),
        scratch_shapes=scratch,
        compiler_params=pltpu.CompilerParams(
            vmem_limit_bytes=32 * 1024 * 1024,               # cap; v7x-safe at these shapes
        ),
        cost_estimate=pl.CostEstimate(flops=flops,
                                      transcendentals=transcendentals,
                                      bytes_accessed=bytes_accessed),
    )(*inputs)
    # Drop batch/hidden padding; Dropout(p=0.8) is identity in eval mode.
    return y[:, :B0, :H]


# ------------------------ Pure-JAX reference (raw weights) ------------------ #

def _lstm_layer_ref(x_seq, w_ih, w_hh, b_ih, b_hh):
    """Standard PyTorch nn.LSTM layer: gate order (i, f, g, o), unpermuted weights."""
    B = x_seq.shape[1]
    H = w_hh.shape[1]

    def step(carry, x_t):
        h, c = carry
        gates = x_t @ w_ih.T + h @ w_hh.T + b_ih + b_hh
        i = jax.nn.sigmoid(gates[:, :H])
        f = jax.nn.sigmoid(gates[:, H: 2 * H])
        g = jnp.tanh(gates[:, 2 * H: 3 * H])
        o = jax.nn.sigmoid(gates[:, 3 * H:])
        c = f * c + i * g
        h = o * jnp.tanh(c)
        return (h, c), h

    init = (jnp.zeros((B, H), jnp.float32), jnp.zeros((B, H), jnp.float32))
    _, ys = lax.scan(step, init, x_seq)
    return ys


def block_lstm_forward_ref(x, raw_params):
    h = jnp.transpose(x, (1, 0, 2)).astype(jnp.float32)
    for p in raw_params:
        h = _lstm_layer_ref(h, p["w_ih"], p["w_hh"], p["b_ih"], p["b_hh"])
    return h


# ----------------------------------- Main ----------------------------------- #

if __name__ == "__main__":
    # Small config consistent with the module: LSTM input size 16, 2 layers,
    # hidden 32, batch 2, sequence length 8.
    time_steps = 16
    num_layers = 2
    lstm_hs = 32
    batch = 2
    seq_len = 8

    key = jax.random.PRNGKey(0)
    key, xk, pk = jax.random.split(key, 3)

    # x matches the PyTorch forward's expected layout (batch, seq, time_steps).
    x = jax.random.normal(xk, (batch, seq_len, time_steps), jnp.float32)
    raw_params = init_raw_lstm_params(pk, time_steps, num_layers, lstm_hs)
    kparams = prepare_kernel_params(raw_params, lstm_hs)

    y = jax.block_until_ready(block_lstm_forward(x, kparams, lstm_hs))
    y_ref = jax.block_until_ready(block_lstm_forward_ref(x, raw_params))

    assert y.shape == (seq_len, batch, lstm_hs), y.shape
    assert jnp.allclose(y, y_ref, atol=2e-5, rtol=2e-5), (
        float(jnp.max(jnp.abs(y - y_ref))))

    print("KERNEL_OK")
</pallas_src>

<mosaic_0001>
module attributes {stable_mosaic.version = 11 : i64} {
  func.func @kernel(%arg0: memref<8x8x512xf32, #tpu.memory_space<vmem>>, %arg1: memref<128x512xf32, #tpu.memory_space<vmem>>, %arg2: memref<128x512xf32, #tpu.memory_space<vmem>>, %arg3: memref<128x512xf32, #tpu.memory_space<vmem>>, %arg4: memref<1x512xf32, #tpu.memory_space<vmem>>, %arg5: memref<8x8x128xf32, #tpu.memory_space<vmem>>, %arg6: memref<8x8x512xf32, #tpu.memory_space<vmem>>) attributes {dimension_semantics = [], scalar_prefetch = 0 : i64, scratch_operands = 1 : i64, tpu.core_type = #tpu.core_type<tc>} {
    %c0 = arith.constant 0 : index
    %c0_0 = arith.constant 0 : index
    %0 = vector.load %arg1[%c0, %c0_0] : memref<128x512xf32, #tpu.memory_space<vmem>>, vector<128x512xf32>
    %cst = arith.constant 0.000000e+00 : f32
    %1 = vector.broadcast %cst : f32 to vector<8x128xf32>
    %cst_1 = arith.constant 0.000000e+00 : f32
    %2 = vector.broadcast %cst_1 : f32 to vector<8x128xf32>
    %c0_i32 = arith.constant 0 : i32
    %3 = arith.index_cast %c0_i32 : i32 to index
    %c0_2 = arith.constant 0 : index
    %c0_3 = arith.constant 0 : index
    %4 = vector.load %arg0[%3, %c0_2, %c0_3] : memref<8x8x512xf32, #tpu.memory_space<vmem>>, vector<1x8x512xf32>
    %5 = vector.shape_cast %4 : vector<1x8x512xf32> to vector<8x512xf32>
    %cst_4 = arith.constant dense<0.000000e+00> : vector<8x512xf32>
    %6 = tpu.matmul %1, %0, %cst_4 {dimension_numbers = #tpu.dot_dimension_numbers<[1], [0], [0], [1], [0, 0, 1, 1], [], []>} : vector<8x128xf32>, vector<128x512xf32>, vector<8x512xf32> -> vector<8x512xf32>
    %7 = arith.addf %5, %6 : vector<8x512xf32>
    %8 = vector.extract_strided_slice %7 {offsets = [0, 0], sizes = [8, 384], strides = [1, 1]} : vector<8x512xf32> to vector<8x384xf32>
    %9 = arith.negf %8 : vector<8x384xf32>
    %10 = math.exp %9 : vector<8x384xf32>
    %cst_5 = arith.constant 1.000000e+00 : f32
    %11 = vector.broadcast %cst_5 : f32 to vector<8x384xf32>
    %12 = arith.addf %11, %10 : vector<8x384xf32>
    %13 = arith.divf %11, %12 : vector<8x384xf32>
    %14 = vector.extract_strided_slice %7 {offsets = [0, 384], sizes = [8, 128], strides = [1, 1]} : vector<8x512xf32> to vector<8x128xf32>
    %15 = math.tanh %14 : vector<8x128xf32>
    %16 = vector.extract_strided_slice %13 {offsets = [0, 0], sizes = [8, 128], strides = [1, 1]} : vector<8x384xf32> to vector<8x128xf32>
    %17 = vector.extract_strided_slice %13 {offsets = [0, 128], sizes = [8, 128], strides = [1, 1]} : vector<8x384xf32> to vector<8x128xf32>
    %18 = vector.extract_strided_slice %13 {offsets = [0, 256], sizes = [8, 128], strides = [1, 1]} : vector<8x384xf32> to vector<8x128xf32>
    %19 = arith.mulf %17, %2 : vector<8x128xf32>
    %20 = arith.mulf %16, %15 : vector<8x128xf32>
    %21 = arith.addf %19, %20 : vector<8x128xf32>
    %22 = math.tanh %21 : vector<8x128xf32>
    %23 = arith.mulf %18, %22 : vector<8x128xf32>
    %24 = arith.index_cast %c0_i32 : i32 to index
    %c0_6 = arith.constant 0 : index
    %c0_7 = arith.constant 0 : index
    %25 = vector.load %arg5[%24, %c0_6, %c0_7] : memref<8x8x128xf32, #tpu.memory_space<vmem>>, vector<1x8x128xf32>
    %26 = vector.shape_cast %25 : vector<1x8x128xf32> to vector<8x128xf32>
    %27 = vector.shape_cast %23 : vector<8x128xf32> to vector<1x8x128xf32>
    tpu.vector_store %arg5[%24, %c0_6, %c0_7], %27 {strides = array<i32>} : memref<8x8x128xf32, #tpu.memory_space<vmem>>, vector<1x8x128xf32>,
    %c1_i32 = arith.constant 1 : i32
    %28 = arith.index_cast %c1_i32 : i32 to index
    %c0_8 = arith.constant 0 : index
    %c0_9 = arith.constant 0 : index
    %29 = vector.load %arg0[%28, %c0_8, %c0_9] : memref<8x8x512xf32, #tpu.memory_space<vmem>>, vector<1x8x512xf32>
    %30 = vector.shape_cast %29 : vector<1x8x512xf32> to vector<8x512xf32>
    %cst_10 = arith.constant dense<0.000000e+00> : vector<8x512xf32>
    %31 = tpu.matmul %23, %0, %cst_10 {dimension_numbers = #tpu.dot_dimension_numbers<[1], [0], [0], [1], [0, 0, 1, 1], [], []>} : vector<8x128xf32>, vector<128x512xf32>, vector<8x512xf32> -> vector<8x512xf32>
    %32 = arith.addf %30, %31 : vector<8x512xf32>
    %33 = vector.extract_strided_slice %32 {offsets = [0, 0], sizes = [8, 384], strides = [1, 1]} : vector<8x512xf32> to vector<8x384xf32>
    %34 = arith.negf %33 : vector<8x384xf32>
    %35 = math.exp %34 : vector<8x384xf32>
    %cst_11 = arith.constant 1.000000e+00 : f32
    %36 = vector.broadcast %cst_11 : f32 to vector<8x384xf32>
    %37 = arith.addf %36, %35 : vector<8x384xf32>
    %38 = arith.divf %36, %37 : vector<8x384xf32>
    %39 = vector.extract_strided_slice %32 {offsets = [0, 384], sizes = [8, 128], strides = [1, 1]} : vector<8x512xf32> to vector<8x128xf32>
    %40 = math.tanh %39 : vector<8x128xf32>
    %41 = vector.extract_strided_slice %38 {offsets = [0, 0], sizes = [8, 128], strides = [1, 1]} : vector<8x384xf32> to vector<8x128xf32>
    %42 = vector.extract_strided_slice %38 {offsets = [0, 128], sizes = [8, 128], strides = [1, 1]} : vector<8x384xf32> to vector<8x128xf32>
    %43 = vector.extract_strided_slice %38 {offsets = [0, 256], sizes = [8, 128], strides = [1, 1]} : vector<8x384xf32> to vector<8x128xf32>
    %44 = arith.mulf %42, %21 : vector<8x128xf32>
    %45 = arith.mulf %41, %40 : vector<8x128xf32>
    %46 = arith.addf %44, %45 : vector<8x128xf32>
    %47 = math.tanh %46 : vector<8x128xf32>
    %48 = arith.mulf %43, %47 : vector<8x128xf32>
    %49 = arith.index_cast %c1_i32 : i32 to index
    %c0_12 = arith.constant 0 : index
    %c0_13 = arith.constant 0 : index
    %50 = vector.load %arg5[%49, %c0_12, %c0_13] : memref<8x8x128xf32, #tpu.memory_space<vmem>>, vector<1x8x128xf32>
    %51 = vector.shape_cast %50 : vector<1x8x128xf32> to vector<8x128xf32>
    %52 = vector.shape_cast %48 : vector<8x128xf32> to vector<1x8x128xf32>
    tpu.vector_store %arg5[%49, %c0_12, %c0_13], %52 {strides = array<i32>} : memref<8x8x128xf32, #tpu.memory_space<vmem>>, vector<1x8x128xf32>,
    %c2_i32 = arith.constant 2 : i32
    %53 = arith.index_cast %c2_i32 : i32 to index
    %c0_14 = arith.constant 0 : index
    %c0_15 = arith.constant 0 : index
    %54 = vector.load %arg0[%53, %c0_14, %c0_15] : memref<8x8x512xf32, #tpu.memory_space<vmem>>, vector<1x8x512xf32>
    %55 = vector.shape_cast %54 : vector<1x8x512xf32> to vector<8x512xf32>
    %cst_16 = arith.constant dense<0.000000e+00> : vector<8x512xf32>
    %56 = tpu.matmul %48, %0, %cst_16 {dimension_numbers = #tpu.dot_dimension_numbers<[1], [0], [0], [1], [0, 0, 1, 1], [], []>} : vector<8x128xf32>, vector<128x512xf32>, vector<8x512xf32> -> vector<8x512xf32>
    %57 = arith.addf %55, %56 : vector<8x512xf32>
    %58 = vector.extract_strided_slice %57 {offsets = [0, 0], sizes = [8, 384], strides = [1, 1]} : vector<8x512xf32> to vector<8x384xf32>
    %59 = arith.negf %58 : vector<8x384xf32>
    %60 = math.exp %59 : vector<8x384xf32>
    %cst_17 = arith.constant 1.000000e+00 : f32
    %61 = vector.broadcast %cst_17 : f32 to vector<8x384xf32>
    %62 = arith.addf %61, %60 : vector<8x384xf32>
    %63 = arith.divf %61, %62 : vector<8x384xf32>
    %64 = vector.extract_strided_slice %57 {offsets = [0, 384], sizes = [8, 128], strides = [1, 1]} : vector<8x512xf32> to vector<8x128xf32>
    %65 = math.tanh %64 : vector<8x128xf32>
    %66 = vector.extract_strided_slice %63 {offsets = [0, 0], sizes = [8, 128], strides = [1, 1]} : vector<8x384xf32> to vector<8x128xf32>
    %67 = vector.extract_strided_slice %63 {offsets = [0, 128], sizes = [8, 128], strides = [1, 1]} : vector<8x384xf32> to vector<8x128xf32>
    %68 = vector.extract_strided_slice %63 {offsets = [0, 256], sizes = [8, 128], strides = [1, 1]} : vector<8x384xf32> to vector<8x128xf32>
    %69 = arith.mulf %67, %46 : vector<8x128xf32>
    %70 = arith.mulf %66, %65 : vector<8x128xf32>
    %71 = arith.addf %69, %70 : vector<8x128xf32>
    %72 = math.tanh %71 : vector<8x128xf32>
    %73 = arith.mulf %68, %72 : vector<8x128xf32>
    %74 = arith.index_cast %c2_i32 : i32 to index
    %c0_18 = arith.constant 0 : index
    %c0_19 = arith.constant 0 : index
    %75 = vector.load %arg5[%74, %c0_18, %c0_19] : memref<8x8x128xf32, #tpu.memory_space<vmem>>, vector<1x8x128xf32>
    %76 = vector.shape_cast %75 : vector<1x8x128xf32> to vector<8x128xf32>
    %77 = vector.shape_cast %73 : vector<8x128xf32> to vector<1x8x128xf32>
    tpu.vector_store %arg5[%74, %c0_18, %c0_19], %77 {strides = array<i32>} : memref<8x8x128xf32, #tpu.memory_space<vmem>>, vector<1x8x128xf32>,
    %c3_i32 = arith.constant 3 : i32
    %78 = arith.index_cast %c3_i32 : i32 to index
    %c0_20 = arith.constant 0 : index
    %c0_21 = arith.constant 0 : index
    %79 = vector.load %arg0[%78, %c0_20, %c0_21] : memref<8x8x512xf32, #tpu.memory_space<vmem>>, vector<1x8x512xf32>
    %80 = vector.shape_cast %79 : vector<1x8x512xf32> to vector<8x512xf32>
    %cst_22 = arith.constant dense<0.000000e+00> : vector<8x512xf32>
    %81 = tpu.matmul %73, %0, %cst_22 {dimension_numbers = #tpu.dot_dimension_numbers<[1], [0], [0], [1], [0, 0, 1, 1], [], []>} : vector<8x128xf32>, vector<128x512xf32>, vector<8x512xf32> -> vector<8x512xf32>
    %82 = arith.addf %80, %81 : vector<8x512xf32>
    %83 = vector.extract_strided_slice %82 {offsets = [0, 0], sizes = [8, 384], strides = [1, 1]} : vector<8x512xf32> to vector<8x384xf32>
    %84 = arith.negf %83 : vector<8x384xf32>
    %85 = math.exp %84 : vector<8x384xf32>
    %cst_23 = arith.constant 1.000000e+00 : f32
    %86 = vector.broadcast %cst_23 : f32 to vector<8x384xf32>
    %87 = arith.addf %86, %85 : vector<8x384xf32>
    %88 = arith.divf %86, %87 : vector<8x384xf32>
    %89 = vector.extract_strided_slice %82 {offsets = [0, 384], sizes = [8, 128], strides = [1, 1]} : vector<8x512xf32> to vector<8x128xf32>
    %90 = math.tanh %89 : vector<8x128xf32>
    %91 = vector.extract_strided_slice %88 {offsets = [0, 0], sizes = [8, 128], strides = [1, 1]} : vector<8x384xf32> to vector<8x128xf32>
    %92 = vector.extract_strided_slice %88 {offsets = [0, 128], sizes = [8, 128], strides = [1, 1]} : vector<8x384xf32> to vector<8x128xf32>
    %93 = vector.extract_strided_slice %88 {offsets = [0, 256], sizes = [8, 128], strides = [1, 1]} : vector<8x384xf32> to vector<8x128xf32>
    %94 = arith.mulf %92, %71 : vector<8x128xf32>
    %95 = arith.mulf %91, %90 : vector<8x128xf32>
    %96 = arith.addf %94, %95 : vector<8x128xf32>
    %97 = math.tanh %96 : vector<8x128xf32>
    %98 = arith.mulf %93, %97 : vector<8x128xf32>
    %99 = arith.index_cast %c3_i32 : i32 to index
    %c0_24 = arith.constant 0 : index
    %c0_25 = arith.constant 0 : index
    %100 = vector.load %arg5[%99, %c0_24, %c0_25] : memref<8x8x128xf32, #tpu.memory_space<vmem>>, vector<1x8x128xf32>
    %101 = vector.shape_cast %100 : vector<1x8x128xf32> to vector<8x128xf32>
    %102 = vector.shape_cast %98 : vector<8x128xf32> to vector<1x8x128xf32>
    tpu.vector_store %arg5[%99, %c0_24, %c0_25], %102 {strides = array<i32>} : memref<8x8x128xf32, #tpu.memory_space<vmem>>, vector<1x8x128xf32>,
    %c4_i32 = arith.constant 4 : i32
    %103 = arith.index_cast %c4_i32 : i32 to index
    %c0_26 = arith.constant 0 : index
    %c0_27 = arith.constant 0 : index
    %104 = vector.load %arg0[%103, %c0_26, %c0_27] : memref<8x8x512xf32, #tpu.memory_space<vmem>>, vector<1x8x512xf32>
    %105 = vector.shape_cast %104 : vector<1x8x512xf32> to vector<8x512xf32>
    %cst_28 = arith.constant dense<0.000000e+00> : vector<8x512xf32>
    %106 = tpu.matmul %98, %0, %cst_28 {dimension_numbers = #tpu.dot_dimension_numbers<[1], [0], [0], [1], [0, 0, 1, 1], [], []>} : vector<8x128xf32>, vector<128x512xf32>, vector<8x512xf32> -> vector<8x512xf32>
    %107 = arith.addf %105, %106 : vector<8x512xf32>
    %108 = vector.extract_strided_slice %107 {offsets = [0, 0], sizes = [8, 384], strides = [1, 1]} : vector<8x512xf32> to vector<8x384xf32>
    %109 = arith.negf %108 : vector<8x384xf32>
    %110 = math.exp %109 : vector<8x384xf32>
    %cst_29 = arith.constant 1.000000e+00 : f32
    %111 = vector.broadcast %cst_29 : f32 to vector<8x384xf32>
    %112 = arith.addf %111, %110 : vector<8x384xf32>
    %113 = arith.divf %111, %112 : vector<8x384xf32>
    %114 = vector.extract_strided_slice %107 {offsets = [0, 384], sizes = [8, 128], strides = [1, 1]} : vector<8x512xf32> to vector<8x128xf32>
    %115 = math.tanh %114 : vector<8x128xf32>
    %116 = vector.extract_strided_slice %113 {offsets = [0, 0], sizes = [8, 128], strides = [1, 1]} : vector<8x384xf32> to vector<8x128xf32>
    %117 = vector.extract_strided_slice %113 {offsets = [0, 128], sizes = [8, 128], strides = [1, 1]} : vector<8x384xf32> to vector<8x128xf32>
    %118 = vector.extract_strided_slice %113 {offsets = [0, 256], sizes = [8, 128], strides = [1, 1]} : vector<8x384xf32> to vector<8x128xf32>
    %119 = arith.mulf %117, %96 : vector<8x128xf32>
    %120 = arith.mulf %116, %115 : vector<8x128xf32>
    %121 = arith.addf %119, %120 : vector<8x128xf32>
    %122 = math.tanh %121 : vector<8x128xf32>
    %123 = arith.mulf %118, %122 : vector<8x128xf32>
    %124 = arith.index_cast %c4_i32 : i32 to index
    %c0_30 = arith.constant 0 : index
    %c0_31 = arith.constant 0 : index
    %125 = vector.load %arg5[%124, %c0_30, %c0_31] : memref<8x8x128xf32, #tpu.memory_space<vmem>>, vector<1x8x128xf32>
    %126 = vector.shape_cast %125 : vector<1x8x128xf32> to vector<8x128xf32>
    %127 = vector.shape_cast %123 : vector<8x128xf32> to vector<1x8x128xf32>
    tpu.vector_store %arg5[%124, %c0_30, %c0_31], %127 {strides = array<i32>} : memref<8x8x128xf32, #tpu.memory_space<vmem>>, vector<1x8x128xf32>,
    %c5_i32 = arith.constant 5 : i32
    %128 = arith.index_cast %c5_i32 : i32 to index
    %c0_32 = arith.constant 0 : index
    %c0_33 = arith.constant 0 : index
    %129 = vector.load %arg0[%128, %c0_32, %c0_33] : memref<8x8x512xf32, #tpu.memory_space<vmem>>, vector<1x8x512xf32>
    %130 = vector.shape_cast %129 : vector<1x8x512xf32> to vector<8x512xf32>
    %cst_34 = arith.constant dense<0.000000e+00> : vector<8x512xf32>
    %131 = tpu.matmul %123, %0, %cst_34 {dimension_numbers = #tpu.dot_dimension_numbers<[1], [0], [0], [1], [0, 0, 1, 1], [], []>} : vector<8x128xf32>, vector<128x512xf32>, vector<8x512xf32> -> vector<8x512xf32>
    %132 = arith.addf %130, %131 : vector<8x512xf32>
    %133 = vector.extract_strided_slice %132 {offsets = [0, 0], sizes = [8, 384], strides = [1, 1]} : vector<8x512xf32> to vector<8x384xf32>
    %134 = arith.negf %133 : vector<8x384xf32>
    %135 = math.exp %134 : vector<8x384xf32>
    %cst_35 = arith.constant 1.000000e+00 : f32
    %136 = vector.broadcast %cst_35 : f32 to vector<8x384xf32>
    %137 = arith.addf %136, %135 : vector<8x384xf32>
    %138 = arith.divf %136, %137 : vector<8x384xf32>
    %139 = vector.extract_strided_slice %132 {offsets = [0, 384], sizes = [8, 128], strides = [1, 1]} : vector<8x512xf32> to vector<8x128xf32>
    %140 = math.tanh %139 : vector<8x128xf32>
    %141 = vector.extract_strided_slice %138 {offsets = [0, 0], sizes = [8, 128], strides = [1, 1]} : vector<8x384xf32> to vector<8x128xf32>
    %142 = vector.extract_strided_slice %138 {offsets = [0, 128], sizes = [8, 128], strides = [1, 1]} : vector<8x384xf32> to vector<8x128xf32>
    %143 = vector.extract_strided_slice %138 {offsets = [0, 256], sizes = [8, 128], strides = [1, 1]} : vector<8x384xf32> to vector<8x128xf32>
    %144 = arith.mulf %142, %121 : vector<8x128xf32>
    %145 = arith.mulf %141, %140 : vector<8x128xf32>
    %146 = arith.addf %144, %145 : vector<8x128xf32>
    %147 = math.tanh %146 : vector<8x128xf32>
    %148 = arith.mulf %143, %147 : vector<8x128xf32>
    %149 = arith.index_cast %c5_i32 : i32 to index
    %c0_36 = arith.constant 0 : index
    %c0_37 = arith.constant 0 : index
    %150 = vector.load %arg5[%149, %c0_36, %c0_37] : memref<8x8x128xf32, #tpu.memory_space<vmem>>, vector<1x8x128xf32>
    %151 = vector.shape_cast %150 : vector<1x8x128xf32> to vector<8x128xf32>
    %152 = vector.shape_cast %148 : vector<8x128xf32> to vector<1x8x128xf32>
    tpu.vector_store %arg5[%149, %c0_36, %c0_37], %152 {strides = array<i32>} : memref<8x8x128xf32, #tpu.memory_space<vmem>>, vector<1x8x128xf32>,
    %c6_i32 = arith.constant 6 : i32
    %153 = arith.index_cast %c6_i32 : i32 to index
    %c0_38 = arith.constant 0 : index
    %c0_39 = arith.constant 0 : index
    %154 = vector.load %arg0[%153, %c0_38, %c0_39] : memref<8x8x512xf32, #tpu.memory_space<vmem>>, vector<1x8x512xf32>
    %155 = vector.shape_cast %154 : vector<1x8x512xf32> to vector<8x512xf32>
    %cst_40 = arith.constant dense<0.000000e+00> : vector<8x512xf32>
    %156 = tpu.matmul %148, %0, %cst_40 {dimension_numbers = #tpu.dot_dimension_numbers<[1], [0], [0], [1], [0, 0, 1, 1], [], []>} : vector<8x128xf32>, vector<128x512xf32>, vector<8x512xf32> -> vector<8x512xf32>
    %157 = arith.addf %155, %156 : vector<8x512xf32>
    %158 = vector.extract_strided_slice %157 {offsets = [0, 0], sizes = [8, 384], strides = [1, 1]} : vector<8x512xf32> to vector<8x384xf32>
    %159 = arith.negf %158 : vector<8x384xf32>
    %160 = math.exp %159 : vector<8x384xf32>
    %cst_41 = arith.constant 1.000000e+00 : f32
    %161 = vector.broadcast %cst_41 : f32 to vector<8x384xf32>
    %162 = arith.addf %161, %160 : vector<8x384xf32>
    %163 = arith.divf %161, %162 : vector<8x384xf32>
    %164 = vector.extract_strided_slice %157 {offsets = [0, 384], sizes = [8, 128], strides = [1, 1]} : vector<8x512xf32> to vector<8x128xf32>
    %165 = math.tanh %164 : vector<8x128xf32>
    %166 = vector.extract_strided_slice %163 {offsets = [0, 0], sizes = [8, 128], strides = [1, 1]} : vector<8x384xf32> to vector<8x128xf32>
    %167 = vector.extract_strided_slice %163 {offsets = [0, 128], sizes = [8, 128], strides = [1, 1]} : vector<8x384xf32> to vector<8x128xf32>
    %168 = vector.extract_strided_slice %163 {offsets = [0, 256], sizes = [8, 128], strides = [1, 1]} : vector<8x384xf32> to vector<8x128xf32>
    %169 = arith.mulf %167, %146 : vector<8x128xf32>
    %170 = arith.mulf %166, %165 : vector<8x128xf32>
    %171 = arith.addf %169, %170 : vector<8x128xf32>
    %172 = math.tanh %171 : vector<8x128xf32>
    %173 = arith.mulf %168, %172 : vector<8x128xf32>
    %174 = arith.index_cast %c6_i32 : i32 to index
    %c0_42 = arith.constant 0 : index
    %c0_43 = arith.constant 0 : index
    %175 = vector.load %arg5[%174, %c0_42, %c0_43] : memref<8x8x128xf32, #tpu.memory_space<vmem>>, vector<1x8x128xf32>
    %176 = vector.shape_cast %175 : vector<1x8x128xf32> to vector<8x128xf32>
    %177 = vector.shape_cast %173 : vector<8x128xf32> to vector<1x8x128xf32>
    tpu.vector_store %arg5[%174, %c0_42, %c0_43], %177 {strides = array<i32>} : memref<8x8x128xf32, #tpu.memory_space<vmem>>, vector<1x8x128xf32>,
    %c7_i32 = arith.constant 7 : i32
    %178 = arith.index_cast %c7_i32 : i32 to index
    %c0_44 = arith.constant 0 : index
    %c0_45 = arith.constant 0 : index
    %179 = vector.load %arg0[%178, %c0_44, %c0_45] : memref<8x8x512xf32, #tpu.memory_space<vmem>>, vector<1x8x512xf32>
    %180 = vector.shape_cast %179 : vector<1x8x512xf32> to vector<8x512xf32>
    %cst_46 = arith.constant dense<0.000000e+00> : vector<8x512xf32>
    %181 = tpu.matmul %173, %0, %cst_46 {dimension_numbers = #tpu.dot_dimension_numbers<[1], [0], [0], [1], [0, 0, 1, 1], [], []>} : vector<8x128xf32>, vector<128x512xf32>, vector<8x512xf32> -> vector<8x512xf32>
    %182 = arith.addf %180, %181 : vector<8x512xf32>
    %183 = vector.extract_strided_slice %182 {offsets = [0, 0], sizes = [8, 384], strides = [1, 1]} : vector<8x512xf32> to vector<8x384xf32>
    %184 = arith.negf %183 : vector<8x384xf32>
    %185 = math.exp %184 : vector<8x384xf32>
    %cst_47 = arith.constant 1.000000e+00 : f32
    %186 = vector.broadcast %cst_47 : f32 to vector<8x384xf32>
    %187 = arith.addf %186, %185 : vector<8x384xf32>
    %188 = arith.divf %186, %187 : vector<8x384xf32>
    %189 = vector.extract_strided_slice %182 {offsets = [0, 384], sizes = [8, 128], strides = [1, 1]} : vector<8x512xf32> to vector<8x128xf32>
    %190 = math.tanh %189 : vector<8x128xf32>
    %191 = vector.extract_strided_slice %188 {offsets = [0, 0], sizes = [8, 128], strides = [1, 1]} : vector<8x384xf32> to vector<8x128xf32>
    %192 = vector.extract_strided_slice %188 {offsets = [0, 128], sizes = [8, 128], strides = [1, 1]} : vector<8x384xf32> to vector<8x128xf32>
    %193 = vector.extract_strided_slice %188 {offsets = [0, 256], sizes = [8, 128], strides = [1, 1]} : vector<8x384xf32> to vector<8x128xf32>
    %194 = arith.mulf %192, %171 : vector<8x128xf32>
    %195 = arith.mulf %191, %190 : vector<8x128xf32>
    %196 = arith.addf %194, %195 : vector<8x128xf32>
    %197 = math.tanh %196 : vector<8x128xf32>
    %198 = arith.mulf %193, %197 : vector<8x128xf32>
    %199 = arith.index_cast %c7_i32 : i32 to index
    %c0_48 = arith.constant 0 : index
    %c0_49 = arith.constant 0 : index
    %200 = vector.load %arg5[%199, %c0_48, %c0_49] : memref<8x8x128xf32, #tpu.memory_space<vmem>>, vector<1x8x128xf32>
    %201 = vector.shape_cast %200 : vector<1x8x128xf32> to vector<8x128xf32>
    %202 = vector.shape_cast %198 : vector<8x128xf32> to vector<1x8x128xf32>
    tpu.vector_store %arg5[%199, %c0_48, %c0_49], %202 {strides = array<i32>} : memref<8x8x128xf32, #tpu.memory_space<vmem>>, vector<1x8x128xf32>,
    %c8_i32 = arith.constant 8 : i32
    %c0_50 = arith.constant 0 : index
    %c0_51 = arith.constant 0 : index
    %c0_52 = arith.constant 0 : index
    %203 = vector.load %arg5[%c0_50, %c0_51, %c0_52] : memref<8x8x128xf32, #tpu.memory_space<vmem>>, vector<8x8x128xf32>
    %204 = vector.shape_cast %203 : vector<8x8x128xf32> to vector<64x128xf32>
    %c0_53 = arith.constant 0 : index
    %c0_54 = arith.constant 0 : index
    %205 = vector.load %arg2[%c0_53, %c0_54] : memref<128x512xf32, #tpu.memory_space<vmem>>, vector<128x512xf32>
    %cst_55 = arith.constant dense<0.000000e+00> : vector<64x512xf32>
    %206 = tpu.matmul %204, %205, %cst_55 {dimension_numbers = #tpu.dot_dimension_numbers<[1], [0], [0], [1], [0, 0, 1, 1], [], []>} : vector<64x128xf32>, vector<128x512xf32>, vector<64x512xf32> -> vector<64x512xf32>
    %c0_56 = arith.constant 0 : index
    %c0_57 = arith.constant 0 : index
    %207 = vector.load %arg4[%c0_56, %c0_57] : memref<1x512xf32, #tpu.memory_space<vmem>>, vector<1x512xf32>
    %208 = vector.broadcast %207 : vector<1x512xf32> to vector<64x512xf32>
    %209 = arith.addf %206, %208 : vector<64x512xf32>
    %210 = vector.shape_cast %209 : vector<64x512xf32> to vector<8x8x512xf32>
    %c0_58 = arith.constant 0 : index
    %c0_59 = arith.constant 0 : index
    %c0_60 = arith.constant 0 : index
    %211 = vector.load %arg6[%c0_58, %c0_59, %c0_60] : memref<8x8x512xf32, #tpu.memory_space<vmem>>, vector<8x8x512xf32>
    tpu.vector_store %arg6[%c0_58, %c0_59, %c0_60], %210 {strides = array<i32>} : memref<8x8x512xf32, #tpu.memory_space<vmem>>, vector<8x8x512xf32>,
    %c0_61 = arith.constant 0 : index
    %c0_62 = arith.constant 0 : index
    %212 = vector.load %arg3[%c0_61, %c0_62] : memref<128x512xf32, #tpu.memory_space<vmem>>, vector<128x512xf32>
    %cst_63 = arith.constant 0.000000e+00 : f32
    %213 = vector.broadcast %cst_63 : f32 to vector<8x128xf32>
    %cst_64 = arith.constant 0.000000e+00 : f32
    %214 = vector.broadcast %cst_64 : f32 to vector<8x128xf32>
    %c0_i32_65 = arith.constant 0 : i32
    %215 = arith.index_cast %c0_i32_65 : i32 to index
    %c0_66 = arith.constant 0 : index
    %c0_67 = arith.constant 0 : index
    %216 = vector.load %arg6[%215, %c0_66, %c0_67] : memref<8x8x512xf32, #tpu.memory_space<vmem>>, vector<1x8x512xf32>
    %217 = vector.shape_cast %216 : vector<1x8x512xf32> to vector<8x512xf32>
    %cst_68 = arith.constant dense<0.000000e+00> : vector<8x512xf32>
    %218 = tpu.matmul %213, %212, %cst_68 {dimension_numbers = #tpu.dot_dimension_numbers<[1], [0], [0], [1], [0, 0, 1, 1], [], []>} : vector<8x128xf32>, vector<128x512xf32>, vector<8x512xf32> -> vector<8x512xf32>
    %219 = arith.addf %217, %218 : vector<8x512xf32>
    %220 = vector.extract_strided_slice %219 {offsets = [0, 0], sizes = [8, 384], strides = [1, 1]} : vector<8x512xf32> to vector<8x384xf32>
    %221 = arith.negf %220 : vector<8x384xf32>
    %222 = math.exp %221 : vector<8x384xf32>
    %cst_69 = arith.constant 1.000000e+00 : f32
    %223 = vector.broadcast %cst_69 : f32 to vector<8x384xf32>
    %224 = arith.addf %223, %222 : vector<8x384xf32>
    %225 = arith.divf %223, %224 : vector<8x384xf32>
    %226 = vector.extract_strided_slice %219 {offsets = [0, 384], sizes = [8, 128], strides = [1, 1]} : vector<8x512xf32> to vector<8x128xf32>
    %227 = math.tanh %226 : vector<8x128xf32>
    %228 = vector.extract_strided_slice %225 {offsets = [0, 0], sizes = [8, 128], strides = [1, 1]} : vector<8x384xf32> to vector<8x128xf32>
    %229 = vector.extract_strided_slice %225 {offsets = [0, 128], sizes = [8, 128], strides = [1, 1]} : vector<8x384xf32> to vector<8x128xf32>
    %230 = vector.extract_strided_slice %225 {offsets = [0, 256], sizes = [8, 128], strides = [1, 1]} : vector<8x384xf32> to vector<8x128xf32>
    %231 = arith.mulf %229, %214 : vector<8x128xf32>
    %232 = arith.mulf %228, %227 : vector<8x128xf32>
    %233 = arith.addf %231, %232 : vector<8x128xf32>
    %234 = math.tanh %233 : vector<8x128xf32>
    %235 = arith.mulf %230, %234 : vector<8x128xf32>
    %236 = arith.index_cast %c0_i32_65 : i32 to index
    %c0_70 = arith.constant 0 : index
    %c0_71 = arith.constant 0 : index
    %237 = vector.load %arg5[%236, %c0_70, %c0_71] : memref<8x8x128xf32, #tpu.memory_space<vmem>>, vector<1x8x128xf32>
    %238 = vector.shape_cast %237 : vector<1x8x128xf32> to vector<8x128xf32>
    %239 = vector.shape_cast %235 : vector<8x128xf32> to vector<1x8x128xf32>
    tpu.vector_store %arg5[%236, %c0_70, %c0_71], %239 {strides = array<i32>} : memref<8x8x128xf32, #tpu.memory_space<vmem>>, vector<1x8x128xf32>,
    %c1_i32_72 = arith.constant 1 : i32
    %240 = arith.index_cast %c1_i32_72 : i32 to index
    %c0_73 = arith.constant 0 : index
    %c0_74 = arith.constant 0 : index
    %241 = vector.load %arg6[%240, %c0_73, %c0_74] : memref<8x8x512xf32, #tpu.memory_space<vmem>>, vector<1x8x512xf32>
    %242 = vector.shape_cast %241 : vector<1x8x512xf32> to vector<8x512xf32>
    %cst_75 = arith.constant dense<0.000000e+00> : vector<8x512xf32>
    %243 = tpu.matmul %235, %212, %cst_75 {dimension_numbers = #tpu.dot_dimension_numbers<[1], [0], [0], [1], [0, 0, 1, 1], [], []>} : vector<8x128xf32>, vector<128x512xf32>, vector<8x512xf32> -> vector<8x512xf32>
    %244 = arith.addf %242, %243 : vector<8x512xf32>
    %245 = vector.extract_strided_slice %244 {offsets = [0, 0], sizes = [8, 384], strides = [1, 1]} : vector<8x512xf32> to vector<8x384xf32>
    %246 = arith.negf %245 : vector<8x384xf32>
    %247 = math.exp %246 : vector<8x384xf32>
    %cst_76 = arith.constant 1.000000e+00 : f32
    %248 = vector.broadcast %cst_76 : f32 to vector<8x384xf32>
    %249 = arith.addf %248, %247 : vector<8x384xf32>
    %250 = arith.divf %248, %249 : vector<8x384xf32>
    %251 = vector.extract_strided_slice %244 {offsets = [0, 384], sizes = [8, 128], strides = [1, 1]} : vector<8x512xf32> to vector<8x128xf32>
    %252 = math.tanh %251 : vector<8x128xf32>
    %253 = vector.extract_strided_slice %250 {offsets = [0, 0], sizes = [8, 128], strides = [1, 1]} : vector<8x384xf32> to vector<8x128xf32>
    %254 = vector.extract_strided_slice %250 {offsets = [0, 128], sizes = [8, 128], strides = [1, 1]} : vector<8x384xf32> to vector<8x128xf32>
    %255 = vector.extract_strided_slice %250 {offsets = [0, 256], sizes = [8, 128], strides = [1, 1]} : vector<8x384xf32> to vector<8x128xf32>
    %256 = arith.mulf %254, %233 : vector<8x128xf32>
    %257 = arith.mulf %253, %252 : vector<8x128xf32>
    %258 = arith.addf %256, %257 : vector<8x128xf32>
    %259 = math.tanh %258 : vector<8x128xf32>
    %260 = arith.mulf %255, %259 : vector<8x128xf32>
    %261 = arith.index_cast %c1_i32_72 : i32 to index
    %c0_77 = arith.constant 0 : index
    %c0_78 = arith.constant 0 : index
    %262 = vector.load %arg5[%261, %c0_77, %c0_78] : memref<8x8x128xf32, #tpu.memory_space<vmem>>, vector<1x8x128xf32>
    %263 = vector.shape_cast %262 : vector<1x8x128xf32> to vector<8x128xf32>
    %264 = vector.shape_cast %260 : vector<8x128xf32> to vector<1x8x128xf32>
    tpu.vector_store %arg5[%261, %c0_77, %c0_78], %264 {strides = array<i32>} : memref<8x8x128xf32, #tpu.memory_space<vmem>>, vector<1x8x128xf32>,
    %c2_i32_79 = arith.constant 2 : i32
    %265 = arith.index_cast %c2_i32_79 : i32 to index
    %c0_80 = arith.constant 0 : index
    %c0_81 = arith.constant 0 : index
    %266 = vector.load %arg6[%265, %c0_80, %c0_81] : memref<8x8x512xf32, #tpu.memory_space<vmem>>, vector<1x8x512xf32>
    %267 = vector.shape_cast %266 : vector<1x8x512xf32> to vector<8x512xf32>
    %cst_82 = arith.constant dense<0.000000e+00> : vector<8x512xf32>
    %268 = tpu.matmul %260, %212, %cst_82 {dimension_numbers = #tpu.dot_dimension_numbers<[1], [0], [0], [1], [0, 0, 1, 1], [], []>} : vector<8x128xf32>, vector<128x512xf32>, vector<8x512xf32> -> vector<8x512xf32>
    %269 = arith.addf %267, %268 : vector<8x512xf32>
    %270 = vector.extract_strided_slice %269 {offsets = [0, 0], sizes = [8, 384], strides = [1, 1]} : vector<8x512xf32> to vector<8x384xf32>
    %271 = arith.negf %270 : vector<8x384xf32>
    %272 = math.exp %271 : vector<8x384xf32>
    %cst_83 = arith.constant 1.000000e+00 : f32
    %273 = vector.broadcast %cst_83 : f32 to vector<8x384xf32>
    %274 = arith.addf %273, %272 : vector<8x384xf32>
    %275 = arith.divf %273, %274 : vector<8x384xf32>
    %276 = vector.extract_strided_slice %269 {offsets = [0, 384], sizes = [8, 128], strides = [1, 1]} : vector<8x512xf32> to vector<8x128xf32>
    %277 = math.tanh %276 : vector<8x128xf32>
    %278 = vector.extract_strided_slice %275 {offsets = [0, 0], sizes = [8, 128], strides = [1, 1]} : vector<8x384xf32> to vector<8x128xf32>
    %279 = vector.extract_strided_slice %275 {offsets = [0, 128], sizes = [8, 128], strides = [1, 1]} : vector<8x384xf32> to vector<8x128xf32>
    %280 = vector.extract_strided_slice %275 {offsets = [0, 256], sizes = [8, 128], strides = [1, 1]} : vector<8x384xf32> to vector<8x128xf32>
    %281 = arith.mulf %279, %258 : vector<8x128xf32>
    %282 = arith.mulf %278, %277 : vector<8x128xf32>
    %283 = arith.addf %281, %282 : vector<8x128xf32>
    %284 = math.tanh %283 : vector<8x128xf32>
    %285 = arith.mulf %280, %284 : vector<8x128xf32>
    %286 = arith.index_cast %c2_i32_79 : i32 to index
    %c0_84 = arith.constant 0 : index
    %c0_85 = arith.constant 0 : index
    %287 = vector.load %arg5[%286, %c0_84, %c0_85] : memref<8x8x128xf32, #tpu.memory_space<vmem>>, vector<1x8x128xf32>
    %288 = vector.shape_cast %287 : vector<1x8x128xf32> to vector<8x128xf32>
    %289 = vector.shape_cast %285 : vector<8x128xf32> to vector<1x8x128xf32>
    tpu.vector_store %arg5[%286, %c0_84, %c0_85], %289 {strides = array<i32>} : memref<8x8x128xf32, #tpu.memory_space<vmem>>, vector<1x8x128xf32>,
    %c3_i32_86 = arith.constant 3 : i32
    %290 = arith.index_cast %c3_i32_86 : i32 to index
    %c0_87 = arith.constant 0 : index
    %c0_88 = arith.constant 0 : index
    %291 = vector.load %arg6[%290, %c0_87, %c0_88] : memref<8x8x512xf32, #tpu.memory_space<vmem>>, vector<1x8x512xf32>
    %292 = vector.shape_cast %291 : vector<1x8x512xf32> to vector<8x512xf32>
    %cst_89 = arith.constant dense<0.000000e+00> : vector<8x512xf32>
    %293 = tpu.matmul %285, %212, %cst_89 {dimension_numbers = #tpu.dot_dimension_numbers<[1], [0], [0], [1], [0, 0, 1, 1], [], []>} : vector<8x128xf32>, vector<128x512xf32>, vector<8x512xf32> -> vector<8x512xf32>
    %294 = arith.addf %292, %293 : vector<8x512xf32>
    %295 = vector.extract_strided_slice %294 {offsets = [0, 0], sizes = [8, 384], strides = [1, 1]} : vector<8x512xf32> to vector<8x384xf32>
    %296 = arith.negf %295 : vector<8x384xf32>
    %297 = math.exp %296 : vector<8x384xf32>
    %cst_90 = arith.constant 1.000000e+00 : f32
    %298 = vector.broadcast %cst_90 : f32 to vector<8x384xf32>
    %299 = arith.addf %298, %297 : vector<8x384xf32>
    %300 = arith.divf %298, %299 : vector<8x384xf32>
    %301 = vector.extract_strided_slice %294 {offsets = [0, 384], sizes = [8, 128], strides = [1, 1]} : vector<8x512xf32> to vector<8x128xf32>
    %302 = math.tanh %301 : vector<8x128xf32>
    %303 = vector.extract_strided_slice %300 {offsets = [0, 0], sizes = [8, 128], strides = [1, 1]} : vector<8x384xf32> to vector<8x128xf32>
    %304 = vector.extract_strided_slice %300 {offsets = [0, 128], sizes = [8, 128], strides = [1, 1]} : vector<8x384xf32> to vector<8x128xf32>
    %305 = vector.extract_strided_slice %300 {offsets = [0, 256], sizes = [8, 128], strides = [1, 1]} : vector<8x384xf32> to vector<8x128xf32>
    %306 = arith.mulf %304, %283 : vector<8x128xf32>
    %307 = arith.mulf %303, %302 : vector<8x128xf32>
    %308 = arith.addf %306, %307 : vector<8x128xf32>
    %309 = math.tanh %308 : vector<8x128xf32>
    %310 = arith.mulf %305, %309 : vector<8x128xf32>
    %311 = arith.index_cast %c3_i32_86 : i32 to index
    %c0_91 = arith.constant 0 : index
    %c0_92 = arith.constant 0 : index
    %312 = vector.load %arg5[%311, %c0_91, %c0_92] : memref<8x8x128xf32, #tpu.memory_space<vmem>>, vector<1x8x128xf32>
    %313 = vector.shape_cast %312 : vector<1x8x128xf32> to vector<8x128xf32>
    %314 = vector.shape_cast %310 : vector<8x128xf32> to vector<1x8x128xf32>
    tpu.vector_store %arg5[%311, %c0_91, %c0_92], %314 {strides = array<i32>} : memref<8x8x128xf32, #tpu.memory_space<vmem>>, vector<1x8x128xf32>,
    %c4_i32_93 = arith.constant 4 : i32
    %315 = arith.index_cast %c4_i32_93 : i32 to index
    %c0_94 = arith.constant 0 : index
    %c0_95 = arith.constant 0 : index
    %316 = vector.load %arg6[%315, %c0_94, %c0_95] : memref<8x8x512xf32, #tpu.memory_space<vmem>>, vector<1x8x512xf32>
    %317 = vector.shape_cast %316 : vector<1x8x512xf32> to vector<8x512xf32>
    %cst_96 = arith.constant dense<0.000000e+00> : vector<8x512xf32>
    %318 = tpu.matmul %310, %212, %cst_96 {dimension_numbers = #tpu.dot_dimension_numbers<[1], [0], [0], [1], [0, 0, 1, 1], [], []>} : vector<8x128xf32>, vector<128x512xf32>, vector<8x512xf32> -> vector<8x512xf32>
    %319 = arith.addf %317, %318 : vector<8x512xf32>
    %320 = vector.extract_strided_slice %319 {offsets = [0, 0], sizes = [8, 384], strides = [1, 1]} : vector<8x512xf32> to vector<8x384xf32>
    %321 = arith.negf %320 : vector<8x384xf32>
    %322 = math.exp %321 : vector<8x384xf32>
    %cst_97 = arith.constant 1.000000e+00 : f32
    %323 = vector.broadcast %cst_97 : f32 to vector<8x384xf32>
    %324 = arith.addf %323, %322 : vector<8x384xf32>
    %325 = arith.divf %323, %324 : vector<8x384xf32>
    %326 = vector.extract_strided_slice %319 {offsets = [0, 384], sizes = [8, 128], strides = [1, 1]} : vector<8x512xf32> to vector<8x128xf32>
    %327 = math.tanh %326 : vector<8x128xf32>
    %328 = vector.extract_strided_slice %325 {offsets = [0, 0], sizes = [8, 128], strides = [1, 1]} : vector<8x384xf32> to vector<8x128xf32>
    %329 = vector.extract_strided_slice %325 {offsets = [0, 128], sizes = [8, 128], strides = [1, 1]} : vector<8x384xf32> to vector<8x128xf32>
    %330 = vector.extract_strided_slice %325 {offsets = [0, 256], sizes = [8, 128], strides = [1, 1]} : vector<8x384xf32> to vector<8x128xf32>
    %331 = arith.mulf %329, %308 : vector<8x128xf32>
    %332 = arith.mulf %328, %327 : vector<8x128xf32>
    %333 = arith.addf %331, %332 : vector<8x128xf32>
    %334 = math.tanh %333 : vector<8x128xf32>
    %335 = arith.mulf %330, %334 : vector<8x128xf32>
    %336 = arith.index_cast %c4_i32_93 : i32 to index
    %c0_98 = arith.constant 0 : index
    %c0_99 = arith.constant 0 : index
    %337 = vector.load %arg5[%336, %c0_98, %c0_99] : memref<8x8x128xf32, #tpu.memory_space<vmem>>, vector<1x8x128xf32>
    %338 = vector.shape_cast %337 : vector<1x8x128xf32> to vector<8x128xf32>
    %339 = vector.shape_cast %335 : vector<8x128xf32> to vector<1x8x128xf32>
    tpu.vector_store %arg5[%336, %c0_98, %c0_99], %339 {strides = array<i32>} : memref<8x8x128xf32, #tpu.memory_space<vmem>>, vector<1x8x128xf32>,
    %c5_i32_100 = arith.constant 5 : i32
    %340 = arith.index_cast %c5_i32_100 : i32 to index
    %c0_101 = arith.constant 0 : index
    %c0_102 = arith.constant 0 : index
    %341 = vector.load %arg6[%340, %c0_101, %c0_102] : memref<8x8x512xf32, #tpu.memory_space<vmem>>, vector<1x8x512xf32>
    %342 = vector.shape_cast %341 : vector<1x8x512xf32> to vector<8x512xf32>
    %cst_103 = arith.constant dense<0.000000e+00> : vector<8x512xf32>
    %343 = tpu.matmul %335, %212, %cst_103 {dimension_numbers = #tpu.dot_dimension_numbers<[1], [0], [0], [1], [0, 0, 1, 1], [], []>} : vector<8x128xf32>, vector<128x512xf32>, vector<8x512xf32> -> vector<8x512xf32>
    %344 = arith.addf %342, %343 : vector<8x512xf32>
    %345 = vector.extract_strided_slice %344 {offsets = [0, 0], sizes = [8, 384], strides = [1, 1]} : vector<8x512xf32> to vector<8x384xf32>
    %346 = arith.negf %345 : vector<8x384xf32>
    %347 = math.exp %346 : vector<8x384xf32>
    %cst_104 = arith.constant 1.000000e+00 : f32
    %348 = vector.broadcast %cst_104 : f32 to vector<8x384xf32>
    %349 = arith.addf %348, %347 : vector<8x384xf32>
    %350 = arith.divf %348, %349 : vector<8x384xf32>
    %351 = vector.extract_strided_slice %344 {offsets = [0, 384], sizes = [8, 128], strides = [1, 1]} : vector<8x512xf32> to vector<8x128xf32>
    %352 = math.tanh %351 : vector<8x128xf32>
    %353 = vector.extract_strided_slice %350 {offsets = [0, 0], sizes = [8, 128], strides = [1, 1]} : vector<8x384xf32> to vector<8x128xf32>
    %354 = vector.extract_strided_slice %350 {offsets = [0, 128], sizes = [8, 128], strides = [1, 1]} : vector<8x384xf32> to vector<8x128xf32>
    %355 = vector.extract_strided_slice %350 {offsets = [0, 256], sizes = [8, 128], strides = [1, 1]} : vector<8x384xf32> to vector<8x128xf32>
    %356 = arith.mulf %354, %333 : vector<8x128xf32>
    %357 = arith.mulf %353, %352 : vector<8x128xf32>
    %358 = arith.addf %356, %357 : vector<8x128xf32>
    %359 = math.tanh %358 : vector<8x128xf32>
    %360 = arith.mulf %355, %359 : vector<8x128xf32>
    %361 = arith.index_cast %c5_i32_100 : i32 to index
    %c0_105 = arith.constant 0 : index
    %c0_106 = arith.constant 0 : index
    %362 = vector.load %arg5[%361, %c0_105, %c0_106] : memref<8x8x128xf32, #tpu.memory_space<vmem>>, vector<1x8x128xf32>
    %363 = vector.shape_cast %362 : vector<1x8x128xf32> to vector<8x128xf32>
    %364 = vector.shape_cast %360 : vector<8x128xf32> to vector<1x8x128xf32>
    tpu.vector_store %arg5[%361, %c0_105, %c0_106], %364 {strides = array<i32>} : memref<8x8x128xf32, #tpu.memory_space<vmem>>, vector<1x8x128xf32>,
    %c6_i32_107 = arith.constant 6 : i32
    %365 = arith.index_cast %c6_i32_107 : i32 to index
    %c0_108 = arith.constant 0 : index
    %c0_109 = arith.constant 0 : index
    %366 = vector.load %arg6[%365, %c0_108, %c0_109] : memref<8x8x512xf32, #tpu.memory_space<vmem>>, vector<1x8x512xf32>
    %367 = vector.shape_cast %366 : vector<1x8x512xf32> to vector<8x512xf32>
    %cst_110 = arith.constant dense<0.000000e+00> : vector<8x512xf32>
    %368 = tpu.matmul %360, %212, %cst_110 {dimension_numbers = #tpu.dot_dimension_numbers<[1], [0], [0], [1], [0, 0, 1, 1], [], []>} : vector<8x128xf32>, vector<128x512xf32>, vector<8x512xf32> -> vector<8x512xf32>
    %369 = arith.addf %367, %368 : vector<8x512xf32>
    %370 = vector.extract_strided_slice %369 {offsets = [0, 0], sizes = [8, 384], strides = [1, 1]} : vector<8x512xf32> to vector<8x384xf32>
    %371 = arith.negf %370 : vector<8x384xf32>
    %372 = math.exp %371 : vector<8x384xf32>
    %cst_111 = arith.constant 1.000000e+00 : f32
    %373 = vector.broadcast %cst_111 : f32 to vector<8x384xf32>
    %374 = arith.addf %373, %372 : vector<8x384xf32>
    %375 = arith.divf %373, %374 : vector<8x384xf32>
    %376 = vector.extract_strided_slice %369 {offsets = [0, 384], sizes = [8, 128], strides = [1, 1]} : vector<8x512xf32> to vector<8x128xf32>
    %377 = math.tanh %376 : vector<8x128xf32>
    %378 = vector.extract_strided_slice %375 {offsets = [0, 0], sizes = [8, 128], strides = [1, 1]} : vector<8x384xf32> to vector<8x128xf32>
    %379 = vector.extract_strided_slice %375 {offsets = [0, 128], sizes = [8, 128], strides = [1, 1]} : vector<8x384xf32> to vector<8x128xf32>
    %380 = vector.extract_strided_slice %375 {offsets = [0, 256], sizes = [8, 128], strides = [1, 1]} : vector<8x384xf32> to vector<8x128xf32>
    %381 = arith.mulf %379, %358 : vector<8x128xf32>
    %382 = arith.mulf %378, %377 : vector<8x128xf32>
    %383 = arith.addf %381, %382 : vector<8x128xf32>
    %384 = math.tanh %383 : vector<8x128xf32>
    %385 = arith.mulf %380, %384 : vector<8x128xf32>
    %386 = arith.index_cast %c6_i32_107 : i32 to index
    %c0_112 = arith.constant 0 : index
    %c0_113 = arith.constant 0 : index
    %387 = vector.load %arg5[%386, %c0_112, %c0_113] : memref<8x8x128xf32, #tpu.memory_space<vmem>>, vector<1x8x128xf32>
    %388 = vector.shape_cast %387 : vector<1x8x128xf32> to vector<8x128xf32>
    %389 = vector.shape_cast %385 : vector<8x128xf32> to vector<1x8x128xf32>
    tpu.vector_store %arg5[%386, %c0_112, %c0_113], %389 {strides = array<i32>} : memref<8x8x128xf32, #tpu.memory_space<vmem>>, vector<1x8x128xf32>,
    %c7_i32_114 = arith.constant 7 : i32
    %390 = arith.index_cast %c7_i32_114 : i32 to index
    %c0_115 = arith.constant 0 : index
    %c0_116 = arith.constant 0 : index
    %391 = vector.load %arg6[%390, %c0_115, %c0_116] : memref<8x8x512xf32, #tpu.memory_space<vmem>>, vector<1x8x512xf32>
    %392 = vector.shape_cast %391 : vector<1x8x512xf32> to vector<8x512xf32>
    %cst_117 = arith.constant dense<0.000000e+00> : vector<8x512xf32>
    %393 = tpu.matmul %385, %212, %cst_117 {dimension_numbers = #tpu.dot_dimension_numbers<[1], [0], [0], [1], [0, 0, 1, 1], [], []>} : vector<8x128xf32>, vector<128x512xf32>, vector<8x512xf32> -> vector<8x512xf32>
    %394 = arith.addf %392, %393 : vector<8x512xf32>
    %395 = vector.extract_strided_slice %394 {offsets = [0, 0], sizes = [8, 384], strides = [1, 1]} : vector<8x512xf32> to vector<8x384xf32>
    %396 = arith.negf %395 : vector<8x384xf32>
    %397 = math.exp %396 : vector<8x384xf32>
    %cst_118 = arith.constant 1.000000e+00 : f32
    %398 = vector.broadcast %cst_118 : f32 to vector<8x384xf32>
    %399 = arith.addf %398, %397 : vector<8x384xf32>
    %400 = arith.divf %398, %399 : vector<8x384xf32>
    %401 = vector.extract_strided_slice %394 {offsets = [0, 384], sizes = [8, 128], strides = [1, 1]} : vector<8x512xf32> to vector<8x128xf32>
    %402 = math.tanh %401 : vector<8x128xf32>
    %403 = vector.extract_strided_slice %400 {offsets = [0, 0], sizes = [8, 128], strides = [1, 1]} : vector<8x384xf32> to vector<8x128xf32>
    %404 = vector.extract_strided_slice %400 {offsets = [0, 128], sizes = [8, 128], strides = [1, 1]} : vector<8x384xf32> to vector<8x128xf32>
    %405 = vector.extract_strided_slice %400 {offsets = [0, 256], sizes = [8, 128], strides = [1, 1]} : vector<8x384xf32> to vector<8x128xf32>
    %406 = arith.mulf %404, %383 : vector<8x128xf32>
    %407 = arith.mulf %403, %402 : vector<8x128xf32>
    %408 = arith.addf %406, %407 : vector<8x128xf32>
    %409 = math.tanh %408 : vector<8x128xf32>
    %410 = arith.mulf %405, %409 : vector<8x128xf32>
    %411 = arith.index_cast %c7_i32_114 : i32 to index
    %c0_119 = arith.constant 0 : index
    %c0_120 = arith.constant 0 : index
    %412 = vector.load %arg5[%411, %c0_119, %c0_120] : memref<8x8x128xf32, #tpu.memory_space<vmem>>, vector<1x8x128xf32>
    %413 = vector.shape_cast %412 : vector<1x8x128xf32> to vector<8x128xf32>
    %414 = vector.shape_cast %410 : vector<8x128xf32> to vector<1x8x128xf32>
    tpu.vector_store %arg5[%411, %c0_119, %c0_120], %414 {strides = array<i32>} : memref<8x8x128xf32, #tpu.memory_space<vmem>>, vector<1x8x128xf32>,
    %c8_i32_121 = arith.constant 8 : i32
    return
  }
}

</mosaic_0001>

<bundles_post_ra>
// kernel: block_lstm_forward.1
= control target key start
LH: loop header
LB: loop body
LE: loop exit
PB: predicated region body
PF: predicated region fallthrough
CT: control target
= control target key end

     0   :  { %10 = vsyncpa [#allocation4], 0  ;;  %s5808_s0 = inlined_call_operand.vmem [shape: f32[8,8,512], index: 0, kind: input, shape index: {}]   ;;  %s5809_s1 = inlined_call_operand.vmem [shape: f32[128,512], index: 1, kind: input, shape index: {}]   ;;  %s5810_s2 = inlined_call_operand.hbm [shape: f32[128,512], index: 2, kind: input, shape index: {}]   ;;  %s5811_s3 = inlined_call_operand.hbm [shape: f32[128,512], index: 3, kind: input, shape index: {}]   ;;  %s5812_s4 = inlined_call_operand.vmem [shape: f32[1,512], index: 4, kind: input, shape index: {}]   ;;  %s5813_s5 = inlined_call_operand.vmem [shape: f32[8,8,128], index: 5, kind: output, shape index: {}]  }
   0x1   :  { %s20_s20 = sshll.u32 %s5810_s2, 4  ;;  %s21_s20 = int_to_ptr.hbm [resolvable:$true] %s20_s20 }
   0x2   :  { %11 = vsyncpa [#allocation6], 0  ;;  %s3448_s21 = smov [#allocation3]   ;;  %s33_s25 = sshll.u32 %s5811_s3, 4  ;;  %s34_s25 = int_to_ptr.hbm [resolvable:$true] %s33_s25 }
   0x3   :  { %s22_s22 = sshll.u32 %s3448_s21, 4  ;;  %s3449_s26 = smov 512   ;;  %s23_s22 = int_to_ptr.vmem [resolvable:$true] %s22_s22 }
   0x4   :  { %s3450_s27 = smov 32   ;;  %s3451_s28 = smov [#allocation5]  }
   0x5   :  { %28 = dma.hbm_to_vmem [thread:$0]  %s21_s20, 8192, %s23_s22, [#allocation4], %s3449_s26, %s3449_s26, %s3450_s27  }
   0x6   :  { %s35_s29 = sshll.u32 %s3451_s28, 4  ;;  %s36_s29 = int_to_ptr.vmem [resolvable:$true] %s35_s29 }
   0x7   :  { %41 = dma.hbm_to_vmem [thread:$0]  %s34_s25, 8192, %s36_s29, [#allocation6], %s3449_s26, %s3449_s26, %s3450_s27  }
   0x8   :  { %3444 = dma.done.wait [#allocation4], 8192  }
   0x9   :  { %3445 = vsyncadd [#allocation4], 4294959104 }
   0xa   :  { %3446 = dma.done.wait [#allocation6], 8192  }
   0xb   :  { %3447 = vsyncadd [#allocation6], 4294959104  ;;  %v3492_v0 = vld [vmem:[%s5809_s1 + $0x1e0] sm:$0xff]  ;;  %v3497_v1 = vld [vmem:[%s5809_s1 + $0x1e8] sm:$0xff]  ;;  %v5814_v60 = vmov 0.0  }
   0xc   :  { %v3502_v2 = vld [vmem:[%s5809_s1 + $0x1f0] sm:$0xff]  ;;  %120 = vmatpush.msra.mxu0 %v3492_v0  ;;  %140 = vmatpush.msra.mxu1 %v3497_v1  ;;  %v3509_v3 = vld [vmem:[%s5809_s1 + $0x1c0] sm:$0xff]  ;;  %v3514_v4 = vld [vmem:[%s5809_s1 + $0x1c8] sm:$0xff] }
   0xd   :  { %v3519_v5 = vld [vmem:[%s5809_s1 + $0x1d0] sm:$0xff]  ;;  %160 = vmatpush.msra.mxu2 %v3502_v2  ;;  %v3525_v6 = vld [vmem:[%s5809_s1 + $0x1a0] sm:$0xff]  ;;  %v3530_v7 = vld [vmem:[%s5809_s1 + $0x1a8] sm:$0xff] }
   0xe   :  { %6052 = vst [vmem:[#allocation9_spill] sm:$0xff] %v3525_v6  ;;  %121 = vmatpush.msra.mxu0 %v3509_v3  ;;  %141 = vmatpush.msra.mxu1 %v3514_v4  ;;  %v3537_v8 = vld [vmem:[%s5809_s1 + $0x1b0] sm:$0xff]  ;;  %v3543_v9 = vld [vmem:[%s5809_s1 + $0x180] sm:$0xff]  ;;  %v3548_v10 = vld [vmem:[%s5809_s1 + $0x188] sm:$0xff] }
   0xf   :  { %161 = vmatpush.msra.mxu2 %v3519_v5  ;;  %v3555_v11 = vld [vmem:[%s5809_s1 + $0x190] sm:$0xff]  ;;  %v3561_v12 = vld [vmem:[%s5809_s1 + $0x160] sm:$0xff]  ;;  %v3566_v13 = vld [vmem:[%s5809_s1 + $0x168] sm:$0xff] }
  0x10   :  { %122 = vmatpush.msra.mxu0 %v3525_v6  ;;  %142 = vmatpush.msra.mxu1 %v3530_v7  ;;  %v3573_v14 = vld [vmem:[%s5809_s1 + $0x170] sm:$0xff]  ;;  %v3579_v15 = vld [vmem:[%s5809_s1 + $0x140] sm:$0xff]  ;;  %v3584_v16 = vld [vmem:[%s5809_s1 + $0x148] sm:$0xff] }
  0x11   :  { %162 = vmatpush.msra.mxu2 %v3537_v8  ;;  %v3589_v17 = vld [vmem:[%s5809_s1 + $0x1f8] sm:$0xff]  ;;  %v3596_v18 = vld [vmem:[%s5809_s1 + $0x150] sm:$0xff]  ;;  %v3607_v20 = vld [vmem:[%s5809_s1 + $0x120] sm:$0xff] }
  0x12   :  { %123 = vmatpush.msra.mxu0 %v3543_v9  ;;  %143 = vmatpush.msra.mxu1 %v3548_v10  ;;  %v3601_v19 = vld [vmem:[%s5809_s1 + $0x1d8] sm:$0xff]  ;;  %v3612_v21 = vld [vmem:[%s5809_s1 + $0x128] sm:$0xff]  ;;  %v3620_v22 = vld [vmem:[%s5809_s1 + $0x130] sm:$0xff] }
  0x13   :  { %163 = vmatpush.msra.mxu2 %v3555_v11  ;;  %180 = vmatpush.msra.mxu3 %v3589_v17  ;;  %v3625_v23 = vld [vmem:[%s5809_s1 + $0x1b8] sm:$0xff]  ;;  %v3631_v24 = vld [vmem:[%s5809_s1 + $0x100] sm:$0xff]  ;;  %v3636_v25 = vld [vmem:[%s5809_s1 + $0x108] sm:$0xff] }
  0x14   :  { %124 = vmatpush.msra.mxu0 %v3561_v12  ;;  %144 = vmatpush.msra.mxu1 %v3566_v13  ;;  %v3644_v26 = vld [vmem:[%s5809_s1 + $0x110] sm:$0xff]  ;;  %v3649_v27 = vld [vmem:[%s5809_s1 + $0x198] sm:$0xff]  ;;  %v3655_v28 = vld [vmem:[%s5809_s1 + $0xe0] sm:$0xff] }
  0x15   :  { %164 = vmatpush.msra.mxu2 %v3573_v14  ;;  %181 = vmatpush.msra.mxu3 %v3601_v19  ;;  %v3660_v29 = vld [vmem:[%s5809_s1 + $0xe8] sm:$0xff]  ;;  %v3668_v30 = vld [vmem:[%s5809_s1 + $0xf0] sm:$0xff]  ;;  %v3673_v31 = vld [vmem:[%s5809_s1 + $0x178] sm:$0xff] }
  0x16   :  { %125 = vmatpush.msra.mxu0 %v3579_v15  ;;  %145 = vmatpush.msra.mxu1 %v3584_v16  ;;  %v3679_v32 = vld [vmem:[%s5809_s1 + $0xc0] sm:$0xff]  ;;  %v3684_v33 = vld [vmem:[%s5809_s1 + $0xc8] sm:$0xff]  ;;  %v3692_v34 = vld [vmem:[%s5809_s1 + $0xd0] sm:$0xff] }
  0x17   :  { %165 = vmatpush.msra.mxu2 %v3596_v18  ;;  %182 = vmatpush.msra.mxu3 %v3625_v23  ;;  %6053 = vst [vmem:[#allocation10_spill] sm:$0xff] %v3692_v34  ;;  %v3697_v35 = vld [vmem:[%s5809_s1 + $0x158] sm:$0xff]  ;;  %v3703_v36 = vld [vmem:[%s5809_s1 + $0xa0] sm:$0xff]  ;;  %v3708_v37 = vld [vmem:[%s5809_s1 + $0xa8] sm:$0xff] }
  0x18   :  { %126 = vmatpush.msra.mxu0 %v3607_v20  ;;  %146 = vmatpush.msra.mxu1 %v3612_v21  ;;  %6054 = vst [vmem:[#allocation11_spill] sm:$0xff] %v3703_v36  ;;  %v3716_v38 = vld [vmem:[%s5809_s1 + $0xb0] sm:$0xff]  ;;  %v3721_v39 = vld [vmem:[%s5809_s1 + $0x138] sm:$0xff]  ;;  %v3727_v40 = vld [vmem:[%s5809_s1 + $0x80] sm:$0xff] }
  0x19   :  { %166 = vmatpush.msra.mxu2 %v3620_v22  ;;  %183 = vmatpush.msra.mxu3 %v3649_v27  ;;  %6055 = vst [vmem:[#allocation12_spill] sm:$0xff] %v3708_v37  ;;  %v3732_v41 = vld [vmem:[%s5809_s1 + $0x88] sm:$0xff]  ;;  %v3740_v42 = vld [vmem:[%s5809_s1 + $0x90] sm:$0xff]  ;;  %v3745_v43 = vld [vmem:[%s5809_s1 + $0x118] sm:$0xff] }
  0x1a   :  { %127 = vmatpush.msra.mxu0 %v3631_v24  ;;  %147 = vmatpush.msra.mxu1 %v3636_v25  ;;  %6056 = vst [vmem:[#allocation13_spill] sm:$0xff] %v3716_v38  ;;  %v3751_v44 = vld [vmem:[%s5809_s1 + $0x60] sm:$0xff]  ;;  %v3756_v45 = vld [vmem:[%s5809_s1 + $0x68] sm:$0xff]  ;;  %v3764_v46 = vld [vmem:[%s5809_s1 + $0x70] sm:$0xff] }
  0x1b   :  { %167 = vmatpush.msra.mxu2 %v3644_v26  ;;  %184 = vmatpush.msra.mxu3 %v3673_v31  ;;  %6057 = vst [vmem:[#allocation14_spill] sm:$0xff] %v3727_v40  ;;  %v3769_v47 = vld [vmem:[%s5809_s1 + $0xf8] sm:$0xff]  ;;  %v3775_v48 = vld [vmem:[%s5809_s1 + $0x40] sm:$0xff]  ;;  %v3780_v49 = vld [vmem:[%s5809_s1 + $0x48] sm:$0xff] }
  0x1c   :  { %128 = vmatpush.msra.mxu0 %v3655_v28  ;;  %148 = vmatpush.msra.mxu1 %v3660_v29  ;;  %6058 = vst [vmem:[#allocation15_spill] sm:$0xff] %v3732_v41  ;;  %v3788_v50 = vld [vmem:[%s5809_s1 + $0x50] sm:$0xff]  ;;  %v3793_v51 = vld [vmem:[%s5809_s1 + $0xd8] sm:$0xff]  ;;  %v3799_v52 = vld [vmem:[%s5809_s1 + $0x20] sm:$0xff] }
  0x1d   :  { %168 = vmatpush.msra.mxu2 %v3668_v30  ;;  %185 = vmatpush.msra.mxu3 %v3697_v35  ;;  %6059 = vst [vmem:[#allocation16_spill] sm:$0xff] %v3740_v42  ;;  %v3804_v53 = vld [vmem:[%s5809_s1 + $0x28] sm:$0xff]  ;;  %v3812_v54 = vld [vmem:[%s5809_s1 + $0x30] sm:$0xff]  ;;  %v3817_v55 = vld [vmem:[%s5809_s1 + $0xb8] sm:$0xff] }
  0x1e   :  { %129 = vmatpush.msra.mxu0 %v3679_v32  ;;  %149 = vmatpush.msra.mxu1 %v3684_v33  ;;  %6060 = vst [vmem:[#allocation17_spill] sm:$0xff] %v3751_v44  ;;  %v3823_v56 = vld [vmem:[%s5809_s1] sm:$0xff]  ;;  %v3828_v57 = vld [vmem:[%s5809_s1 + $0x8] sm:$0xff]  ;;  %v3836_v58 = vld [vmem:[%s5809_s1 + $0x10] sm:$0xff] }
  0x1f   :  { %169 = vmatpush.msra.mxu2 %v3692_v34  ;;  %6061 = vst [vmem:[#allocation18_spill] sm:$0xff] %v3756_v45  ;;  %186 = vmatpush.msra.mxu3 %v3721_v39  ;;  %v3845_v59 = vld [vmem:[%s5809_s1 + $0x98] sm:$0xff] }
  0x20   :  { %130 = vmatpush.msra.mxu0 %v3703_v36  ;;  %150 = vmatpush.msra.mxu1 %v3708_v37  ;;  %6062 = vst [vmem:[#allocation19_spill] sm:$0xff] %v3764_v46  ;;  %v3854_v61 = vld [vmem:[%s5809_s1 + $0x78] sm:$0xff] }
  0x21   :  { %170 = vmatpush.msra.mxu2 %v3716_v38  ;;  %6063 = vst [vmem:[#allocation20_spill] sm:$0xff] %v3775_v48  ;;  %187 = vmatpush.msra.mxu3 %v3745_v43  ;;  %v3861_v62 = vld [vmem:[%s5809_s1 + $0x58] sm:$0xff] }
  0x22   :  { %131 = vmatpush.msra.mxu0 %v3727_v40  ;;  %151 = vmatpush.msra.mxu1 %v3732_v41  ;;  %6064 = vst [vmem:[#allocation21_spill] sm:$0xff] %v3780_v49  ;;  %v3870_v63 = vld [vmem:[%s5809_s1 + $0x38] sm:$0xff] }
  0x23   :  { %171 = vmatpush.msra.mxu2 %v3740_v42  ;;  %6065 = vst [vmem:[#allocation22_spill] sm:$0xff] %v3788_v50  ;;  %188 = vmatpush.msra.mxu3 %v3769_v47 }
  0x24   :  { %132 = vmatpush.msra.mxu0 %v3751_v44  ;;  %152 = vmatpush.msra.mxu1 %v3756_v45  ;;  %6066 = vst [vmem:[#allocation23_spill] sm:$0xff] %v3793_v51 }
  0x25   :  { %172 = vmatpush.msra.mxu2 %v3764_v46  ;;  %6067 = vst [vmem:[#allocation24_spill] sm:$0xff] %v3799_v52  ;;  %189 = vmatpush.msra.mxu3 %v3793_v51 }
  0x26   :  { %6068 = vst [vmem:[#allocation25_spill] sm:$0xff] %v3804_v53  ;;  %133 = vmatpush.msra.mxu0 %v3775_v48  ;;  %153 = vmatpush.msra.mxu1 %v3780_v49 }
  0x27   :  { %6069 = vst [vmem:[#allocation26_spill] sm:$0xff] %v3812_v54  ;;  %173 = vmatpush.msra.mxu2 %v3788_v50  ;;  %190 = vmatpush.msra.mxu3 %v3817_v55 }
  0x28   :  { %6070 = vst [vmem:[#allocation27_spill] sm:$0xff] %v3817_v55  ;;  %134 = vmatpush.msra.mxu0 %v3799_v52  ;;  %154 = vmatpush.msra.mxu1 %v3804_v53 }
  0x29   :  { %6071 = vst [vmem:[#allocation28_spill] sm:$0xff] %v3823_v56  ;;  %174 = vmatpush.msra.mxu2 %v3812_v54  ;;  %191 = vmatpush.msra.mxu3 %v3845_v59 }
  0x2a   :  { %6072 = vst [vmem:[#allocation29_spill] sm:$0xff] %v3828_v57  ;;  %135 = vmatpush.msra.mxu0 %v3823_v56  ;;  %155 = vmatpush.msra.mxu1 %v3828_v57 }
  0x2b   :  { %6073 = vst [vmem:[#allocation30_spill] sm:$0xff] %v3836_v58  ;;  %175 = vmatpush.msra.mxu2 %v3836_v58  ;;  %136 = vmatmul.f32.vlgmr.msra.gmra.mxu0 %v5814_v60 }
  0x2c   :  { %6074 = vst [vmem:[#allocation31_spill] sm:$0xff] %v3845_v59  ;;  %156 = vmatmul.f32.vlgmr.msra.gmra.mxu1 %v5814_v60  ;;  %176 = vmatmul.f32.vlgmr.msra.gmra.mxu2 %v5814_v60  ;;  %v3879_v60 = vld [vmem:[%s5809_s1 + $0x18] sm:$0xff] }
  0x2d   :  { %6075 = vst [vmem:[#allocation32_spill] sm:$0xff] %v3854_v61  ;;  %273 = vmatpush.msrb.mxu0 %v3492_v0  ;;  %293 = vmatpush.msrb.mxu1 %v3497_v1 }
  0x2e   :  { %6076 = vst [vmem:[#allocation33_spill] sm:$0xff] %v3861_v62  ;;  %313 = vmatpush.msrb.mxu2 %v3502_v2  ;;  %192 = vmatpush.msra.mxu3 %v3854_v61 }
  0x2f   :  { %274 = vmatpush.msrb.mxu0 %v3509_v3  ;;  %6077 = vst [vmem:[#allocation34_spill] sm:$0xff] %v3870_v63  ;;  %294 = vmatpush.msrb.mxu1 %v3514_v4 }
  0x30   :  { %314 = vmatpush.msrb.mxu2 %v3519_v5  ;;  %193 = vmatpush.msra.mxu3 %v3861_v62  ;;  %6078 = vst [vmem:[#allocation35_spill] sm:$0xff] %v3879_v60 }
  0x31   :  { %275 = vmatpush.msrb.mxu0 %v3525_v6  ;;  %295 = vmatpush.msrb.mxu1 %v3530_v7  ;;  %v6079_v6 = vmov 0.0  }
  0x32   :  { %315 = vmatpush.msrb.mxu2 %v3537_v8  ;;  %194 = vmatpush.msra.mxu3 %v3870_v63 }
  0x33   :  { %276 = vmatpush.msrb.mxu0 %v3543_v9  ;;  %296 = vmatpush.msrb.mxu1 %v3548_v10 }
  0x34   :  { %316 = vmatpush.msrb.mxu2 %v3555_v11  ;;  %195 = vmatpush.msra.mxu3 %v3879_v60 }
  0x35   :  { %277 = vmatpush.msrb.mxu0 %v3561_v12  ;;  %196 = vmatmul.f32.vlgmr.msra.gmra.mxu3 %v6079_v6  ;;  %v6080_v6 = vld [vmem:[#allocation9_spill] sm:$0xff] }
  0x36   :  { %297 = vmatpush.msrb.mxu1 %v3566_v13  ;;  %333 = vmatpush.msrb.mxu3 %v3589_v17 }
  0x37   :  { %317 = vmatpush.msrb.mxu2 %v3573_v14  ;;  %278 = vmatpush.msrb.mxu0 %v3579_v15 }
  0x38   :  { %298 = vmatpush.msrb.mxu1 %v3584_v16  ;;  %334 = vmatpush.msrb.mxu3 %v3601_v19 }
  0x39   :  { %318 = vmatpush.msrb.mxu2 %v3596_v18  ;;  %279 = vmatpush.msrb.mxu0 %v3607_v20 }
  0x3a   :  { %299 = vmatpush.msrb.mxu1 %v3612_v21  ;;  %335 = vmatpush.msrb.mxu3 %v3625_v23 }
  0x3b   :  { %319 = vmatpush.msrb.mxu2 %v3620_v22  ;;  %280 = vmatpush.msrb.mxu0 %v3631_v24 }
  0x3c   :  { %300 = vmatpush.msrb.mxu1 %v3636_v25  ;;  %336 = vmatpush.msrb.mxu3 %v3649_v27 }
  0x3d   :  { %320 = vmatpush.msrb.mxu2 %v3644_v26  ;;  %281 = vmatpush.msrb.mxu0 %v3655_v28 }
  0x3e   :  { %301 = vmatpush.msrb.mxu1 %v3660_v29  ;;  %337 = vmatpush.msrb.mxu3 %v3673_v31 }
  0x3f   :  { %321 = vmatpush.msrb.mxu2 %v3668_v30  ;;  %282 = vmatpush.msrb.mxu0 %v3679_v32 }
  0x40   :  { %302 = vmatpush.msrb.mxu1 %v3684_v33  ;;  %338 = vmatpush.msrb.mxu3 %v3697_v35 }
  0x41   :  { %322 = vmatpush.msrb.mxu2 %v3692_v34  ;;  %283 = vmatpush.msrb.mxu0 %v3703_v36 }
  0x42   :  { %303 = vmatpush.msrb.mxu1 %v3708_v37  ;;  %339 = vmatpush.msrb.mxu3 %v3721_v39 }
  0x43   :  { %323 = vmatpush.msrb.mxu2 %v3716_v38  ;;  %284 = vmatpush.msrb.mxu0 %v3727_v40 }
  0x44   :  { %304 = vmatpush.msrb.mxu1 %v3732_v41  ;;  %340 = vmatpush.msrb.mxu3 %v3745_v43 }
  0x45   :  { %324 = vmatpush.msrb.mxu2 %v3740_v42  ;;  %285 = vmatpush.msrb.mxu0 %v3751_v44 }
  0x46   :  { %305 = vmatpush.msrb.mxu1 %v3756_v45  ;;  %341 = vmatpush.msrb.mxu3 %v3769_v47 }
  0x47   :  { %325 = vmatpush.msrb.mxu2 %v3764_v46  ;;  %286 = vmatpush.msrb.mxu0 %v3775_v48 }
  0x48   :  { %306 = vmatpush.msrb.mxu1 %v3780_v49  ;;  %342 = vmatpush.msrb.mxu3 %v3793_v51 }
  0x49   :  { %326 = vmatpush.msrb.mxu2 %v3788_v50  ;;  %287 = vmatpush.msrb.mxu0 %v3799_v52 }
  0x4a   :  { %307 = vmatpush.msrb.mxu1 %v3804_v53  ;;  %343 = vmatpush.msrb.mxu3 %v3817_v55 }
  0x4b   :  { %327 = vmatpush.msrb.mxu2 %v3812_v54  ;;  %288 = vmatpush.msrb.mxu0 %v3823_v56 }
  0x4c   :  { %308 = vmatpush.msrb.mxu1 %v3828_v57  ;;  %344 = vmatpush.msrb.mxu3 %v3845_v59 }
  0x4d   :  { %328 = vmatpush.msrb.mxu2 %v3836_v58  ;;  %427 = vmatpush.msra.mxu0 %v3492_v0 }
  0x4e   :  { %447 = vmatpush.msra.mxu1 %v3497_v1  ;;  %345 = vmatpush.msrb.mxu3 %v3854_v61 }
  0x4f   :  { %467 = vmatpush.msra.mxu2 %v3502_v2  ;;  %428 = vmatpush.msra.mxu0 %v3509_v3 }
  0x50   :  { %448 = vmatpush.msra.mxu1 %v3514_v4  ;;  %346 = vmatpush.msrb.mxu3 %v3861_v62 }
  0x51   :  { %468 = vmatpush.msra.mxu2 %v3519_v5  ;;  %429 = vmatpush.msra.mxu0 %v6080_v6 }
  0x52   :  { %449 = vmatpush.msra.mxu1 %v3530_v7  ;;  %347 = vmatpush.msrb.mxu3 %v3870_v63 }
  0x53   :  { %469 = vmatpush.msra.mxu2 %v3537_v8  ;;  %430 = vmatpush.msra.mxu0 %v3543_v9 }
  0x54   :  { %450 = vmatpush.msra.mxu1 %v3548_v10  ;;  %348 = vmatpush.msrb.mxu3 %v3879_v60 }
  0x55   :  { %470 = vmatpush.msra.mxu2 %v3555_v11  ;;  %431 = vmatpush.msra.mxu0 %v3561_v12 }
  0x56   :  { %487 = vmatpush.msra.mxu3 %v3589_v17  ;;  %451 = vmatpush.msra.mxu1 %v3566_v13 }
  0x57   :  { %471 = vmatpush.msra.mxu2 %v3573_v14  ;;  %432 = vmatpush.msra.mxu0 %v3579_v15 }
  0x58   :  { %488 = vmatpush.msra.mxu3 %v3601_v19  ;;  %452 = vmatpush.msra.mxu1 %v3584_v16 }
  0x59   :  { %472 = vmatpush.msra.mxu2 %v3596_v18  ;;  %433 = vmatpush.msra.mxu0 %v3607_v20 }
  0x5a   :  { %489 = vmatpush.msra.mxu3 %v3625_v23  ;;  %453 = vmatpush.msra.mxu1 %v3612_v21 }
  0x5b   :  { %473 = vmatpush.msra.mxu2 %v3620_v22  ;;  %434 = vmatpush.msra.mxu0 %v3631_v24 }
  0x5c   :  { %490 = vmatpush.msra.mxu3 %v3649_v27  ;;  %454 = vmatpush.msra.mxu1 %v3636_v25 }
  0x5d   :  { %474 = vmatpush.msra.mxu2 %v3644_v26  ;;  %435 = vmatpush.msra.mxu0 %v3655_v28 }
  0x5e   :  { %491 = vmatpush.msra.mxu3 %v3673_v31  ;;  %455 = vmatpush.msra.mxu1 %v3660_v29 }
  0x5f   :  { %475 = vmatpush.msra.mxu2 %v3668_v30  ;;  %436 = vmatpush.msra.mxu0 %v3679_v32 }
  0x60   :  { %492 = vmatpush.msra.mxu3 %v3697_v35  ;;  %456 = vmatpush.msra.mxu1 %v3684_v33 }
  0x61   :  { %476 = vmatpush.msra.mxu2 %v3692_v34  ;;  %437 = vmatpush.msra.mxu0 %v3703_v36 }
  0x62   :  { %493 = vmatpush.msra.mxu3 %v3721_v39  ;;  %457 = vmatpush.msra.mxu1 %v3708_v37 }
  0x63   :  { %477 = vmatpush.msra.mxu2 %v3716_v38  ;;  %438 = vmatpush.msra.mxu0 %v3727_v40 }
  0x64   :  { %494 = vmatpush.msra.mxu3 %v3745_v43  ;;  %458 = vmatpush.msra.mxu1 %v3732_v41 }
  0x65   :  { %478 = vmatpush.msra.mxu2 %v3740_v42  ;;  %439 = vmatpush.msra.mxu0 %v3751_v44 }
  0x66   :  { %495 = vmatpush.msra.mxu3 %v3769_v47  ;;  %459 = vmatpush.msra.mxu1 %v3756_v45 }
  0x67   :  { %479 = vmatpush.msra.mxu2 %v3764_v46  ;;  %440 = vmatpush.msra.mxu0 %v3775_v48 }
  0x68   :  { %496 = vmatpush.msra.mxu3 %v3793_v51  ;;  %460 = vmatpush.msra.mxu1 %v3780_v49 }
  0x69   :  { %480 = vmatpush.msra.mxu2 %v3788_v50  ;;  %441 = vmatpush.msra.mxu0 %v3799_v52 }
  0x6a   :  { %497 = vmatpush.msra.mxu3 %v3817_v55  ;;  %461 = vmatpush.msra.mxu1 %v3804_v53 }
  0x6b   :  { %481 = vmatpush.msra.mxu2 %v3812_v54  ;;  %442 = vmatpush.msra.mxu0 %v3823_v56  ;;  %v116_v54 = vld [vmem:[%s5808_s0] sm:$0xff]  ;;  %v117_v56 = vld [vmem:[%s5808_s0 + $0x8] sm:$0xff] }
  0x6c   :  { %498 = vmatpush.msra.mxu3 %v3845_v59  ;;  %462 = vmatpush.msra.mxu1 %v3828_v57 }
  0x6d   :  { %482 = vmatpush.msra.mxu2 %v3836_v58 }
  0x6e   :  { %499 = vmatpush.msra.mxu3 %v3854_v61 }
  0x70   :  { %500 = vmatpush.msra.mxu3 %v3861_v62 }
  0x72   :  { %501 = vmatpush.msra.mxu3 %v3870_v63  ;;  %v118_v63 = vld [vmem:[%s5808_s0 + $0x10] sm:$0xff] }
  0x74   :  { %502 = vmatpush.msra.mxu3 %v3879_v60 }
  0xa8   :  { %v137_v53 = vpop.f32.mrf.mxu0 }
  0xa9   :  { %v200_v57 = vadd.f32 %v137_v53, %v116_v54  ;;  %v157_v52 = vpop.f32.mrf.mxu1 }
  0xaa   :  { %v201_v58 = vadd.f32 %v157_v52, %v117_v56  ;;  %v119_v52 = vld [vmem:[%s5808_s0 + $0x18] sm:$0xff] }
  0xab   :  { %v2917_v50 = vmul.f32 -1.442695, %v200_v57 }
  0xac   :  { %v2918_v49 = vmul.f32 -1.442695, %v201_v58 }
  0xad   :  { %3012 = vpow2.f32 %v2917_v50 }
  0xae   :  { %3014 = vpow2.f32 %v2918_v49 }
  0xaf   :  { %v177_v60 = vpop.f32.mrf.mxu2 }
  0xb0   :  { %v202_v62 = vadd.f32 %v177_v60, %v118_v63 }
  0xb2   :  { %v2919_v48 = vmul.f32 -1.442695, %v202_v62 }
  0xb3   :  { %v3013_v61 = vpop.eup %3012 }
  0xb4   :  { %v3015_v46 = vpop.eup %3014  ;;  %v213_v45 = vadd.f32 1.0, %v3013_v61  ;;  %3016 = vpow2.f32 %v2919_v48 }
  0xb5   :  { %v214_v44 = vadd.f32 1.0, %v3015_v46 }
  0xb6   :  { %3018 = vrcp.f32 %v213_v45  ;;  %v227_v48 = vand.u32 2147483648, %v213_v45  ;;  %v225_v59 = vand.u32 2147483647, %v213_v45  ;;  %vm221_vm2 = vweird.f32 %v213_v45 }
  0xb7   :  { %3020 = vrcp.f32 %v214_v44  ;;  %v242_v46 = vand.u32 2147483648, %v214_v44  ;;  %v240_v41 = vand.u32 2147483647, %v214_v44  ;;  %vm236_vm3 = vweird.f32 %v214_v44 }
  0xb8   :  { %v197_v50 = vpop.f32.mrf.mxu3  ;;  %vm226_vm5 = vcmp.eq.f32.partialorder %v225_v59, 8.507059e+37 }
  0xb9   :  { %v203_v54 = vadd.f32 %v197_v50, %v119_v52  ;;  %vm241_vm7 = vcmp.eq.f32.partialorder %v240_v41, 8.507059e+37 }
  0xba   :  { %v3017_v53 = vpop.eup %3016 }
  0xbb   :  { %v215_v56 = vadd.f32 1.0, %v3017_v53  ;;  %v228_v53 = vor.u32 1.1754944e-38, %v227_v48  ;;  %v6088_v48 = vld [vmem:[#allocation15_spill] sm:$0xff] }
  0xbc   :  { %v3019_v57 = vpop.eup %3018 }
  0xbd   :  { %v3021_v49 = vpop.eup %3020  ;;  %v217_v58 = vmul.f32 %v3019_v57, %v213_v45  ;;  %3022 = vrcp.f32 %v215_v56  ;;  %vm222_vm0 = vweird.f32 %v3019_v57  ;;  %v257_v45 = vand.u32 2147483648, %v215_v56 }
  0xbe   :  { %v232_v60 = vmul.f32 %v3021_v49, %v214_v44  ;;  %3024 = vtanh.f32 %v203_v54  ;;  %vm237_vm1 = vweird.f32 %v3021_v49  ;;  %vm223_vm4 = vmor %vm221_vm2, %vm222_vm0  ;;  %v243_v54 = vor.u32 1.1754944e-38, %v242_v46  ;;  %v6089_v46 = vld [vmem:[#allocation16_spill] sm:$0xff] }
  0xbf   :  { %v218_v62 = vsub.f32 1.0, %v217_v58  ;;  %vm238_vm6 = vmor %vm236_vm3, %vm237_vm1  ;;  %vm251_vm9 = vweird.f32 %v215_v56  ;;  %v258_v59 = vor.u32 1.1754944e-38, %v257_v45  ;;  %v6099_v45 = vld [vmem:[#allocation24_spill] sm:$0xff] }
  0xc0   :  { %v233_v61 = vsub.f32 1.0, %v232_v60 }
  0xc1   :  { %v219_v63 = vmul.f32 %v3019_v57, %v218_v62 }
  0xc2   :  { %v234_v42 = vmul.f32 %v3021_v49, %v233_v61 }
  0xc3   :  { %v3023_v40 = vpop.eup %3022  ;;  %v220_v55 = vadd.f32 %v3019_v57, %v219_v63 }
  0xc4   :  { %v3025_v52 = vpop.eup %3024  ;;  %v247_v50 = vmul.f32 %v3023_v40, %v215_v56  ;;  %v235_v38 = vadd.f32 %v3021_v49, %v234_v42  ;;  %vm252_vm8 = vweird.f32 %v3023_v40  ;;  %v255_v42 = vand.u32 2147483647, %v215_v56  ;;  %v6086_v56 = vld [vmem:[#allocation27_spill] sm:$0xff] }
  0xc5   :  { %v224_v58 = vsel %vm223_vm4, %v3019_v57, %v220_v55  ;;  %vm253_vm10 = vmor %vm251_vm9, %vm252_vm8 }
  0xc6   :  { %v248_v60 = vsub.f32 1.0, %v247_v50  ;;  %v229_v62 = vsel %vm226_vm5, %v228_v53, %v224_v58  ;;  %v239_v37 = vsel %vm238_vm6, %v3021_v49, %v235_v38  ;;  %vm256_vm11 = vcmp.eq.f32.partialorder %v255_v42, 8.507059e+37  ;;  %v6087_v49 = vld [vmem:[#allocation14_spill] sm:$0xff]  ;;  %v6091_v50 = vld [vmem:[#allocation17_spill] sm:$0xff]  ;;  %v6094_v58 = vld [vmem:[#allocation32_spill] sm:$0xff] }
  0xc7   :  { %v244_v61 = vsel %vm241_vm7, %v243_v54, %v239_v37  ;;  %v263_v36 = vmul.f32 %v3025_v52, %v229_v62  ;;  %v6083_v37 = vld [vmem:[#allocation11_spill] sm:$0xff]  ;;  %v6092_v53 = vld [vmem:[#allocation18_spill] sm:$0xff]  ;;  %v6096_v62 = vld [vmem:[#allocation21_spill] sm:$0xff] }
  0xc8   :  { %v249_v51 = vmul.f32 %v3023_v40, %v248_v60  ;;  %v262_v34 = vmul.f32 0.0, %v244_v61  ;;  %v6090_v52 = vld [vmem:[#allocation31_spill] sm:$0xff]  ;;  %v6095_v60 = vld [vmem:[#allocation20_spill] sm:$0xff]  ;;  %v6097_v61 = vld [vmem:[#allocation22_spill] sm:$0xff] }
  0xc9   :  { %v6093_v54 = vld [vmem:[#allocation19_spill] sm:$0xff]  ;;  %v6100_v42 = vld [vmem:[#allocation25_spill] sm:$0xff] }
  0xca   :  { %v4017_v63 = vadd.f32 %v263_v36, %v262_v34  ;;  %v250_v44 = vadd.f32 %v3023_v40, %v249_v51  ;;  %v6081_v34 = vld [vmem:[#allocation10_spill] sm:$0xff]  ;;  %v6082_v36 = vld [vmem:[#allocation23_spill] sm:$0xff]  ;;  %v6085_v51 = vld [vmem:[#allocation13_spill] sm:$0xff] }
  0xcc   :  { %3026 = vtanh.f32 %v4017_v63  ;;  %v254_v55 = vsel %vm253_vm10, %v3023_v40, %v250_v44  ;;  %v6084_v40 = vld [vmem:[#allocation12_spill] sm:$0xff]  ;;  %v6098_v44 = vld [vmem:[#allocation33_spill] sm:$0xff] }
  0xcd   :  { %v259_v38 = vsel %vm256_vm11, %v258_v59, %v254_v55  ;;  %v6101_v55 = vld [vmem:[#allocation26_spill] sm:$0xff] }
  0xce   :  { %v6102_v59 = vld [vmem:[#allocation34_spill] sm:$0xff] }
  0xd2   :  { %v3027_v57 = vpop.eup %3026 }
  0xd3   :  { %v266_v41 = vmul.f32 %v3027_v57, %v259_v38  ;;  %v6103_v57 = vld [vmem:[#allocation28_spill] sm:$0xff]  ;;  %v6104_v38 = vld [vmem:[#allocation29_spill] sm:$0xff] }
  0xd5   :  { %267 = vst [vmem:[%s5813_s5] sm:$0xff] %v266_v41  ;;  %289 = vmatmul.f32.vlgmr.msrb.gmra.mxu0 %v266_v41  ;;  %309 = vmatmul.f32.vlgmr.msrb.gmra.mxu1 %v266_v41 }
  0xd6   :  { %329 = vmatmul.f32.vlgmr.msrb.gmra.mxu2 %v266_v41  ;;  %349 = vmatmul.f32.vlgmr.msrb.gmra.mxu3 %v266_v41  ;;  %v6105_v41 = vld [vmem:[#allocation30_spill] sm:$0xff] }
  0xd7   :  { %581 = vmatpush.msrb.mxu0 %v3492_v0  ;;  %601 = vmatpush.msrb.mxu1 %v3497_v1 }
  0xd8   :  { %621 = vmatpush.msrb.mxu2 %v3502_v2  ;;  %641 = vmatpush.msrb.mxu3 %v3589_v17 }
  0xd9   :  { %582 = vmatpush.msrb.mxu0 %v3509_v3  ;;  %602 = vmatpush.msrb.mxu1 %v3514_v4 }
  0xda   :  { %622 = vmatpush.msrb.mxu2 %v3519_v5  ;;  %642 = vmatpush.msrb.mxu3 %v3601_v19 }
  0xdb   :  { %583 = vmatpush.msrb.mxu0 %v6080_v6  ;;  %603 = vmatpush.msrb.mxu1 %v3530_v7 }
  0xdc   :  { %623 = vmatpush.msrb.mxu2 %v3537_v8  ;;  %643 = vmatpush.msrb.mxu3 %v3625_v23 }
  0xdd   :  { %584 = vmatpush.msrb.mxu0 %v3543_v9  ;;  %604 = vmatpush.msrb.mxu1 %v3548_v10 }
  0xde   :  { %624 = vmatpush.msrb.mxu2 %v3555_v11  ;;  %644 = vmatpush.msrb.mxu3 %v3649_v27 }
  0xdf   :  { %585 = vmatpush.msrb.mxu0 %v3561_v12  ;;  %605 = vmatpush.msrb.mxu1 %v3566_v13 }
  0xe0   :  { %625 = vmatpush.msrb.mxu2 %v3573_v14  ;;  %645 = vmatpush.msrb.mxu3 %v3673_v31 }
  0xe1   :  { %586 = vmatpush.msrb.mxu0 %v3579_v15  ;;  %606 = vmatpush.msrb.mxu1 %v3584_v16 }
  0xe2   :  { %626 = vmatpush.msrb.mxu2 %v3596_v18  ;;  %646 = vmatpush.msrb.mxu3 %v3697_v35 }
  0xe3   :  { %587 = vmatpush.msrb.mxu0 %v3607_v20  ;;  %607 = vmatpush.msrb.mxu1 %v3612_v21 }
  0xe4   :  { %627 = vmatpush.msrb.mxu2 %v3620_v22  ;;  %647 = vmatpush.msrb.mxu3 %v3721_v39 }
  0xe5   :  { %588 = vmatpush.msrb.mxu0 %v3631_v24  ;;  %608 = vmatpush.msrb.mxu1 %v3636_v25 }
  0xe6   :  { %628 = vmatpush.msrb.mxu2 %v3644_v26  ;;  %648 = vmatpush.msrb.mxu3 %v3745_v43 }
  0xe7   :  { %589 = vmatpush.msrb.mxu0 %v3655_v28  ;;  %609 = vmatpush.msrb.mxu1 %v3660_v29 }
  0xe8   :  { %629 = vmatpush.msrb.mxu2 %v3668_v30  ;;  %649 = vmatpush.msrb.mxu3 %v3769_v47 }
  0xe9   :  { %590 = vmatpush.msrb.mxu0 %v3679_v32  ;;  %610 = vmatpush.msrb.mxu1 %v3684_v33 }
  0xea   :  { %630 = vmatpush.msrb.mxu2 %v6081_v34  ;;  %650 = vmatpush.msrb.mxu3 %v6082_v36 }
  0xeb   :  { %591 = vmatpush.msrb.mxu0 %v6083_v37  ;;  %611 = vmatpush.msrb.mxu1 %v6084_v40 }
  0xec   :  { %631 = vmatpush.msrb.mxu2 %v6085_v51  ;;  %651 = vmatpush.msrb.mxu3 %v6086_v56 }
  0xed   :  { %592 = vmatpush.msrb.mxu0 %v6087_v49  ;;  %612 = vmatpush.msrb.mxu1 %v6088_v48 }
  0xee   :  { %632 = vmatpush.msrb.mxu2 %v6089_v46  ;;  %652 = vmatpush.msrb.mxu3 %v6090_v52 }
  0xef   :  { %593 = vmatpush.msrb.mxu0 %v6091_v50  ;;  %613 = vmatpush.msrb.mxu1 %v6092_v53 }
  0xf0   :  { %633 = vmatpush.msrb.mxu2 %v6093_v54  ;;  %653 = vmatpush.msrb.mxu3 %v6094_v58 }
  0xf1   :  { %594 = vmatpush.msrb.mxu0 %v6095_v60  ;;  %614 = vmatpush.msrb.mxu1 %v6096_v62  ;;  %v6106_v60 = vld [vmem:[#allocation35_spill] sm:$0xff] }
  0xf2   :  { %634 = vmatpush.msrb.mxu2 %v6097_v61  ;;  %654 = vmatpush.msrb.mxu3 %v6098_v44  ;;  %v2920_v44 = vld [vmem:[%s5808_s0 + $0x20] sm:$0xff] }
  0xf3   :  { %595 = vmatpush.msrb.mxu0 %v6099_v45  ;;  %615 = vmatpush.msrb.mxu1 %v6100_v42  ;;  %v2921_v42 = vld [vmem:[%s5808_s0 + $0x28] sm:$0xff] }
  0xf4   :  { %635 = vmatpush.msrb.mxu2 %v6101_v55  ;;  %655 = vmatpush.msrb.mxu3 %v6102_v59 }
  0xf5   :  { %596 = vmatpush.msrb.mxu0 %v6103_v57  ;;  %616 = vmatpush.msrb.mxu1 %v6104_v38 }
  0xf6   :  { %636 = vmatpush.msrb.mxu2 %v6105_v41  ;;  %656 = vmatpush.msrb.mxu3 %v6106_v60  ;;  %v2922_v41 = vld [vmem:[%s5808_s0 + $0x30] sm:$0xff] }
 0x152   :  { %v290_v45 = vpop.f32.mrf.mxu0  ;;  %v310_v55 = vpop.f32.mrf.mxu1 }
 0x153   :  { %v353_v61 = vadd.f32 %v2920_v44, %v290_v45  ;;  %v354_v59 = vadd.f32 %v2921_v42, %v310_v55 }
 0x155   :  { %v2924_v62 = vmul.f32 -1.442695, %v353_v61  ;;  %v2925_v57 = vmul.f32 -1.442695, %v354_v59  ;;  %v2923_v61 = vld [vmem:[%s5808_s0 + $0x38] sm:$0xff] }
 0x157   :  { %3028 = vpow2.f32 %v2924_v62 }
 0x158   :  { %3030 = vpow2.f32 %v2925_v57 }
 0x159   :  { %v330_v60 = vpop.f32.mrf.mxu2  ;;  %v350_v62 = vpop.f32.mrf.mxu3 }
 0x15a   :  { %v355_v38 = vadd.f32 %v2922_v41, %v330_v60  ;;  %v356_v55 = vadd.f32 %v2923_v61, %v350_v62 }
 0x15c   :  { %v2926_v58 = vmul.f32 -1.442695, %v355_v38 }
 0x15d   :  { %v3029_v54 = vpop.eup %3028 }
 0x15e   :  { %v3031_v53 = vpop.eup %3030  ;;  %v366_v50 = vadd.f32 1.0, %v3029_v54  ;;  %3032 = vpow2.f32 %v2926_v58 }
 0x15f   :  { %v367_v52 = vadd.f32 1.0, %v3031_v53 }
 0x160   :  { %3034 = vrcp.f32 %v366_v50  ;;  %v380_v54 = vand.u32 2147483648, %v366_v50  ;;  %v378_v46 = vand.u32 2147483647, %v366_v50  ;;  %vm374_vm14 = vweird.f32 %v366_v50 }
 0x161   :  { %3036 = vrcp.f32 %v367_v52  ;;  %v395_v53 = vand.u32 2147483648, %v367_v52  ;;  %v393_v49 = vand.u32 2147483647, %v367_v52  ;;  %vm389_vm15 = vweird.f32 %v367_v52 }
 0x162   :  { %v381_v62 = vor.u32 1.1754944e-38, %v380_v54  ;;  %vm379_vm2 = vcmp.eq.f32.partialorder %v378_v46, 8.507059e+37 }
 0x163   :  { %vm394_vm3 = vcmp.eq.f32.partialorder %v393_v49, 8.507059e+37 }
 0x164   :  { %v3033_v44 = vpop.eup %3032 }
 0x165   :  { %v368_v45 = vadd.f32 1.0, %v3033_v44 }
 0x166   :  { %v3035_v42 = vpop.eup %3034 }
 0x167   :  { %v3037_v59 = vpop.eup %3036  ;;  %v370_v57 = vmul.f32 %v3035_v42, %v366_v50  ;;  %3038 = vrcp.f32 %v368_v45  ;;  %vm375_vm12 = vweird.f32 %v3035_v42  ;;  %v410_v54 = vand.u32 2147483648, %v368_v45 }
 0x168   :  { %v385_v60 = vmul.f32 %v3037_v59, %v367_v52  ;;  %3040 = vtanh.f32 %v356_v55  ;;  %vm390_vm13 = vweird.f32 %v3037_v59  ;;  %vm376_vm0 = vmor %vm374_vm14, %vm375_vm12  ;;  %vm404_vm5 = vweird.f32 %v368_v45 }
 0x169   :  { %v371_v38 = vsub.f32 1.0, %v370_v57  ;;  %vm391_vm1 = vmor %vm389_vm15, %vm390_vm13  ;;  %v396_v57 = vor.u32 1.1754944e-38, %v395_v53  ;;  %v411_v46 = vor.u32 1.1754944e-38, %v410_v54 }
 0x16a   :  { %v386_v41 = vsub.f32 1.0, %v385_v60 }
 0x16b   :  { %v372_v58 = vmul.f32 %v3035_v42, %v371_v38 }
 0x16c   :  { %v387_v48 = vmul.f32 %v3037_v59, %v386_v41 }
 0x16d   :  { %v3039_v56 = vpop.eup %3038  ;;  %v373_v51 = vadd.f32 %v3035_v42, %v372_v58 }
 0x16e   :  { %v400_v61 = vmul.f32 %v3039_v56, %v368_v45  ;;  %v388_v44 = vadd.f32 %v3037_v59, %v387_v48  ;;  %v3041_v55 = vpop.eup %3040  ;;  %vm405_vm4 = vweird.f32 %v3039_v56 }
 0x16f   :  { %v377_v60 = vsel %vm376_vm0, %v3035_v42, %v373_v51  ;;  %v408_v51 = vand.u32 2147483647, %v368_v45  ;;  %vm406_vm6 = vmor %vm404_vm5, %vm405_vm4 }
 0x170   :  { %v401_v40 = vsub.f32 1.0, %v400_v61  ;;  %v382_v38 = vsel %vm379_vm2, %v381_v62, %v377_v60  ;;  %v392_v37 = vsel %vm391_vm1, %v3037_v59, %v388_v44 }
 0x171   :  { %v397_v41 = vsel %vm394_vm3, %v396_v57, %v392_v37  ;;  %v416_v36 = vmul.f32 %v3041_v55, %v382_v38  ;;  %vm409_vm7 = vcmp.eq.f32.partialorder %v408_v51, 8.507059e+37 }
 0x172   :  { %v402_v34 = vmul.f32 %v3039_v56, %v401_v40  ;;  %v415_v58 = vmul.f32 %v397_v41, %v4017_v63 }
 0x174   :  { %v4100_v50 = vadd.f32 %v416_v36, %v415_v58  ;;  %v403_v52 = vadd.f32 %v3039_v56, %v402_v34 }
 0x176   :  { %3042 = vtanh.f32 %v4100_v50  ;;  %v407_v48 = vsel %vm406_vm6, %v3039_v56, %v403_v52  ;;  %v2931_v56 = vld [vmem:[%s5808_s0 + $0x58] sm:$0xff] }
 0x177   :  { %v412_v49 = vsel %vm409_vm7, %v411_v46, %v407_v48 }
 0x17c   :  { %v3043_v42 = vpop.eup %3042 }
 0x17d   :  { %v419_v37 = vmul.f32 %v3043_v42, %v412_v49 }
 0x17f   :  { %2927 = vst [vmem:[%s5813_s5 + $0x8] sm:$0xff] %v419_v37  ;;  %443 = vmatmul.f32.vlgmr.msra.gmra.mxu0 %v419_v37  ;;  %463 = vmatmul.f32.vlgmr.msra.gmra.mxu1 %v419_v37 }
 0x180   :  { %483 = vmatmul.f32.vlgmr.msra.gmra.mxu2 %v419_v37  ;;  %503 = vmatmul.f32.vlgmr.msra.gmra.mxu3 %v419_v37 }
 0x181   :  { %735 = vmatpush.msra.mxu0 %v3492_v0  ;;  %755 = vmatpush.msra.mxu1 %v3497_v1  ;;  %v6107_v0 = vld [vmem:[#allocation10_spill] sm:$0xff]  ;;  %v6108_v1 = vld [vmem:[#allocation23_spill] sm:$0xff] }
 0x182   :  { %775 = vmatpush.msra.mxu2 %v3502_v2  ;;  %795 = vmatpush.msra.mxu3 %v3589_v17  ;;  %v6109_v2 = vld [vmem:[#allocation11_spill] sm:$0xff]  ;;  %v6124_v17 = vld [vmem:[#allocation33_spill] sm:$0xff] }
 0x183   :  { %736 = vmatpush.msra.mxu0 %v3509_v3  ;;  %756 = vmatpush.msra.mxu1 %v3514_v4  ;;  %v6110_v3 = vld [vmem:[#allocation12_spill] sm:$0xff]  ;;  %v6111_v4 = vld [vmem:[#allocation13_spill] sm:$0xff] }
 0x184   :  { %776 = vmatpush.msra.mxu2 %v3519_v5  ;;  %796 = vmatpush.msra.mxu3 %v3601_v19  ;;  %v6112_v5 = vld [vmem:[#allocation27_spill] sm:$0xff]  ;;  %v6126_v19 = vld [vmem:[#allocation25_spill] sm:$0xff] }
 0x185   :  { %737 = vmatpush.msra.mxu0 %v6080_v6  ;;  %757 = vmatpush.msra.mxu1 %v3530_v7  ;;  %v6113_v6 = vld [vmem:[#allocation14_spill] sm:$0xff]  ;;  %v6114_v7 = vld [vmem:[#allocation15_spill] sm:$0xff] }
 0x186   :  { %777 = vmatpush.msra.mxu2 %v3537_v8  ;;  %797 = vmatpush.msra.mxu3 %v3625_v23  ;;  %v6115_v8 = vld [vmem:[#allocation16_spill] sm:$0xff]  ;;  %v6130_v23 = vld [vmem:[#allocation29_spill] sm:$0xff] }
 0x187   :  { %738 = vmatpush.msra.mxu0 %v3543_v9  ;;  %758 = vmatpush.msra.mxu1 %v3548_v10  ;;  %v6116_v9 = vld [vmem:[#allocation31_spill] sm:$0xff]  ;;  %v6117_v10 = vld [vmem:[#allocation17_spill] sm:$0xff] }
 0x188   :  { %778 = vmatpush.msra.mxu2 %v3555_v11  ;;  %798 = vmatpush.msra.mxu3 %v3649_v27  ;;  %v6118_v11 = vld [vmem:[#allocation18_spill] sm:$0xff] }
 0x189   :  { %739 = vmatpush.msra.mxu0 %v3561_v12  ;;  %759 = vmatpush.msra.mxu1 %v3566_v13  ;;  %v6119_v12 = vld [vmem:[#allocation19_spill] sm:$0xff]  ;;  %v6120_v13 = vld [vmem:[#allocation32_spill] sm:$0xff]  ;;  %v2929_v27 = vld [vmem:[%s5808_s0 + $0x48] sm:$0xff] }
 0x18a   :  { %779 = vmatpush.msra.mxu2 %v3573_v14  ;;  %799 = vmatpush.msra.mxu3 %v3673_v31  ;;  %v6121_v14 = vld [vmem:[#allocation20_spill] sm:$0xff] }
 0x18b   :  { %740 = vmatpush.msra.mxu0 %v3579_v15  ;;  %760 = vmatpush.msra.mxu1 %v3584_v16  ;;  %v6122_v15 = vld [vmem:[#allocation21_spill] sm:$0xff]  ;;  %v6123_v16 = vld [vmem:[#allocation22_spill] sm:$0xff] }
 0x18c   :  { %780 = vmatpush.msra.mxu2 %v3596_v18  ;;  %800 = vmatpush.msra.mxu3 %v3697_v35  ;;  %v6125_v18 = vld [vmem:[#allocation24_spill] sm:$0xff]  ;;  %v2930_v35 = vld [vmem:[%s5808_s0 + $0x50] sm:$0xff] }
 0x18d   :  { %741 = vmatpush.msra.mxu0 %v3607_v20  ;;  %761 = vmatpush.msra.mxu1 %v3612_v21  ;;  %v6127_v20 = vld [vmem:[#allocation26_spill] sm:$0xff] }
 0x18e   :  { %781 = vmatpush.msra.mxu2 %v3620_v22  ;;  %801 = vmatpush.msra.mxu3 %v3721_v39  ;;  %v6128_v21 = vld [vmem:[#allocation34_spill] sm:$0xff]  ;;  %v6129_v22 = vld [vmem:[#allocation28_spill] sm:$0xff] }
 0x18f   :  { %742 = vmatpush.msra.mxu0 %v3631_v24  ;;  %762 = vmatpush.msra.mxu1 %v3636_v25  ;;  %v6131_v24 = vld [vmem:[#allocation30_spill] sm:$0xff]  ;;  %v6132_v25 = vld [vmem:[#allocation35_spill] sm:$0xff] }
 0x190   :  { %782 = vmatpush.msra.mxu2 %v3644_v26  ;;  %802 = vmatpush.msra.mxu3 %v3745_v43  ;;  %v2928_v26 = vld [vmem:[%s5808_s0 + $0x40] sm:$0xff] }
 0x191   :  { %743 = vmatpush.msra.mxu0 %v3655_v28  ;;  %763 = vmatpush.msra.mxu1 %v3660_v29 }
 0x192   :  { %783 = vmatpush.msra.mxu2 %v3668_v30  ;;  %803 = vmatpush.msra.mxu3 %v3769_v47 }
 0x193   :  { %744 = vmatpush.msra.mxu0 %v3679_v32  ;;  %764 = vmatpush.msra.mxu1 %v3684_v33 }
 0x194   :  { %784 = vmatpush.msra.mxu2 %v6107_v0  ;;  %804 = vmatpush.msra.mxu3 %v6108_v1 }
 0x195   :  { %745 = vmatpush.msra.mxu0 %v6109_v2  ;;  %765 = vmatpush.msra.mxu1 %v6110_v3 }
 0x196   :  { %785 = vmatpush.msra.mxu2 %v6111_v4  ;;  %805 = vmatpush.msra.mxu3 %v6112_v5 }
 0x197   :  { %746 = vmatpush.msra.mxu0 %v6113_v6  ;;  %766 = vmatpush.msra.mxu1 %v6114_v7 }
 0x198   :  { %786 = vmatpush.msra.mxu2 %v6115_v8  ;;  %806 = vmatpush.msra.mxu3 %v6116_v9 }
 0x199   :  { %747 = vmatpush.msra.mxu0 %v6117_v10  ;;  %767 = vmatpush.msra.mxu1 %v6118_v11 }
 0x19a   :  { %787 = vmatpush.msra.mxu2 %v6119_v12  ;;  %807 = vmatpush.msra.mxu3 %v6120_v13 }
 0x19b   :  { %748 = vmatpush.msra.mxu0 %v6121_v14  ;;  %768 = vmatpush.msra.mxu1 %v6122_v15 }
 0x19c   :  { %788 = vmatpush.msra.mxu2 %v6123_v16  ;;  %808 = vmatpush.msra.mxu3 %v6124_v17 }
 0x19d   :  { %749 = vmatpush.msra.mxu0 %v6125_v18  ;;  %769 = vmatpush.msra.mxu1 %v6126_v19 }
 0x19e   :  { %789 = vmatpush.msra.mxu2 %v6127_v20  ;;  %809 = vmatpush.msra.mxu3 %v6128_v21  ;;  %v4198_v20 = vld [vmem:[%s5809_s1 + $0x1e8] sm:$0xff]  ;;  %v4204_v21 = vld [vmem:[%s5809_s1 + $0x1f0] sm:$0xff] }
 0x19f   :  { %750 = vmatpush.msra.mxu0 %v6129_v22  ;;  %770 = vmatpush.msra.mxu1 %v6130_v23  ;;  %v4210_v22 = vld [vmem:[%s5809_s1 + $0x1f8] sm:$0xff]  ;;  %v4216_v23 = vld [vmem:[%s5809_s1 + $0x1c0] sm:$0xff] }
 0x1a0   :  { %790 = vmatpush.msra.mxu2 %v6131_v24  ;;  %810 = vmatpush.msra.mxu3 %v6132_v25  ;;  %v4222_v24 = vld [vmem:[%s5809_s1 + $0x1c8] sm:$0xff]  ;;  %v4228_v25 = vld [vmem:[%s5809_s1 + $0x1d0] sm:$0xff] }
 0x1fc   :  { %v444_v28 = vpop.f32.mrf.mxu0  ;;  %v464_v29 = vpop.f32.mrf.mxu1 }
 0x1fd   :  { %v507_v30 = vadd.f32 %v2928_v26, %v444_v28  ;;  %v508_v31 = vadd.f32 %v2929_v27, %v464_v29  ;;  %v4234_v26 = vld [vmem:[%s5809_s1 + $0x1d8] sm:$0xff]  ;;  %v4240_v27 = vld [vmem:[%s5809_s1 + $0x1a0] sm:$0xff]  ;;  %v4246_v28 = vld [vmem:[%s5809_s1 + $0x1a8] sm:$0xff] }
 0x1fe   :  { %v4252_v29 = vld [vmem:[%s5809_s1 + $0x1b0] sm:$0xff] }
 0x1ff   :  { %v2932_v32 = vmul.f32 -1.442695, %v507_v30  ;;  %v2933_v33 = vmul.f32 -1.442695, %v508_v31  ;;  %v4258_v30 = vld [vmem:[%s5809_s1 + $0x1b8] sm:$0xff]  ;;  %v4264_v31 = vld [vmem:[%s5809_s1 + $0x180] sm:$0xff] }
 0x201   :  { %3044 = vpow2.f32 %v2932_v32  ;;  %v4270_v32 = vld [vmem:[%s5809_s1 + $0x188] sm:$0xff] }
 0x202   :  { %3046 = vpow2.f32 %v2933_v33  ;;  %v4276_v33 = vld [vmem:[%s5809_s1 + $0x190] sm:$0xff] }
 0x203   :  { %v484_v39 = vpop.f32.mrf.mxu2  ;;  %v504_v45 = vpop.f32.mrf.mxu3 }
 0x204   :  { %v509_v43 = vadd.f32 %v2930_v35, %v484_v39  ;;  %v510_v62 = vadd.f32 %v2931_v56, %v504_v45  ;;  %v4282_v35 = vld [vmem:[%s5809_s1 + $0x198] sm:$0xff]  ;;  %v4288_v39 = vld [vmem:[%s5809_s1 + $0x160] sm:$0xff] }
 0x205   :  { %v4330_v56 = vld [vmem:[%s5809_s1 + $0x158] sm:$0xff]  ;;  %v4336_v45 = vld [vmem:[%s5809_s1 + $0x120] sm:$0xff] }
 0x206   :  { %v2934_v47 = vmul.f32 -1.442695, %v509_v43  ;;  %v4294_v43 = vld [vmem:[%s5809_s1 + $0x168] sm:$0xff] }
 0x207   :  { %v3045_v63 = vpop.eup %3044 }
 0x208   :  { %v3047_v34 = vpop.eup %3046  ;;  %v520_v36 = vadd.f32 1.0, %v3045_v63  ;;  %3048 = vpow2.f32 %v2934_v47  ;;  %v4300_v47 = vld [vmem:[%s5809_s1 + $0x170] sm:$0xff]  ;;  %v4306_v63 = vld [vmem:[%s5809_s1 + $0x178] sm:$0xff] }
 0x209   :  { %v521_v40 = vadd.f32 1.0, %v3047_v34  ;;  %v4312_v34 = vld [vmem:[%s5809_s1 + $0x140] sm:$0xff] }
 0x20a   :  { %3050 = vrcp.f32 %v520_v36  ;;  %v534_v41 = vand.u32 2147483648, %v520_v36  ;;  %v532_v54 = vand.u32 2147483647, %v520_v36  ;;  %vm528_vm10 = vweird.f32 %v520_v36 }
 0x20b   :  { %3052 = vrcp.f32 %v521_v40  ;;  %v549_v58 = vand.u32 2147483648, %v521_v40  ;;  %v547_v48 = vand.u32 2147483647, %v521_v40  ;;  %vm543_vm11 = vweird.f32 %v521_v40 }
 0x20c   :  { %v535_v37 = vor.u32 1.1754944e-38, %v534_v41  ;;  %vm533_vm14 = vcmp.eq.f32.partialorder %v532_v54, 8.507059e+37  ;;  %v4396_v41 = vld [vmem:[%s5809_s1 + $0xf0] sm:$0xff]  ;;  %v4414_v54 = vld [vmem:[%s5809_s1 + $0xc8] sm:$0xff] }
 0x20d   :  { %v550_v1 = vor.u32 1.1754944e-38, %v549_v58  ;;  %vm548_vm15 = vcmp.eq.f32.partialorder %v547_v48, 8.507059e+37  ;;  %v4402_v58 = vld [vmem:[%s5809_s1 + $0xf8] sm:$0xff] }
 0x20e   :  { %v3049_v59 = vpop.eup %3048  ;;  %v4426_v48 = vld [vmem:[%s5809_s1 + $0xd8] sm:$0xff] }
 0x20f   :  { %v522_v53 = vadd.f32 1.0, %v3049_v59  ;;  %v4342_v59 = vld [vmem:[%s5809_s1 + $0x128] sm:$0xff]  ;;  %6134 = vst [vmem:[#allocation10_spill] sm:$0xff] %v4426_v48 }
 0x210   :  { %v3051_v61 = vpop.eup %3050 }
 0x211   :  { %v3053_v44 = vpop.eup %3052  ;;  %v524_v57 = vmul.f32 %v3051_v61, %v520_v36  ;;  %3054 = vrcp.f32 %v522_v53  ;;  %vm529_vm8 = vweird.f32 %v3051_v61  ;;  %v564_v13 = vand.u32 2147483648, %v522_v53  ;;  %v4318_v36 = vld [vmem:[%s5809_s1 + $0x148] sm:$0xff] }
 0x212   :  { %v539_v60 = vmul.f32 %v3053_v44, %v521_v40  ;;  %3056 = vtanh.f32 %v510_v62  ;;  %vm544_vm9 = vweird.f32 %v3053_v44  ;;  %vm530_vm12 = vmor %vm528_vm10, %vm529_vm8  ;;  %vm558_vm1 = vweird.f32 %v522_v53  ;;  %v4324_v40 = vld [vmem:[%s5809_s1 + $0x150] sm:$0xff]  ;;  %v4360_v62 = vld [vmem:[%s5809_s1 + $0x100] sm:$0xff] }
 0x213   :  { %v525_v55 = vsub.f32 1.0, %v524_v57  ;;  %vm545_vm13 = vmor %vm543_vm11, %vm544_vm9  ;;  %v562_v14 = vand.u32 2147483647, %v522_v53  ;;  %v565_v16 = vor.u32 1.1754944e-38, %v564_v13  ;;  %v4372_v57 = vld [vmem:[%s5809_s1 + $0x110] sm:$0xff]  ;;  %v4528_v13 = vld [vmem:[%s5809_s1 + $0x20] sm:$0xff] }
 0x214   :  { %v540_v38 = vsub.f32 1.0, %v539_v60  ;;  %v4378_v60 = vld [vmem:[%s5809_s1 + $0x118] sm:$0xff]  ;;  %6151 = vst [vmem:[#allocation33_spill] sm:$0xff] %v4528_v13 }
 0x215   :  { %v526_v52 = vmul.f32 %v3051_v61, %v525_v55  ;;  %vm563_vm3 = vcmp.eq.f32.partialorder %v562_v14, 8.507059e+37  ;;  %v4384_v55 = vld [vmem:[%s5809_s1 + $0xe0] sm:$0xff]  ;;  %v4534_v14 = vld [vmem:[%s5809_s1 + $0x28] sm:$0xff] }
 0x216   :  { %v541_v51 = vmul.f32 %v3053_v44, %v540_v38  ;;  %v4390_v38 = vld [vmem:[%s5809_s1 + $0xe8] sm:$0xff]  ;;  %6152 = vst [vmem:[#allocation24_spill] sm:$0xff] %v4534_v14 }
 0x217   :  { %v3055_v46 = vpop.eup %3054  ;;  %v527_v42 = vadd.f32 %v3051_v61, %v526_v52  ;;  %v4408_v52 = vld [vmem:[%s5809_s1 + $0xc0] sm:$0xff] }
 0x218   :  { %v554_v49 = vmul.f32 %v3055_v46, %v522_v53  ;;  %v542_v0 = vadd.f32 %v3053_v44, %v541_v51  ;;  %v3057_v3 = vpop.eup %3056  ;;  %vm559_vm0 = vweird.f32 %v3055_v46  ;;  %v4348_v53 = vld [vmem:[%s5809_s1 + $0x130] sm:$0xff] }
 0x219   :  { %v531_v2 = vsel %vm530_vm12, %v3051_v61, %v527_v42  ;;  %vm560_vm2 = vmor %vm558_vm1, %vm559_vm0  ;;  %v4354_v61 = vld [vmem:[%s5809_s1 + $0x138] sm:$0xff]  ;;  %v4420_v51 = vld [vmem:[%s5809_s1 + $0xd0] sm:$0xff] }
 0x21a   :  { %v555_v4 = vsub.f32 1.0, %v554_v49  ;;  %v536_v5 = vsel %vm533_vm14, %v535_v37, %v531_v2  ;;  %v546_v6 = vsel %vm545_vm13, %v3053_v44, %v542_v0  ;;  %v4366_v44 = vld [vmem:[%s5809_s1 + $0x108] sm:$0xff]  ;;  %6133 = vst [vmem:[#allocation9_spill] sm:$0xff] %v4420_v51  ;;  %v4444_v49 = vld [vmem:[%s5809_s1 + $0xb0] sm:$0xff]  ;;  %v4450_v37 = vld [vmem:[%s5809_s1 + $0xb8] sm:$0xff] }
 0x21b   :  { %v551_v7 = vsel %vm548_vm15, %v550_v1, %v546_v6  ;;  %v570_v8 = vmul.f32 %v3057_v3, %v536_v5  ;;  %v4438_v42 = vld [vmem:[%s5809_s1 + $0xa8] sm:$0xff]  ;;  %6137 = vst [vmem:[#allocation12_spill] sm:$0xff] %v4444_v49  ;;  %v4456_v0 = vld [vmem:[%s5809_s1 + $0x80] sm:$0xff]  ;;  %v4468_v2 = vld [vmem:[%s5809_s1 + $0x90] sm:$0xff] }
 0x21c   :  { %v556_v9 = vmul.f32 %v3055_v46, %v555_v4  ;;  %v569_v10 = vmul.f32 %v551_v7, %v4100_v50  ;;  %v4192_v50 = vld [vmem:[%s5809_s1 + $0x1e0] sm:$0xff]  ;;  %6136 = vst [vmem:[#allocation11_spill] sm:$0xff] %v4438_v42  ;;  %v4462_v1 = vld [vmem:[%s5809_s1 + $0x88] sm:$0xff]  ;;  %v4474_v3 = vld [vmem:[%s5809_s1 + $0x98] sm:$0xff] }
 0x21d   :  { %6138 = vst [vmem:[#allocation13_spill] sm:$0xff] %v4450_v37  ;;  %v4480_v4 = vld [vmem:[%s5809_s1 + $0x60] sm:$0xff]  ;;  %v4486_v5 = vld [vmem:[%s5809_s1 + $0x68] sm:$0xff]  ;;  %v4492_v6 = vld [vmem:[%s5809_s1 + $0x70] sm:$0xff] }
 0x21e   :  { %v4183_v11 = vadd.f32 %v570_v8, %v569_v10  ;;  %v557_v12 = vadd.f32 %v3055_v46, %v556_v9  ;;  %6139 = vst [vmem:[#allocation27_spill] sm:$0xff] %v4456_v0  ;;  %v4498_v7 = vld [vmem:[%s5809_s1 + $0x78] sm:$0xff]  ;;  %v4504_v8 = vld [vmem:[%s5809_s1 + $0x40] sm:$0xff]  ;;  %v4510_v9 = vld [vmem:[%s5809_s1 + $0x48] sm:$0xff] }
 0x21f   :  { %6140 = vst [vmem:[#allocation14_spill] sm:$0xff] %v4462_v1  ;;  %v4516_v10 = vld [vmem:[%s5809_s1 + $0x50] sm:$0xff] }
 0x220   :  { %3058 = vtanh.f32 %v4183_v11  ;;  %v561_v15 = vsel %vm560_vm2, %v3055_v46, %v557_v12  ;;  %v4432_v46 = vld [vmem:[%s5809_s1 + $0xa0] sm:$0xff]  ;;  %6141 = vst [vmem:[#allocation15_spill] sm:$0xff] %v4468_v2  ;;  %v4522_v12 = vld [vmem:[%s5809_s1 + $0x58] sm:$0xff] }
 0x221   :  { %v566_v18 = vsel %vm563_vm3, %v565_v16, %v561_v15  ;;  %6135 = vst [vmem:[#allocation23_spill] sm:$0xff] %v4432_v46  ;;  %v4540_v15 = vld [vmem:[%s5809_s1 + $0x30] sm:$0xff]  ;;  %v4546_v16 = vld [vmem:[%s5809_s1 + $0x38] sm:$0xff] }
 0x222   :  { %6142 = vst [vmem:[#allocation16_spill] sm:$0xff] %v4474_v3 }
 0x223   :  { %6143 = vst [vmem:[#allocation31_spill] sm:$0xff] %v4480_v4 }
 0x224   :  { %6144 = vst [vmem:[#allocation17_spill] sm:$0xff] %v4486_v5 }
 0x225   :  { %6145 = vst [vmem:[#allocation18_spill] sm:$0xff] %v4492_v6 }
 0x226   :  { %v3059_v17 = vpop.eup %3058  ;;  %6146 = vst [vmem:[#allocation19_spill] sm:$0xff] %v4498_v7 }
 0x227   :  { %v573_v19 = vmul.f32 %v3059_v17, %v566_v18  ;;  %6147 = vst [vmem:[#allocation32_spill] sm:$0xff] %v4504_v8  ;;  %v4552_v17 = vld [vmem:[%s5809_s1] sm:$0xff]  ;;  %v4558_v18 = vld [vmem:[%s5809_s1 + $0x8] sm:$0xff] }
 0x228   :  { %6148 = vst [vmem:[#allocation20_spill] sm:$0xff] %v4510_v9 }
 0x229   :  { %2935 = vst [vmem:[%s5813_s5 + $0x10] sm:$0xff] %v573_v19  ;;  %597 = vmatmul.f32.vlgmr.msrb.gmra.mxu0 %v573_v19  ;;  %617 = vmatmul.f32.vlgmr.msrb.gmra.mxu1 %v573_v19 }
 0x22a   :  { %637 = vmatmul.f32.vlgmr.msrb.gmra.mxu2 %v573_v19  ;;  %657 = vmatmul.f32.vlgmr.msrb.gmra.mxu3 %v573_v19  ;;  %6149 = vst [vmem:[#allocation21_spill] sm:$0xff] %v4516_v10  ;;  %v4564_v19 = vld [vmem:[%s5809_s1 + $0x10] sm:$0xff] }
 0x22b   :  { %889 = vmatpush.msrb.mxu0 %v4192_v50  ;;  %909 = vmatpush.msrb.mxu1 %v4198_v20  ;;  %6150 = vst [vmem:[#allocation22_spill] sm:$0xff] %v4522_v12 }
 0x22c   :  { %929 = vmatpush.msrb.mxu2 %v4204_v21  ;;  %949 = vmatpush.msrb.mxu3 %v4210_v22  ;;  %6153 = vst [vmem:[#allocation25_spill] sm:$0xff] %v4540_v15 }
 0x22d   :  { %890 = vmatpush.msrb.mxu0 %v4216_v23  ;;  %910 = vmatpush.msrb.mxu1 %v4222_v24  ;;  %6154 = vst [vmem:[#allocation26_spill] sm:$0xff] %v4546_v16 }
 0x22e   :  { %930 = vmatpush.msrb.mxu2 %v4228_v25  ;;  %950 = vmatpush.msrb.mxu3 %v4234_v26  ;;  %6155 = vst [vmem:[#allocation34_spill] sm:$0xff] %v4552_v17 }
 0x22f   :  { %891 = vmatpush.msrb.mxu0 %v4240_v27  ;;  %911 = vmatpush.msrb.mxu1 %v4246_v28  ;;  %6156 = vst [vmem:[#allocation28_spill] sm:$0xff] %v4558_v18 }
 0x230   :  { %931 = vmatpush.msrb.mxu2 %v4252_v29  ;;  %951 = vmatpush.msrb.mxu3 %v4258_v30  ;;  %6157 = vst [vmem:[#allocation29_spill] sm:$0xff] %v4564_v19 }
 0x231   :  { %892 = vmatpush.msrb.mxu0 %v4264_v31  ;;  %912 = vmatpush.msrb.mxu1 %v4270_v32 }
 0x232   :  { %932 = vmatpush.msrb.mxu2 %v4276_v33  ;;  %952 = vmatpush.msrb.mxu3 %v4282_v35 }
 0x233   :  { %893 = vmatpush.msrb.mxu0 %v4288_v39  ;;  %913 = vmatpush.msrb.mxu1 %v4294_v43 }
 0x234   :  { %933 = vmatpush.msrb.mxu2 %v4300_v47  ;;  %953 = vmatpush.msrb.mxu3 %v4306_v63 }
 0x235   :  { %894 = vmatpush.msrb.mxu0 %v4312_v34  ;;  %914 = vmatpush.msrb.mxu1 %v4318_v36 }
 0x236   :  { %934 = vmatpush.msrb.mxu2 %v4324_v40  ;;  %954 = vmatpush.msrb.mxu3 %v4330_v56 }
 0x237   :  { %895 = vmatpush.msrb.mxu0 %v4336_v45  ;;  %915 = vmatpush.msrb.mxu1 %v4342_v59 }
 0x238   :  { %935 = vmatpush.msrb.mxu2 %v4348_v53  ;;  %955 = vmatpush.msrb.mxu3 %v4354_v61 }
 0x239   :  { %896 = vmatpush.msrb.mxu0 %v4360_v62  ;;  %916 = vmatpush.msrb.mxu1 %v4366_v44 }
 0x23a   :  { %936 = vmatpush.msrb.mxu2 %v4372_v57  ;;  %956 = vmatpush.msrb.mxu3 %v4378_v60 }
 0x23b   :  { %897 = vmatpush.msrb.mxu0 %v4384_v55  ;;  %917 = vmatpush.msrb.mxu1 %v4390_v38 }
 0x23c   :  { %937 = vmatpush.msrb.mxu2 %v4396_v41  ;;  %957 = vmatpush.msrb.mxu3 %v4402_v58 }
 0x23d   :  { %898 = vmatpush.msrb.mxu0 %v4408_v52  ;;  %918 = vmatpush.msrb.mxu1 %v4414_v54 }
 0x23e   :  { %938 = vmatpush.msrb.mxu2 %v4420_v51  ;;  %958 = vmatpush.msrb.mxu3 %v4426_v48 }
 0x23f   :  { %899 = vmatpush.msrb.mxu0 %v4432_v46  ;;  %919 = vmatpush.msrb.mxu1 %v4438_v42 }
 0x240   :  { %939 = vmatpush.msrb.mxu2 %v4444_v49  ;;  %959 = vmatpush.msrb.mxu3 %v4450_v37 }
 0x241   :  { %900 = vmatpush.msrb.mxu0 %v4456_v0  ;;  %920 = vmatpush.msrb.mxu1 %v4462_v1 }
 0x242   :  { %940 = vmatpush.msrb.mxu2 %v4468_v2  ;;  %960 = vmatpush.msrb.mxu3 %v4474_v3 }
 0x243   :  { %901 = vmatpush.msrb.mxu0 %v4480_v4  ;;  %921 = vmatpush.msrb.mxu1 %v4486_v5 }
 0x244   :  { %941 = vmatpush.msrb.mxu2 %v4492_v6  ;;  %961 = vmatpush.msrb.mxu3 %v4498_v7 }
 0x245   :  { %902 = vmatpush.msrb.mxu0 %v4504_v8  ;;  %922 = vmatpush.msrb.mxu1 %v4510_v9  ;;  %v2938_v9 = vld [vmem:[%s5808_s0 + $0x70] sm:$0xff] }
 0x246   :  { %942 = vmatpush.msrb.mxu2 %v4516_v10  ;;  %962 = vmatpush.msrb.mxu3 %v4522_v12 }
 0x247   :  { %903 = vmatpush.msrb.mxu0 %v4528_v13  ;;  %923 = vmatpush.msrb.mxu1 %v4534_v14 }
 0x248   :  { %943 = vmatpush.msrb.mxu2 %v4540_v15  ;;  %963 = vmatpush.msrb.mxu3 %v4546_v16  ;;  %v4570_v16 = vld [vmem:[%s5809_s1 + $0x18] sm:$0xff] }
 0x249   :  { %904 = vmatpush.msrb.mxu0 %v4552_v17  ;;  %924 = vmatpush.msrb.mxu1 %v4558_v18  ;;  %6158 = vst [vmem:[#allocation30_spill] sm:$0xff] %v4570_v16  ;;  %v2936_v17 = vld [vmem:[%s5808_s0 + $0x60] sm:$0xff]  ;;  %v2937_v18 = vld [vmem:[%s5808_s0 + $0x68] sm:$0xff] }
 0x24a   :  { %944 = vmatpush.msrb.mxu2 %v4564_v19  ;;  %964 = vmatpush.msrb.mxu3 %v4570_v16 }
 0x2a6   :  { %v598_v15 = vpop.f32.mrf.mxu0  ;;  %v618_v14 = vpop.f32.mrf.mxu1 }
 0x2a7   :  { %v661_v13 = vadd.f32 %v2936_v17, %v598_v15  ;;  %v662_v12 = vadd.f32 %v2937_v18, %v618_v14 }
 0x2a9   :  { %v2940_v19 = vmul.f32 -1.442695, %v661_v13  ;;  %v2941_v10 = vmul.f32 -1.442695, %v662_v12  ;;  %v2939_v12 = vld [vmem:[%s5808_s0 + $0x78] sm:$0xff] }
 0x2ab   :  { %3060 = vpow2.f32 %v2940_v19 }
 0x2ac   :  { %3062 = vpow2.f32 %v2941_v10 }
 0x2ad   :  { %v638_v16 = vpop.f32.mrf.mxu2  ;;  %v658_v13 = vpop.f32.mrf.mxu3 }
 0x2ae   :  { %v663_v8 = vadd.f32 %v2938_v9, %v638_v16  ;;  %v664_v18 = vadd.f32 %v2939_v12, %v658_v13 }
 0x2b0   :  { %v2942_v7 = vmul.f32 -1.442695, %v663_v8 }
 0x2b1   :  { %v3061_v6 = vpop.eup %3060 }
 0x2b2   :  { %v3063_v5 = vpop.eup %3062  ;;  %v674_v4 = vadd.f32 1.0, %v3061_v6  ;;  %3064 = vpow2.f32 %v2942_v7 }
 0x2b3   :  { %v675_v3 = vadd.f32 1.0, %v3063_v5 }
 0x2b4   :  { %3066 = vrcp.f32 %v674_v4  ;;  %v688_v6 = vand.u32 2147483648, %v674_v4  ;;  %v686_v2 = vand.u32 2147483647, %v674_v4  ;;  %vm682_vm6 = vweird.f32 %v674_v4 }
 0x2b5   :  { %3068 = vrcp.f32 %v675_v3  ;;  %v703_v5 = vand.u32 2147483648, %v675_v3  ;;  %v701_v0 = vand.u32 2147483647, %v675_v3  ;;  %vm697_vm7 = vweird.f32 %v675_v3 }
 0x2b6   :  { %v689_v13 = vor.u32 1.1754944e-38, %v688_v6  ;;  %vm687_vm10 = vcmp.eq.f32.partialorder %v686_v2, 8.507059e+37 }
 0x2b7   :  { %vm702_vm11 = vcmp.eq.f32.partialorder %v701_v0, 8.507059e+37 }
 0x2b8   :  { %v3065_v14 = vpop.eup %3064 }
 0x2b9   :  { %v676_v15 = vadd.f32 1.0, %v3065_v14 }
 0x2ba   :  { %v3067_v17 = vpop.eup %3066 }
 0x2bb   :  { %v3069_v10 = vpop.eup %3068  ;;  %v678_v19 = vmul.f32 %v3067_v17, %v674_v4  ;;  %3070 = vrcp.f32 %v676_v15  ;;  %vm683_vm4 = vweird.f32 %v3067_v17  ;;  %v718_v6 = vand.u32 2147483648, %v676_v15 }
 0x2bc   :  { %v693_v8 = vmul.f32 %v3069_v10, %v675_v3  ;;  %3072 = vtanh.f32 %v664_v18  ;;  %vm698_vm5 = vweird.f32 %v3069_v10  ;;  %vm684_vm8 = vmor %vm682_vm6, %vm683_vm4  ;;  %vm712_vm13 = vweird.f32 %v676_v15 }
 0x2bd   :  { %v679_v9 = vsub.f32 1.0, %v678_v19  ;;  %vm699_vm9 = vmor %vm697_vm7, %vm698_vm5  ;;  %v704_v19 = vor.u32 1.1754944e-38, %v703_v5  ;;  %v719_v2 = vor.u32 1.1754944e-38, %v718_v6  ;;  %v6166_v5 = vld [vmem:[#allocation14_spill] sm:$0xff]  ;;  %v6177_v6 = vld [vmem:[#allocation33_spill] sm:$0xff] }
 0x2be   :  { %v694_v16 = vsub.f32 1.0, %v693_v8 }
 0x2bf   :  { %v680_v7 = vmul.f32 %v3067_v17, %v679_v9 }
 0x2c0   :  { %v695_v1 = vmul.f32 %v3069_v10, %v694_v16 }
 0x2c1   :  { %v3071_v37 = vpop.eup %3070  ;;  %v681_v49 = vadd.f32 %v3067_v17, %v680_v7 }
 0x2c2   :  { %v708_v12 = vmul.f32 %v3071_v37, %v676_v15  ;;  %v696_v14 = vadd.f32 %v3069_v10, %v695_v1  ;;  %v3073_v18 = vpop.eup %3072  ;;  %vm713_vm12 = vweird.f32 %v3071_v37 }
 0x2c3   :  { %v685_v8 = vsel %vm684_vm8, %v3067_v17, %v681_v49  ;;  %v716_v49 = vand.u32 2147483647, %v676_v15  ;;  %vm714_vm14 = vmor %vm712_vm13, %vm713_vm12  ;;  %v6164_v15 = vld [vmem:[#allocation13_spill] sm:$0xff] }
 0x2c4   :  { %v709_v42 = vsub.f32 1.0, %v708_v12  ;;  %v690_v9 = vsel %vm687_vm10, %v689_v13, %v685_v8  ;;  %v700_v46 = vsel %vm699_vm9, %v3069_v10, %v696_v14  ;;  %v6165_v10 = vld [vmem:[#allocation27_spill] sm:$0xff]  ;;  %v6168_v13 = vld [vmem:[#allocation16_spill] sm:$0xff]  ;;  %v6171_v8 = vld [vmem:[#allocation18_spill] sm:$0xff] }
 0x2c5   :  { %v705_v16 = vsel %vm702_vm11, %v704_v19, %v700_v46  ;;  %v724_v48 = vmul.f32 %v3073_v18, %v690_v9  ;;  %vm717_vm15 = vcmp.eq.f32.partialorder %v716_v49, 8.507059e+37  ;;  %v6167_v12 = vld [vmem:[#allocation15_spill] sm:$0xff]  ;;  %v6170_v19 = vld [vmem:[#allocation17_spill] sm:$0xff]  ;;  %v6173_v9 = vld [vmem:[#allocation32_spill] sm:$0xff] }
 0x2c6   :  { %v710_v51 = vmul.f32 %v3071_v37, %v709_v42  ;;  %v723_v7 = vmul.f32 %v705_v16, %v4183_v11  ;;  %v6159_v11 = vld [vmem:[#allocation9_spill] sm:$0xff]  ;;  %v6162_v42 = vld [vmem:[#allocation11_spill] sm:$0xff]  ;;  %v6174_v16 = vld [vmem:[#allocation20_spill] sm:$0xff] }
 0x2c7   :  { %v6169_v14 = vld [vmem:[#allocation31_spill] sm:$0xff]  ;;  %v6178_v49 = vld [vmem:[#allocation24_spill] sm:$0xff] }
 0x2c8   :  { %v4586_v4 = vadd.f32 %v724_v48, %v723_v7  ;;  %v711_v3 = vadd.f32 %v3071_v37, %v710_v51  ;;  %v6160_v51 = vld [vmem:[#allocation10_spill] sm:$0xff]  ;;  %v6161_v48 = vld [vmem:[#allocation23_spill] sm:$0xff]  ;;  %v6175_v7 = vld [vmem:[#allocation21_spill] sm:$0xff] }
 0x2c9   :  { %v6172_v18 = vld [vmem:[#allocation19_spill] sm:$0xff] }
 0x2ca   :  { %3074 = vtanh.f32 %v4586_v4  ;;  %v715_v1 = vsel %vm714_vm14, %v3071_v37, %v711_v3  ;;  %v6163_v37 = vld [vmem:[#allocation12_spill] sm:$0xff]  ;;  %v6176_v3 = vld [vmem:[#allocation22_spill] sm:$0xff] }
 0x2cb   :  { %v720_v0 = vsel %vm717_vm15, %v719_v2, %v715_v1  ;;  %v6179_v1 = vld [vmem:[#allocation25_spill] sm:$0xff]  ;;  %v6180_v2 = vld [vmem:[#allocation26_spill] sm:$0xff] }
 0x2d0   :  { %v3075_v17 = vpop.eup %3074 }
 0x2d1   :  { %v727_v46 = vmul.f32 %v3075_v17, %v720_v0  ;;  %v6181_v17 = vld [vmem:[#allocation34_spill] sm:$0xff]  ;;  %v6182_v0 = vld [vmem:[#allocation28_spill] sm:$0xff] }
 0x2d3   :  { %2943 = vst [vmem:[%s5813_s5 + $0x18] sm:$0xff] %v727_v46  ;;  %751 = vmatmul.f32.vlgmr.msra.gmra.mxu0 %v727_v46  ;;  %771 = vmatmul.f32.vlgmr.msra.gmra.mxu1 %v727_v46 }
 0x2d4   :  { %791 = vmatmul.f32.vlgmr.msra.gmra.mxu2 %v727_v46  ;;  %811 = vmatmul.f32.vlgmr.msra.gmra.mxu3 %v727_v46  ;;  %v6183_v46 = vld [vmem:[#allocation29_spill] sm:$0xff] }
 0x2d5   :  { %1043 = vmatpush.msra.mxu0 %v4192_v50  ;;  %1063 = vmatpush.msra.mxu1 %v4198_v20 }
 0x2d6   :  { %1083 = vmatpush.msra.mxu2 %v4204_v21  ;;  %1103 = vmatpush.msra.mxu3 %v4210_v22 }
 0x2d7   :  { %1044 = vmatpush.msra.mxu0 %v4216_v23  ;;  %1064 = vmatpush.msra.mxu1 %v4222_v24 }
 0x2d8   :  { %1084 = vmatpush.msra.mxu2 %v4228_v25  ;;  %1104 = vmatpush.msra.mxu3 %v4234_v26 }
 0x2d9   :  { %1045 = vmatpush.msra.mxu0 %v4240_v27  ;;  %1065 = vmatpush.msra.mxu1 %v4246_v28 }
 0x2da   :  { %1085 = vmatpush.msra.mxu2 %v4252_v29  ;;  %1105 = vmatpush.msra.mxu3 %v4258_v30 }
 0x2db   :  { %1046 = vmatpush.msra.mxu0 %v4264_v31  ;;  %1066 = vmatpush.msra.mxu1 %v4270_v32 }
 0x2dc   :  { %1086 = vmatpush.msra.mxu2 %v4276_v33  ;;  %1106 = vmatpush.msra.mxu3 %v4282_v35 }
 0x2dd   :  { %1047 = vmatpush.msra.mxu0 %v4288_v39  ;;  %1067 = vmatpush.msra.mxu1 %v4294_v43 }
 0x2de   :  { %1087 = vmatpush.msra.mxu2 %v4300_v47  ;;  %1107 = vmatpush.msra.mxu3 %v4306_v63 }
 0x2df   :  { %1048 = vmatpush.msra.mxu0 %v4312_v34  ;;  %1068 = vmatpush.msra.mxu1 %v4318_v36 }
 0x2e0   :  { %1088 = vmatpush.msra.mxu2 %v4324_v40  ;;  %1108 = vmatpush.msra.mxu3 %v4330_v56 }
 0x2e1   :  { %1049 = vmatpush.msra.mxu0 %v4336_v45  ;;  %1069 = vmatpush.msra.mxu1 %v4342_v59 }
 0x2e2   :  { %1089 = vmatpush.msra.mxu2 %v4348_v53  ;;  %1109 = vmatpush.msra.mxu3 %v4354_v61 }
 0x2e3   :  { %1050 = vmatpush.msra.mxu0 %v4360_v62  ;;  %1070 = vmatpush.msra.mxu1 %v4366_v44 }
 0x2e4   :  { %1090 = vmatpush.msra.mxu2 %v4372_v57  ;;  %1110 = vmatpush.msra.mxu3 %v4378_v60 }
 0x2e5   :  { %1051 = vmatpush.msra.mxu0 %v4384_v55  ;;  %1071 = vmatpush.msra.mxu1 %v4390_v38 }
 0x2e6   :  { %1091 = vmatpush.msra.mxu2 %v4396_v41  ;;  %1111 = vmatpush.msra.mxu3 %v4402_v58 }
 0x2e7   :  { %1052 = vmatpush.msra.mxu0 %v4408_v52  ;;  %1072 = vmatpush.msra.mxu1 %v4414_v54 }
 0x2e8   :  { %1092 = vmatpush.msra.mxu2 %v6159_v11  ;;  %1112 = vmatpush.msra.mxu3 %v6160_v51 }
 0x2e9   :  { %1053 = vmatpush.msra.mxu0 %v6161_v48  ;;  %1073 = vmatpush.msra.mxu1 %v6162_v42 }
 0x2ea   :  { %1093 = vmatpush.msra.mxu2 %v6163_v37  ;;  %1113 = vmatpush.msra.mxu3 %v6164_v15 }
 0x2eb   :  { %1054 = vmatpush.msra.mxu0 %v6165_v10  ;;  %1074 = vmatpush.msra.mxu1 %v6166_v5 }
 0x2ec   :  { %1094 = vmatpush.msra.mxu2 %v6167_v12  ;;  %1114 = vmatpush.msra.mxu3 %v6168_v13 }
 0x2ed   :  { %1055 = vmatpush.msra.mxu0 %v6169_v14  ;;  %1075 = vmatpush.msra.mxu1 %v6170_v19 }
 0x2ee   :  { %1095 = vmatpush.msra.mxu2 %v6171_v8  ;;  %1115 = vmatpush.msra.mxu3 %v6172_v18 }
 0x2ef   :  { %1056 = vmatpush.msra.mxu0 %v6173_v9  ;;  %1076 = vmatpush.msra.mxu1 %v6174_v16  ;;  %v6184_v9 = vld [vmem:[#allocation30_spill] sm:$0xff] }
 0x2f0   :  { %1096 = vmatpush.msra.mxu2 %v6175_v7  ;;  %1116 = vmatpush.msra.mxu3 %v6176_v3  ;;  %v2944_v3 = vld [vmem:[%s5808_s0 + $0x80] sm:$0xff] }
 0x2f1   :  { %1057 = vmatpush.msra.mxu0 %v6177_v6  ;;  %1077 = vmatpush.msra.mxu1 %v6178_v49  ;;  %v2945_v49 = vld [vmem:[%s5808_s0 + $0x88] sm:$0xff] }
 0x2f2   :  { %1097 = vmatpush.msra.mxu2 %v6179_v1  ;;  %1117 = vmatpush.msra.mxu3 %v6180_v2 }
 0x2f3   :  { %1058 = vmatpush.msra.mxu0 %v6181_v17  ;;  %1078 = vmatpush.msra.mxu1 %v6182_v0 }
 0x2f4   :  { %1098 = vmatpush.msra.mxu2 %v6183_v46  ;;  %1118 = vmatpush.msra.mxu3 %v6184_v9  ;;  %v2946_v46 = vld [vmem:[%s5808_s0 + $0x90] sm:$0xff] }
 0x350   :  { %v752_v6 = vpop.f32.mrf.mxu0  ;;  %v772_v1 = vpop.f32.mrf.mxu1 }
 0x351   :  { %v815_v7 = vadd.f32 %v2944_v3, %v752_v6  ;;  %v816_v2 = vadd.f32 %v2945_v49, %v772_v1 }
 0x353   :  { %v2948_v16 = vmul.f32 -1.442695, %v815_v7  ;;  %v2949_v17 = vmul.f32 -1.442695, %v816_v2  ;;  %v2947_v7 = vld [vmem:[%s5808_s0 + $0x98] sm:$0xff] }
 0x355   :  { %3076 = vpow2.f32 %v2948_v16 }
 0x356   :  { %3078 = vpow2.f32 %v2949_v17 }
 0x357   :  { %v792_v9 = vpop.f32.mrf.mxu2  ;;  %v812_v16 = vpop.f32.mrf.mxu3 }
 0x358   :  { %v817_v0 = vadd.f32 %v2946_v46, %v792_v9  ;;  %v818_v1 = vadd.f32 %v2947_v7, %v812_v16 }
 0x35a   :  { %v2950_v18 = vmul.f32 -1.442695, %v817_v0 }
 0x35b   :  { %v3077_v8 = vpop.eup %3076 }
 0x35c   :  { %v3079_v19 = vpop.eup %3078  ;;  %v828_v14 = vadd.f32 1.0, %v3077_v8  ;;  %3080 = vpow2.f32 %v2950_v18 }
 0x35d   :  { %v829_v13 = vadd.f32 1.0, %v3079_v19 }
 0x35e   :  { %3082 = vrcp.f32 %v828_v14  ;;  %v842_v8 = vand.u32 2147483648, %v828_v14  ;;  %v840_v12 = vand.u32 2147483647, %v828_v14  ;;  %vm836_vm2 = vweird.f32 %v828_v14 }
 0x35f   :  { %3084 = vrcp.f32 %v829_v13  ;;  %v857_v19 = vand.u32 2147483648, %v829_v13  ;;  %v855_v10 = vand.u32 2147483647, %v829_v13  ;;  %vm851_vm3 = vweird.f32 %v829_v13 }
 0x360   :  { %v843_v16 = vor.u32 1.1754944e-38, %v842_v8  ;;  %vm841_vm6 = vcmp.eq.f32.partialorder %v840_v12, 8.507059e+37 }
 0x361   :  { %vm856_vm7 = vcmp.eq.f32.partialorder %v855_v10, 8.507059e+37 }
 0x362   :  { %v3081_v3 = vpop.eup %3080 }
 0x363   :  { %v830_v6 = vadd.f32 1.0, %v3081_v3 }
 0x364   :  { %v3083_v49 = vpop.eup %3082 }
 0x365   :  { %v3085_v2 = vpop.eup %3084  ;;  %v832_v17 = vmul.f32 %v3083_v49, %v828_v14  ;;  %3086 = vrcp.f32 %v830_v6  ;;  %vm837_vm0 = vweird.f32 %v3083_v49  ;;  %v872_v8 = vand.u32 2147483648, %v830_v6 }
 0x366   :  { %v847_v9 = vmul.f32 %v3085_v2, %v829_v13  ;;  %3088 = vtanh.f32 %v818_v1  ;;  %vm852_vm1 = vweird.f32 %v3085_v2  ;;  %vm838_vm4 = vmor %vm836_vm2, %vm837_vm0  ;;  %vm866_vm9 = vweird.f32 %v830_v6 }
 0x367   :  { %v833_v0 = vsub.f32 1.0, %v832_v17  ;;  %vm853_vm5 = vmor %vm851_vm3, %vm852_vm1  ;;  %v858_v17 = vor.u32 1.1754944e-38, %v857_v19  ;;  %v873_v12 = vor.u32 1.1754944e-38, %v872_v8 }
 0x368   :  { %v848_v46 = vsub.f32 1.0, %v847_v9 }
 0x369   :  { %v834_v18 = vmul.f32 %v3083_v49, %v833_v0 }
 0x36a   :  { %v849_v5 = vmul.f32 %v3085_v2, %v848_v46 }
 0x36b   :  { %v3087_v15 = vpop.eup %3086  ;;  %v835_v37 = vadd.f32 %v3083_v49, %v834_v18 }
 0x36c   :  { %v862_v7 = vmul.f32 %v3087_v15, %v830_v6  ;;  %v850_v3 = vadd.f32 %v3085_v2, %v849_v5  ;;  %v3089_v1 = vpop.eup %3088  ;;  %vm867_vm8 = vweird.f32 %v3087_v15 }
 0x36d   :  { %v839_v9 = vsel %vm838_vm4, %v3083_v49, %v835_v37  ;;  %v870_v37 = vand.u32 2147483647, %v830_v6  ;;  %vm868_vm10 = vmor %vm866_vm9, %vm867_vm8 }
 0x36e   :  { %v863_v42 = vsub.f32 1.0, %v862_v7  ;;  %v844_v0 = vsel %vm841_vm6, %v843_v16, %v839_v9  ;;  %v854_v48 = vsel %vm853_vm5, %v3085_v2, %v850_v3 }
 0x36f   :  { %v859_v46 = vsel %vm856_vm7, %v858_v17, %v854_v48  ;;  %v878_v51 = vmul.f32 %v3089_v1, %v844_v0  ;;  %vm871_vm11 = vcmp.eq.f32.partialorder %v870_v37, 8.507059e+37 }
 0x370   :  { %v864_v11 = vmul.f32 %v3087_v15, %v863_v42  ;;  %v877_v18 = vmul.f32 %v859_v46, %v4586_v4 }
 0x372   :  { %v4669_v14 = vadd.f32 %v878_v51, %v877_v18  ;;  %v865_v13 = vadd.f32 %v3087_v15, %v864_v11 }
 0x374   :  { %3090 = vtanh.f32 %v4669_v14  ;;  %v869_v5 = vsel %vm868_vm10, %v3087_v15, %v865_v13  ;;  %v2955_v15 = vld [vmem:[%s5808_s0 + $0xb8] sm:$0xff] }
 0x375   :  { %v874_v10 = vsel %vm871_vm11, %v873_v12, %v869_v5 }
 0x37a   :  { %v3091_v49 = vpop.eup %3090 }
 0x37b   :  { %v4672_v48 = vmul.f32 %v3091_v49, %v874_v10 }
 0x37d   :  { %905 = vmatmul.f32.vlgmr.msrb.gmra.mxu0 %v4672_v48  ;;  %925 = vmatmul.f32.vlgmr.msrb.gmra.mxu1 %v4672_v48 }
 0x37e   :  { %945 = vmatmul.f32.vlgmr.msrb.gmra.mxu2 %v4672_v48  ;;  %965 = vmatmul.f32.vlgmr.msrb.gmra.mxu3 %v4672_v48 }
 0x37f   :  { %1197 = vmatpush.msrb.mxu0 %v4192_v50  ;;  %1217 = vmatpush.msrb.mxu1 %v4198_v20  ;;  %v6185_v50 = vld [vmem:[#allocation9_spill] sm:$0xff]  ;;  %v6186_v20 = vld [vmem:[#allocation10_spill] sm:$0xff] }
 0x380   :  { %1237 = vmatpush.msrb.mxu2 %v4204_v21  ;;  %1257 = vmatpush.msrb.mxu3 %v4210_v22  ;;  %v6187_v21 = vld [vmem:[#allocation23_spill] sm:$0xff] }
 0x381   :  { %1198 = vmatpush.msrb.mxu0 %v4216_v23  ;;  %1218 = vmatpush.msrb.mxu1 %v4222_v24  ;;  %v6188_v22 = vld [vmem:[#allocation11_spill] sm:$0xff]  ;;  %v6189_v23 = vld [vmem:[#allocation12_spill] sm:$0xff]  ;;  %v6190_v24 = vld [vmem:[#allocation13_spill] sm:$0xff] }
 0x382   :  { %1238 = vmatpush.msrb.mxu2 %v4228_v25  ;;  %1258 = vmatpush.msrb.mxu3 %v4234_v26  ;;  %v6191_v25 = vld [vmem:[#allocation27_spill] sm:$0xff]  ;;  %v6192_v26 = vld [vmem:[#allocation14_spill] sm:$0xff] }
 0x383   :  { %1199 = vmatpush.msrb.mxu0 %v4240_v27  ;;  %1219 = vmatpush.msrb.mxu1 %v4246_v28  ;;  %v6193_v27 = vld [vmem:[#allocation15_spill] sm:$0xff]  ;;  %v6194_v28 = vld [vmem:[#allocation16_spill] sm:$0xff] }
 0x384   :  { %1239 = vmatpush.msrb.mxu2 %v4252_v29  ;;  %1259 = vmatpush.msrb.mxu3 %v4258_v30  ;;  %v6195_v29 = vld [vmem:[#allocation31_spill] sm:$0xff]  ;;  %v6196_v30 = vld [vmem:[#allocation17_spill] sm:$0xff] }
 0x385   :  { %1200 = vmatpush.msrb.mxu0 %v4264_v31  ;;  %1220 = vmatpush.msrb.mxu1 %v4270_v32  ;;  %v6197_v31 = vld [vmem:[#allocation18_spill] sm:$0xff]  ;;  %v6198_v32 = vld [vmem:[#allocation19_spill] sm:$0xff] }
 0x386   :  { %1240 = vmatpush.msrb.mxu2 %v4276_v33  ;;  %1260 = vmatpush.msrb.mxu3 %v4282_v35  ;;  %v6199_v33 = vld [vmem:[#allocation32_spill] sm:$0xff] }
 0x387   :  { %1201 = vmatpush.msrb.mxu0 %v4288_v39  ;;  %1221 = vmatpush.msrb.mxu1 %v4294_v43  ;;  %v6200_v35 = vld [vmem:[#allocation20_spill] sm:$0xff]  ;;  %v6201_v39 = vld [vmem:[#allocation21_spill] sm:$0xff]  ;;  %v6202_v43 = vld [vmem:[#allocation22_spill] sm:$0xff] }
 0x388   :  { %1241 = vmatpush.msrb.mxu2 %v4300_v47  ;;  %1261 = vmatpush.msrb.mxu3 %v4306_v63  ;;  %v6203_v47 = vld [vmem:[#allocation33_spill] sm:$0xff]  ;;  %v6204_v63 = vld [vmem:[#allocation24_spill] sm:$0xff] }
 0x389   :  { %1202 = vmatpush.msrb.mxu0 %v4312_v34  ;;  %1222 = vmatpush.msrb.mxu1 %v4318_v36  ;;  %v6205_v34 = vld [vmem:[#allocation25_spill] sm:$0xff]  ;;  %v6206_v36 = vld [vmem:[#allocation26_spill] sm:$0xff] }
 0x38a   :  { %1242 = vmatpush.msrb.mxu2 %v4324_v40  ;;  %1262 = vmatpush.msrb.mxu3 %v4330_v56  ;;  %v6207_v40 = vld [vmem:[#allocation34_spill] sm:$0xff]  ;;  %v6208_v56 = vld [vmem:[#allocation28_spill] sm:$0xff] }
 0x38b   :  { %1203 = vmatpush.msrb.mxu0 %v4336_v45  ;;  %1223 = vmatpush.msrb.mxu1 %v4342_v59  ;;  %v6209_v45 = vld [vmem:[#allocation29_spill] sm:$0xff]  ;;  %v6210_v59 = vld [vmem:[#allocation30_spill] sm:$0xff] }
 0x38c   :  { %1243 = vmatpush.msrb.mxu2 %v4348_v53  ;;  %1263 = vmatpush.msrb.mxu3 %v4354_v61  ;;  %v2952_v53 = vld [vmem:[%s5808_s0 + $0xa0] sm:$0xff]  ;;  %v2953_v61 = vld [vmem:[%s5808_s0 + $0xa8] sm:$0xff] }
 0x38d   :  { %1204 = vmatpush.msrb.mxu0 %v4360_v62  ;;  %1224 = vmatpush.msrb.mxu1 %v4366_v44 }
 0x38e   :  { %1244 = vmatpush.msrb.mxu2 %v4372_v57  ;;  %1264 = vmatpush.msrb.mxu3 %v4378_v60 }
 0x38f   :  { %1205 = vmatpush.msrb.mxu0 %v4384_v55  ;;  %1225 = vmatpush.msrb.mxu1 %v4390_v38 }
 0x390   :  { %1245 = vmatpush.msrb.mxu2 %v4396_v41  ;;  %1265 = vmatpush.msrb.mxu3 %v4402_v58  ;;  %v2954_v41 = vld [vmem:[%s5808_s0 + $0xb0] sm:$0xff] }
 0x391   :  { %1206 = vmatpush.msrb.mxu0 %v4408_v52  ;;  %1226 = vmatpush.msrb.mxu1 %v4414_v54 }
 0x392   :  { %1246 = vmatpush.msrb.mxu2 %v6185_v50  ;;  %1266 = vmatpush.msrb.mxu3 %v6186_v20 }
 0x393   :  { %1207 = vmatpush.msrb.mxu0 %v6187_v21  ;;  %1227 = vmatpush.msrb.mxu1 %v6188_v22 }
 0x394   :  { %1247 = vmatpush.msrb.mxu2 %v6189_v23  ;;  %1267 = vmatpush.msrb.mxu3 %v6190_v24 }
 0x395   :  { %1208 = vmatpush.msrb.mxu0 %v6191_v25  ;;  %1228 = vmatpush.msrb.mxu1 %v6192_v26 }
 0x396   :  { %1248 = vmatpush.msrb.mxu2 %v6193_v27  ;;  %1268 = vmatpush.msrb.mxu3 %v6194_v28 }
 0x397   :  { %1209 = vmatpush.msrb.mxu0 %v6195_v29  ;;  %1229 = vmatpush.msrb.mxu1 %v6196_v30 }
 0x398   :  { %1249 = vmatpush.msrb.mxu2 %v6197_v31  ;;  %1269 = vmatpush.msrb.mxu3 %v6198_v32 }
 0x399   :  { %1210 = vmatpush.msrb.mxu0 %v6199_v33  ;;  %1230 = vmatpush.msrb.mxu1 %v6200_v35 }
 0x39a   :  { %1250 = vmatpush.msrb.mxu2 %v6201_v39  ;;  %1270 = vmatpush.msrb.mxu3 %v6202_v43 }
 0x39b   :  { %1211 = vmatpush.msrb.mxu0 %v6203_v47  ;;  %1231 = vmatpush.msrb.mxu1 %v6204_v63 }
 0x39c   :  { %1251 = vmatpush.msrb.mxu2 %v6205_v34  ;;  %1271 = vmatpush.msrb.mxu3 %v6206_v36  ;;  %v1415_v36 = vld [vmem:[#allocation3 + $0x1e8] sm:$0xff] }
 0x39d   :  { %1212 = vmatpush.msrb.mxu0 %v6207_v40  ;;  %1232 = vmatpush.msrb.mxu1 %v6208_v56  ;;  %v1416_v40 = vld [vmem:[#allocation3 + $0x1f0] sm:$0xff]  ;;  %v1417_v56 = vld [vmem:[#allocation3 + $0x1f8] sm:$0xff] }
 0x39e   :  { %1252 = vmatpush.msrb.mxu2 %v6209_v45  ;;  %1272 = vmatpush.msrb.mxu3 %v6210_v59  ;;  %v1410_v45 = vld [vmem:[#allocation3 + $0x1c0] sm:$0xff]  ;;  %v1411_v59 = vld [vmem:[#allocation3 + $0x1c8] sm:$0xff] }
 0x3fa   :  { %v906_v62 = vpop.f32.mrf.mxu0  ;;  %v926_v44 = vpop.f32.mrf.mxu1 }
 0x3fb   :  { %v969_v57 = vadd.f32 %v2952_v53, %v906_v62  ;;  %v970_v60 = vadd.f32 %v2953_v61, %v926_v44  ;;  %v1412_v53 = vld [vmem:[#allocation3 + $0x1d0] sm:$0xff]  ;;  %v1413_v61 = vld [vmem:[#allocation3 + $0x1d8] sm:$0xff]  ;;  %v1406_v62 = vld [vmem:[#allocation3 + $0x1a0] sm:$0xff] }
 0x3fc   :  { %v1407_v44 = vld [vmem:[#allocation3 + $0x1a8] sm:$0xff] }
 0x3fd   :  { %v2956_v55 = vmul.f32 -1.442695, %v969_v57  ;;  %v2957_v38 = vmul.f32 -1.442695, %v970_v60  ;;  %v1408_v57 = vld [vmem:[#allocation3 + $0x1b0] sm:$0xff]  ;;  %v1409_v60 = vld [vmem:[#allocation3 + $0x1b8] sm:$0xff] }
 0x3ff   :  { %3092 = vpow2.f32 %v2956_v55  ;;  %v1402_v55 = vld [vmem:[#allocation3 + $0x180] sm:$0xff] }
 0x400   :  { %3094 = vpow2.f32 %v2957_v38  ;;  %v1403_v38 = vld [vmem:[#allocation3 + $0x188] sm:$0xff] }
 0x401   :  { %v946_v58 = vpop.f32.mrf.mxu2  ;;  %v966_v6 = vpop.f32.mrf.mxu3 }
 0x402   :  { %v971_v52 = vadd.f32 %v2954_v41, %v946_v58  ;;  %v972_v16 = vadd.f32 %v2955_v15, %v966_v6  ;;  %v1404_v41 = vld [vmem:[#allocation3 + $0x190] sm:$0xff]  ;;  %v2960_v58 = vld [vmem:[%s5808_s0 + $0xc0] sm:$0xff] }
 0x404   :  { %v2958_v54 = vmul.f32 -1.442695, %v971_v52  ;;  %v2961_v52 = vld [vmem:[%s5808_s0 + $0xc8] sm:$0xff] }
 0x405   :  { %v3093_v4 = vpop.eup %3092 }
 0x406   :  { %v3095_v11 = vpop.eup %3094  ;;  %v982_v51 = vadd.f32 1.0, %v3093_v4  ;;  %3096 = vpow2.f32 %v2958_v54  ;;  %v1405_v54 = vld [vmem:[#allocation3 + $0x198] sm:$0xff]  ;;  %v1398_v4 = vld [vmem:[#allocation3 + $0x160] sm:$0xff] }
 0x407   :  { %v983_v42 = vadd.f32 1.0, %v3095_v11  ;;  %v1399_v11 = vld [vmem:[#allocation3 + $0x168] sm:$0xff] }
 0x408   :  { %3098 = vrcp.f32 %v982_v51  ;;  %v996_v46 = vand.u32 2147483648, %v982_v51  ;;  %v994_v8 = vand.u32 2147483647, %v982_v51  ;;  %vm990_vm14 = vweird.f32 %v982_v51 }
 0x409   :  { %3100 = vrcp.f32 %v983_v42  ;;  %v1011_v18 = vand.u32 2147483648, %v983_v42  ;;  %v1009_v5 = vand.u32 2147483647, %v983_v42  ;;  %vm1005_vm15 = vweird.f32 %v983_v42 }
 0x40a   :  { %v997_v50 = vor.u32 1.1754944e-38, %v996_v46  ;;  %vm995_vm2 = vcmp.eq.f32.partialorder %v994_v8, 8.507059e+37  ;;  %v1393_v8 = vld [vmem:[#allocation3 + $0x138] sm:$0xff] }
 0x40b   :  { %v1012_v21 = vor.u32 1.1754944e-38, %v1011_v18  ;;  %vm1010_vm3 = vcmp.eq.f32.partialorder %v1009_v5, 8.507059e+37  ;;  %v1387_v5 = vld [vmem:[#allocation3 + $0x108] sm:$0xff] }
 0x40c   :  { %v3097_v2 = vpop.eup %3096 }
 0x40d   :  { %v984_v19 = vadd.f32 1.0, %v3097_v2  ;;  %v1394_v2 = vld [vmem:[#allocation3 + $0x140] sm:$0xff] }
 0x40e   :  { %v3099_v7 = vpop.eup %3098 }
 0x40f   :  { %v3101_v3 = vpop.eup %3100  ;;  %v986_v17 = vmul.f32 %v3099_v7, %v982_v51  ;;  %3102 = vrcp.f32 %v984_v19  ;;  %vm991_vm12 = vweird.f32 %v3099_v7  ;;  %v1026_v33 = vand.u32 2147483648, %v984_v19  ;;  %v1400_v51 = vld [vmem:[#allocation3 + $0x170] sm:$0xff] }
 0x410   :  { %v1001_v9 = vmul.f32 %v3101_v3, %v983_v42  ;;  %3104 = vtanh.f32 %v972_v16  ;;  %vm1006_vm13 = vweird.f32 %v3101_v3  ;;  %vm992_vm0 = vmor %vm990_vm14, %vm991_vm12  ;;  %vm1020_vm5 = vweird.f32 %v984_v19  ;;  %v1401_v42 = vld [vmem:[#allocation3 + $0x178] sm:$0xff] }
 0x411   :  { %v987_v1 = vsub.f32 1.0, %v986_v17  ;;  %vm1007_vm1 = vmor %vm1005_vm15, %vm1006_vm13  ;;  %v1024_v35 = vand.u32 2147483647, %v984_v19  ;;  %v1027_v43 = vor.u32 1.1754944e-38, %v1026_v33  ;;  %v1397_v17 = vld [vmem:[#allocation3 + $0x158] sm:$0xff] }
 0x412   :  { %v1002_v0 = vsub.f32 1.0, %v1001_v9  ;;  %v1390_v9 = vld [vmem:[#allocation3 + $0x120] sm:$0xff] }
 0x413   :  { %v988_v13 = vmul.f32 %v3099_v7, %v987_v1  ;;  %vm1025_vm7 = vcmp.eq.f32.partialorder %v1024_v35, 8.507059e+37  ;;  %v1391_v1 = vld [vmem:[#allocation3 + $0x128] sm:$0xff]  ;;  %v1370_v35 = vld [vmem:[#allocation3 + $0x80] sm:$0xff] }
 0x414   :  { %v1003_v37 = vmul.f32 %v3101_v3, %v1002_v0  ;;  %v1392_v0 = vld [vmem:[#allocation3 + $0x130] sm:$0xff] }
 0x415   :  { %v3103_v12 = vpop.eup %3102  ;;  %v989_v49 = vadd.f32 %v3099_v7, %v988_v13  ;;  %v2962_v13 = vld [vmem:[%s5808_s0 + $0xd0] sm:$0xff] }
 0x416   :  { %v1016_v10 = vmul.f32 %v3103_v12, %v984_v19  ;;  %v1004_v20 = vadd.f32 %v3101_v3, %v1003_v37  ;;  %v3105_v23 = vpop.eup %3104  ;;  %vm1021_vm4 = vweird.f32 %v3103_v12  ;;  %v1395_v19 = vld [vmem:[#allocation3 + $0x148] sm:$0xff]  ;;  %v1386_v37 = vld [vmem:[#allocation3 + $0x100] sm:$0xff] }
 0x417   :  { %v993_v22 = vsel %vm992_vm0, %v3099_v7, %v989_v49  ;;  %vm1022_vm6 = vmor %vm1020_vm5, %vm1021_vm4  ;;  %v1396_v7 = vld [vmem:[#allocation3 + $0x150] sm:$0xff]  ;;  %v1389_v49 = vld [vmem:[#allocation3 + $0x118] sm:$0xff] }
 0x418   :  { %v1017_v24 = vsub.f32 1.0, %v1016_v10  ;;  %v998_v25 = vsel %vm995_vm2, %v997_v50, %v993_v22  ;;  %v1008_v26 = vsel %vm1007_vm1, %v3101_v3, %v1004_v20  ;;  %v1382_v10 = vld [vmem:[#allocation3 + $0xe0] sm:$0xff]  ;;  %v1383_v50 = vld [vmem:[#allocation3 + $0xe8] sm:$0xff]  ;;  %v1384_v20 = vld [vmem:[#allocation3 + $0xf0] sm:$0xff] }
 0x419   :  { %v1013_v27 = vsel %vm1010_vm3, %v1012_v21, %v1008_v26  ;;  %v1032_v28 = vmul.f32 %v3105_v23, %v998_v25  ;;  %v1385_v21 = vld [vmem:[#allocation3 + $0xf8] sm:$0xff]  ;;  %v1378_v22 = vld [vmem:[#allocation3 + $0xc0] sm:$0xff]  ;;  %v1380_v25 = vld [vmem:[#allocation3 + $0xd0] sm:$0xff] }
 0x41a   :  { %v1018_v29 = vmul.f32 %v3103_v12, %v1017_v24  ;;  %v1031_v30 = vmul.f32 %v1013_v27, %v4669_v14  ;;  %v1414_v14 = vld [vmem:[#allocation3 + $0x1e0] sm:$0xff]  ;;  %v1379_v24 = vld [vmem:[#allocation3 + $0xc8] sm:$0xff]  ;;  %v1381_v26 = vld [vmem:[#allocation3 + $0xd8] sm:$0xff] }
 0x41c   :  { %v4755_v31 = vadd.f32 %v1032_v28, %v1031_v30  ;;  %v1019_v32 = vadd.f32 %v3103_v12, %v1018_v29  ;;  %v1374_v28 = vld [vmem:[#allocation3 + $0xa0] sm:$0xff]  ;;  %v1375_v29 = vld [vmem:[#allocation3 + $0xa8] sm:$0xff]  ;;  %v1376_v30 = vld [vmem:[#allocation3 + $0xb0] sm:$0xff] }
 0x41e   :  { %3106 = vtanh.f32 %v4755_v31  ;;  %v1023_v39 = vsel %vm1022_vm6, %v3103_v12, %v1019_v32  ;;  %v1388_v12 = vld [vmem:[#allocation3 + $0x110] sm:$0xff]  ;;  %v1377_v32 = vld [vmem:[#allocation3 + $0xb8] sm:$0xff] }
 0x41f   :  { %v1028_v63 = vsel %vm1025_vm7, %v1027_v43, %v1023_v39  ;;  %v1371_v39 = vld [vmem:[#allocation3 + $0x88] sm:$0xff] }
 0x424   :  { %v3107_v47 = vpop.eup %3106 }
 0x425   :  { %v4758_v34 = vmul.f32 %v3107_v47, %v1028_v63  ;;  %v1372_v47 = vld [vmem:[#allocation3 + $0x90] sm:$0xff]  ;;  %v1373_v63 = vld [vmem:[#allocation3 + $0x98] sm:$0xff] }
 0x427   :  { %1059 = vmatmul.f32.vlgmr.msra.gmra.mxu0 %v4758_v34  ;;  %1079 = vmatmul.f32.vlgmr.msra.gmra.mxu1 %v4758_v34 }
 0x428   :  { %1099 = vmatmul.f32.vlgmr.msra.gmra.mxu2 %v4758_v34  ;;  %1119 = vmatmul.f32.vlgmr.msra.gmra.mxu3 %v4758_v34 }
 0x429   :  { %1428 = vmatpush.msra.mxu0 %v1414_v14  ;;  %1469 = vmatpush.msra.mxu1 %v1415_v36 }
 0x42a   :  { %1510 = vmatpush.msra.mxu2 %v1416_v40  ;;  %1551 = vmatpush.msra.mxu3 %v1417_v56  ;;  %v1366_v56 = vld [vmem:[#allocation3 + $0x60] sm:$0xff] }
 0x42b   :  { %1429 = vmatpush.msra.mxu0 %v1410_v45  ;;  %1470 = vmatpush.msra.mxu1 %v1411_v59  ;;  %v1367_v45 = vld [vmem:[#allocation3 + $0x68] sm:$0xff]  ;;  %v1368_v59 = vld [vmem:[#allocation3 + $0x70] sm:$0xff] }
 0x42c   :  { %1511 = vmatpush.msra.mxu2 %v1412_v53  ;;  %1552 = vmatpush.msra.mxu3 %v1413_v61  ;;  %v2963_v53 = vld [vmem:[%s5808_s0 + $0xd8] sm:$0xff] }
 0x42d   :  { %1430 = vmatpush.msra.mxu0 %v1406_v62  ;;  %1471 = vmatpush.msra.mxu1 %v1407_v44  ;;  %v1369_v61 = vld [vmem:[#allocation3 + $0x78] sm:$0xff]  ;;  %v1362_v62 = vld [vmem:[#allocation3 + $0x40] sm:$0xff]  ;;  %v1363_v44 = vld [vmem:[#allocation3 + $0x48] sm:$0xff] }
 0x42e   :  { %1512 = vmatpush.msra.mxu2 %v1408_v57  ;;  %1553 = vmatpush.msra.mxu3 %v1409_v60  ;;  %v1364_v57 = vld [vmem:[#allocation3 + $0x50] sm:$0xff]  ;;  %v1365_v60 = vld [vmem:[#allocation3 + $0x58] sm:$0xff] }
 0x42f   :  { %1431 = vmatpush.msra.mxu0 %v1402_v55  ;;  %1472 = vmatpush.msra.mxu1 %v1403_v38  ;;  %v1358_v55 = vld [vmem:[#allocation3 + $0x20] sm:$0xff] }
 0x430   :  { %1513 = vmatpush.msra.mxu2 %v1404_v41  ;;  %1554 = vmatpush.msra.mxu3 %v1405_v54  ;;  %v1359_v41 = vld [vmem:[#allocation3 + $0x28] sm:$0xff] }
 0x431   :  { %1432 = vmatpush.msra.mxu0 %v1398_v4  ;;  %1473 = vmatpush.msra.mxu1 %v1399_v11  ;;  %v1354_v4 = vld [vmem:[#allocation3] sm:$0xff]  ;;  %v1355_v11 = vld [vmem:[#allocation3 + $0x8] sm:$0xff] }
 0x432   :  { %1514 = vmatpush.msra.mxu2 %v1400_v51  ;;  %1555 = vmatpush.msra.mxu3 %v1401_v42  ;;  %v1356_v42 = vld [vmem:[#allocation3 + $0x10] sm:$0xff] }
 0x433   :  { %1433 = vmatpush.msra.mxu0 %v1394_v2  ;;  %1474 = vmatpush.msra.mxu1 %v1395_v19 }
 0x434   :  { %1515 = vmatpush.msra.mxu2 %v1396_v7  ;;  %1556 = vmatpush.msra.mxu3 %v1397_v17 }
 0x435   :  { %1434 = vmatpush.msra.mxu0 %v1390_v9  ;;  %1475 = vmatpush.msra.mxu1 %v1391_v1 }
 0x436   :  { %1516 = vmatpush.msra.mxu2 %v1392_v0  ;;  %1557 = vmatpush.msra.mxu3 %v1393_v8 }
 0x437   :  { %1435 = vmatpush.msra.mxu0 %v1386_v37  ;;  %1476 = vmatpush.msra.mxu1 %v1387_v5 }
 0x438   :  { %1517 = vmatpush.msra.mxu2 %v1388_v12  ;;  %1558 = vmatpush.msra.mxu3 %v1389_v49 }
 0x439   :  { %1436 = vmatpush.msra.mxu0 %v1382_v10  ;;  %1477 = vmatpush.msra.mxu1 %v1383_v50 }
 0x43a   :  { %1518 = vmatpush.msra.mxu2 %v1384_v20  ;;  %1559 = vmatpush.msra.mxu3 %v1385_v21 }
 0x43b   :  { %1437 = vmatpush.msra.mxu0 %v1378_v22  ;;  %1478 = vmatpush.msra.mxu1 %v1379_v24 }
 0x43c   :  { %1519 = vmatpush.msra.mxu2 %v1380_v25  ;;  %1560 = vmatpush.msra.mxu3 %v1381_v26 }
 0x43d   :  { %1438 = vmatpush.msra.mxu0 %v1374_v28  ;;  %1479 = vmatpush.msra.mxu1 %v1375_v29 }
 0x43e   :  { %1520 = vmatpush.msra.mxu2 %v1376_v30  ;;  %1561 = vmatpush.msra.mxu3 %v1377_v32 }
 0x43f   :  { %1439 = vmatpush.msra.mxu0 %v1370_v35  ;;  %1480 = vmatpush.msra.mxu1 %v1371_v39 }
 0x440   :  { %1521 = vmatpush.msra.mxu2 %v1372_v47  ;;  %1562 = vmatpush.msra.mxu3 %v1373_v63  ;;  %v1347_v63 = vld [vmem:[%s5813_s5 + $0x8] sm:$0xff] }
 0x441   :  { %1440 = vmatpush.msra.mxu0 %v1366_v56  ;;  %1481 = vmatpush.msra.mxu1 %v1367_v45  ;;  %v1349_v56 = vld [vmem:[%s5813_s5 + $0x18] sm:$0xff]  ;;  %v4820_v45 = vld [vmem:[#allocation5 + $0x1f0] sm:$0xff] }
 0x442   :  { %1522 = vmatpush.msra.mxu2 %v1368_v59  ;;  %1563 = vmatpush.msra.mxu3 %v1369_v61  ;;  %6211 = vst [vmem:[#allocation35_spill] sm:$0xff] %v4820_v45  ;;  %v4823_v59 = vld [vmem:[#allocation5 + $0x1f8] sm:$0xff]  ;;  %v4829_v61 = vld [vmem:[#allocation5 + $0x1d0] sm:$0xff] }
 0x443   :  { %1441 = vmatpush.msra.mxu0 %v1362_v62  ;;  %1482 = vmatpush.msra.mxu1 %v1363_v44  ;;  %6213 = vst [vmem:[#allocation10_spill] sm:$0xff] %v4829_v61  ;;  %v4836_v62 = vld [vmem:[#allocation5 + $0x1a0] sm:$0xff]  ;;  %v4838_v44 = vld [vmem:[#allocation5 + $0x1a8] sm:$0xff] }
 0x444   :  { %1523 = vmatpush.msra.mxu2 %v1364_v57  ;;  %1564 = vmatpush.msra.mxu3 %v1365_v60  ;;  %6215 = vst [vmem:[#allocation11_spill] sm:$0xff] %v4836_v62  ;;  %v4844_v57 = vld [vmem:[#allocation5 + $0x1b0] sm:$0xff]  ;;  %v4846_v60 = vld [vmem:[#allocation5 + $0x1b8] sm:$0xff] }
 0x445   :  { %1442 = vmatpush.msra.mxu0 %v1358_v55  ;;  %1483 = vmatpush.msra.mxu1 %v1359_v41  ;;  %v4850_v55 = vld [vmem:[#allocation5 + $0x180] sm:$0xff]  ;;  %v4854_v41 = vld [vmem:[#allocation5 + $0x190] sm:$0xff] }
 0x447   :  { %1443 = vmatpush.msra.mxu0 %v1354_v4  ;;  %1484 = vmatpush.msra.mxu1 %v1355_v11  ;;  %v4866_v4 = vld [vmem:[#allocation5 + $0x160] sm:$0xff]  ;;  %v4868_v11 = vld [vmem:[#allocation5 + $0x168] sm:$0xff] }
 0x4a4   :  { %v1060_v15 = vpop.f32.mrf.mxu0  ;;  %v1080_v6 = vpop.f32.mrf.mxu1 }
 0x4a5   :  { %v1123_v16 = vadd.f32 %v2960_v58, %v1060_v15  ;;  %v1124_v3 = vadd.f32 %v2961_v52, %v1080_v6  ;;  %v1360_v58 = vld [vmem:[#allocation3 + $0x30] sm:$0xff]  ;;  %v1361_v52 = vld [vmem:[#allocation3 + $0x38] sm:$0xff] }
 0x4a6   :  { %v1357_v15 = vld [vmem:[#allocation3 + $0x18] sm:$0xff]  ;;  %1524 = vmatpush.msra.mxu2 %v1360_v58  ;;  %1565 = vmatpush.msra.mxu3 %v1361_v52  ;;  %v2968_v58 = vld [vmem:[%s5808_s0 + $0xe0] sm:$0xff]  ;;  %v2969_v52 = vld [vmem:[%s5808_s0 + $0xe8] sm:$0xff] }
 0x4a7   :  { %v2964_v46 = vmul.f32 -1.442695, %v1123_v16  ;;  %v2965_v18 = vmul.f32 -1.442695, %v1124_v3 }
 0x4a8   :  { %1525 = vmatpush.msra.mxu2 %v1356_v42  ;;  %1566 = vmatpush.msra.mxu3 %v1357_v15  ;;  %v4876_v42 = vld [vmem:[#allocation5 + $0x178] sm:$0xff] }
 0x4a9   :  { %3108 = vpow2.f32 %v2964_v46 }
 0x4aa   :  { %3110 = vpow2.f32 %v2965_v18 }
 0x4ab   :  { %v1100_v23 = vpop.f32.mrf.mxu2  ;;  %v1120_v38 = vpop.f32.mrf.mxu3 }
 0x4ac   :  { %v1125_v27 = vadd.f32 %v2962_v13, %v1100_v23  ;;  %v1126_v2 = vadd.f32 %v2963_v53, %v1120_v38  ;;  %v4825_v53 = vld [vmem:[#allocation5 + $0x1c0] sm:$0xff]  ;;  %v4852_v38 = vld [vmem:[#allocation5 + $0x188] sm:$0xff] }
 0x4ae   :  { %v2966_v33 = vmul.f32 -1.442695, %v1125_v27 }
 0x4af   :  { %v3109_v43 = vpop.eup %3108 }
 0x4b0   :  { %v3111_v14 = vpop.eup %3110  ;;  %v4773_v36 = vadd.f32 1.0, %v3109_v43  ;;  %3112 = vpow2.f32 %v2966_v33 }
 0x4b1   :  { %v4775_v40 = vadd.f32 1.0, %v3111_v14  ;;  %v1348_v14 = vld [vmem:[%s5813_s5 + $0x10] sm:$0xff] }
 0x4b2   :  { %3114 = vrcp.f32 %v4773_v36  ;;  %v1150_v9 = vand.u32 2147483648, %v4773_v36  ;;  %v1148_v46 = vand.u32 2147483647, %v4773_v36  ;;  %vm1144_vm10 = vweird.f32 %v4773_v36 }
 0x4b3   :  { %3116 = vrcp.f32 %v4775_v40  ;;  %v1165_v1 = vand.u32 2147483648, %v4775_v40  ;;  %v1163_v13 = vand.u32 2147483647, %v4775_v40  ;;  %vm1159_vm11 = vweird.f32 %v4775_v40 }
 0x4b4   :  { %v1151_v12 = vor.u32 1.1754944e-38, %v1150_v9  ;;  %vm1149_vm14 = vcmp.eq.f32.partialorder %v1148_v46, 8.507059e+37  ;;  %v4890_v9 = vld [vmem:[#allocation5 + $0x120] sm:$0xff] }
 0x4b5   :  { %v1166_v10 = vor.u32 1.1754944e-38, %v1165_v1  ;;  %vm1164_vm15 = vcmp.eq.f32.partialorder %v1163_v13, 8.507059e+37  ;;  %v4892_v1 = vld [vmem:[#allocation5 + $0x128] sm:$0xff]  ;;  %v4900_v13 = vld [vmem:[#allocation5 + $0x138] sm:$0xff] }
 0x4b6   :  { %v3113_v54 = vpop.eup %3112 }
 0x4b7   :  { %v1138_v51 = vadd.f32 1.0, %v3113_v54  ;;  %v4864_v54 = vld [vmem:[#allocation5 + $0x198] sm:$0xff] }
 0x4b8   :  { %v3115_v6 = vpop.eup %3114 }
 0x4b9   :  { %v3117_v19 = vpop.eup %3116  ;;  %v1140_v7 = vmul.f32 %v3115_v6, %v4773_v36  ;;  %3118 = vrcp.f32 %v1138_v51  ;;  %vm1145_vm8 = vweird.f32 %v3115_v6  ;;  %v1180_v30 = vand.u32 2147483648, %v1138_v51  ;;  %v4803_v36 = vld [vmem:[#allocation5 + $0x1e0] sm:$0xff] }
 0x4ba   :  { %v1155_v16 = vmul.f32 %v3117_v19, %v4775_v40  ;;  %3120 = vtanh.f32 %v1126_v2  ;;  %vm1160_vm9 = vweird.f32 %v3117_v19  ;;  %vm1146_vm12 = vmor %vm1144_vm10, %vm1145_vm8  ;;  %vm1174_vm1 = vweird.f32 %v1138_v51  ;;  %v4805_v40 = vld [vmem:[#allocation5 + $0x1e8] sm:$0xff]  ;;  %v4878_v2 = vld [vmem:[#allocation5 + $0x140] sm:$0xff] }
 0x4bb   :  { %v1141_v3 = vsub.f32 1.0, %v1140_v7  ;;  %vm1161_vm13 = vmor %vm1159_vm11, %vm1160_vm9  ;;  %v1178_v32 = vand.u32 2147483647, %v1138_v51  ;;  %v1181_v35 = vor.u32 1.1754944e-38, %v1180_v30  ;;  %v4883_v7 = vld [vmem:[#allocation5 + $0x150] sm:$0xff]  ;;  %v4941_v30 = vld [vmem:[#allocation5 + $0xa0] sm:$0xff] }
 0x4bc   :  { %v1156_v17 = vsub.f32 1.0, %v1155_v16  ;;  %6218 = vst [vmem:[#allocation27_spill] sm:$0xff] %v4941_v30 }
 0x4bd   :  { %v1142_v0 = vmul.f32 %v3115_v6, %v1141_v3  ;;  %vm1179_vm3 = vcmp.eq.f32.partialorder %v1178_v32, 8.507059e+37  ;;  %v4943_v32 = vld [vmem:[#allocation5 + $0xa8] sm:$0xff] }
 0x4be   :  { %v1157_v18 = vmul.f32 %v3117_v19, %v1156_v17  ;;  %v4888_v17 = vld [vmem:[#allocation5 + $0x158] sm:$0xff]  ;;  %6219 = vst [vmem:[#allocation14_spill] sm:$0xff] %v4943_v32 }
 0x4bf   :  { %v3119_v8 = vpop.eup %3118  ;;  %v1143_v37 = vadd.f32 %v3115_v6, %v1142_v0  ;;  %v4895_v0 = vld [vmem:[#allocation5 + $0x130] sm:$0xff] }
 0x4c0   :  { %v1170_v5 = vmul.f32 %v3119_v8, %v1138_v51  ;;  %v1158_v49 = vadd.f32 %v3117_v19, %v1157_v18  ;;  %v3121_v20 = vpop.eup %3120  ;;  %vm1175_vm0 = vweird.f32 %v3119_v8  ;;  %v4871_v51 = vld [vmem:[#allocation5 + $0x170] sm:$0xff] }
 0x4c1   :  { %v1147_v50 = vsel %vm1146_vm12, %v3115_v6, %v1143_v37  ;;  %vm1176_vm2 = vmor %vm1174_vm1, %vm1175_vm0  ;;  %v4904_v37 = vld [vmem:[#allocation5 + $0x108] sm:$0xff] }
 0x4c2   :  { %v1171_v21 = vsub.f32 1.0, %v1170_v5  ;;  %v1152_v22 = vsel %vm1149_vm14, %v1151_v12, %v1147_v50  ;;  %v1162_v23 = vsel %vm1161_vm13, %v3117_v19, %v1158_v49  ;;  %v4880_v19 = vld [vmem:[#allocation5 + $0x148] sm:$0xff]  ;;  %v4907_v5 = vld [vmem:[#allocation5 + $0x110] sm:$0xff]  ;;  %v4915_v49 = vld [vmem:[#allocation5 + $0x118] sm:$0xff] }
 0x4c3   :  { %v1167_v24 = vsel %vm1164_vm15, %v1166_v10, %v1162_v23  ;;  %v1186_v25 = vmul.f32 %v3121_v20, %v1152_v22  ;;  %v2970_v12 = vld [vmem:[%s5808_s0 + $0xf0] sm:$0xff]  ;;  %v4917_v10 = vld [vmem:[#allocation5 + $0xe0] sm:$0xff]  ;;  %v4919_v50 = vld [vmem:[#allocation5 + $0xe8] sm:$0xff] }
 0x4c4   :  { %v1172_v26 = vmul.f32 %v3119_v8, %v1171_v21  ;;  %v1185_v27 = vmul.f32 %v1167_v24, %v4755_v31  ;;  %v1346_v31 = vld [vmem:[%s5813_s5] sm:$0xff]  ;;  %v4922_v20 = vld [vmem:[#allocation5 + $0xf0] sm:$0xff]  ;;  %v4927_v22 = vld [vmem:[#allocation5 + $0xf8] sm:$0xff] }
 0x4c5   :  { %v4929_v24 = vld [vmem:[#allocation5 + $0xc0] sm:$0xff] }
 0x4c6   :  { %v4791_v28 = vadd.f32 %v1186_v25, %v1185_v27  ;;  %v1173_v29 = vadd.f32 %v3119_v8, %v1172_v26  ;;  %v4931_v25 = vld [vmem:[#allocation5 + $0xc8] sm:$0xff]  ;;  %v4934_v26 = vld [vmem:[#allocation5 + $0xd0] sm:$0xff]  ;;  %v4939_v27 = vld [vmem:[#allocation5 + $0xd8] sm:$0xff] }
 0x4c7   :  { %6216 = vst [vmem:[#allocation12_spill] sm:$0xff] %v4934_v26 }
 0x4c8   :  { %3122 = vtanh.f32 %v4791_v28  ;;  %v1177_v33 = vsel %vm1176_vm2, %v3119_v8, %v1173_v29  ;;  %v4902_v8 = vld [vmem:[#allocation5 + $0x100] sm:$0xff]  ;;  %6217 = vst [vmem:[#allocation13_spill] sm:$0xff] %v4939_v27 }
 0x4c9   :  { %v1182_v43 = vsel %vm1179_vm3, %v1181_v35, %v1177_v33  ;;  %v4946_v33 = vld [vmem:[#allocation5 + $0xb0] sm:$0xff] }
 0x4ca   :  { %6220 = vst [vmem:[#allocation15_spill] sm:$0xff] %v4946_v33 }
 0x4ce   :  { %v3123_v39 = vpop.eup %3122 }
 0x4cf   :  { %v1189_v47 = vmul.f32 %v3123_v39, %v1182_v43  ;;  %v4951_v39 = vld [vmem:[#allocation5 + $0x80] sm:$0xff]  ;;  %v4953_v43 = vld [vmem:[#allocation5 + $0x88] sm:$0xff] }
 0x4d0   :  { %6221 = vst [vmem:[#allocation16_spill] sm:$0xff] %v4951_v39 }
 0x4d1   :  { %1213 = vmatmul.f32.vlgmr.msrb.gmra.mxu0 %v1189_v47  ;;  %1233 = vmatmul.f32.vlgmr.msrb.gmra.mxu1 %v1189_v47  ;;  %6222 = vst [vmem:[#allocation31_spill] sm:$0xff] %v4953_v43 }
 0x4d2   :  { %1253 = vmatmul.f32.vlgmr.msrb.gmra.mxu2 %v1189_v47  ;;  %1273 = vmatmul.f32.vlgmr.msrb.gmra.mxu3 %v1189_v47 }
 0x4d3   :  { %1692 = vmatpush.msrb.mxu0 %v4803_v36  ;;  %1712 = vmatpush.msrb.mxu1 %v4805_v40 }
 0x4d4   :  { %1732 = vmatpush.msrb.mxu2 %v4820_v45  ;;  %1752 = vmatpush.msrb.mxu3 %v4823_v59 }
 0x4d5   :  { %1693 = vmatpush.msrb.mxu0 %v4825_v53 }
 0x4d6   :  { %1733 = vmatpush.msrb.mxu2 %v4829_v61 }
 0x4d7   :  { %1694 = vmatpush.msrb.mxu0 %v4836_v62 }
 0x4d8   :  { %1734 = vmatpush.msrb.mxu2 %v4844_v57 }
 0x4d9   :  { %1444 = vmatmul.f32.vlgmr.msra.gmra.mxu0 %v1346_v31  ;;  %1485 = vmatmul.f32.vlgmr.msra.gmra.mxu1 %v1346_v31 }
 0x4da   :  { %1526 = vmatmul.f32.vlgmr.msra.gmra.mxu2 %v1346_v31  ;;  %1567 = vmatmul.f32.vlgmr.msra.gmra.mxu3 %v1346_v31 }
 0x4db   :  { %1695 = vmatpush.msrb.mxu0 %v4850_v55  ;;  %1735 = vmatpush.msrb.mxu2 %v4854_v41 }
 0x4dd   :  { %1696 = vmatpush.msrb.mxu0 %v4866_v4  ;;  %1736 = vmatpush.msrb.mxu2 %v4871_v51 }
 0x4df   :  { %1697 = vmatpush.msrb.mxu0 %v4878_v2  ;;  %1737 = vmatpush.msrb.mxu2 %v4883_v7 }
 0x4e1   :  { %1447 = vmatmul.f32.gmra.mxu0 %v1347_v63  ;;  %1488 = vmatmul.f32.gmra.mxu1 %v1347_v63 }
 0x4e2   :  { %1529 = vmatmul.f32.gmra.mxu2 %v1347_v63  ;;  %1570 = vmatmul.f32.gmra.mxu3 %v1347_v63 }
 0x4e3   :  { %1698 = vmatpush.msrb.mxu0 %v4890_v9  ;;  %1738 = vmatpush.msrb.mxu2 %v4895_v0 }
 0x4e5   :  { %1699 = vmatpush.msrb.mxu0 %v4902_v8  ;;  %1739 = vmatpush.msrb.mxu2 %v4907_v5 }
 0x4e7   :  { %1700 = vmatpush.msrb.mxu0 %v4917_v10  ;;  %1740 = vmatpush.msrb.mxu2 %v4922_v20 }
 0x4e9   :  { %1450 = vmatmul.f32.gmra.mxu0 %v1348_v14  ;;  %1491 = vmatmul.f32.gmra.mxu1 %v1348_v14 }
 0x4ea   :  { %1532 = vmatmul.f32.gmra.mxu2 %v1348_v14  ;;  %1573 = vmatmul.f32.gmra.mxu3 %v1348_v14  ;;  %v4960_v14 = vld [vmem:[#allocation5 + $0x68] sm:$0xff] }
 0x4eb   :  { %1701 = vmatpush.msrb.mxu0 %v4929_v24  ;;  %1741 = vmatpush.msrb.mxu2 %v4934_v26  ;;  %6224 = vst [vmem:[#allocation18_spill] sm:$0xff] %v4960_v14 }
 0x4ed   :  { %1702 = vmatpush.msrb.mxu0 %v4941_v30  ;;  %1742 = vmatpush.msrb.mxu2 %v4946_v33 }
 0x4ef   :  { %1703 = vmatpush.msrb.mxu0 %v4951_v39 }
 0x4f1   :  { %1453 = vmatmul.f32.gmra.mxu0 %v1349_v56  ;;  %1494 = vmatmul.f32.gmra.mxu1 %v1349_v56 }
 0x4f2   :  { %1535 = vmatmul.f32.gmra.mxu2 %v1349_v56  ;;  %1576 = vmatmul.f32.gmra.mxu3 %v1349_v56  ;;  %v4962_v56 = vld [vmem:[#allocation5 + $0x90] sm:$0xff] }
 0x4f3   :  { %6225 = vst [vmem:[#allocation19_spill] sm:$0xff] %v4962_v56  ;;  %1743 = vmatpush.msrb.mxu2 %v4962_v56  ;;  %v5014_v56 = vld [vmem:[#allocation5 + $0x8] sm:$0xff] }
 0x4f4   :  { %6239 = vst [vmem:[#allocation37_spill] sm:$0xff] %v5014_v56 }
 0x4f9   :  { %1456 = vmatmul.f32.gmra.mxu0 %v4672_v48  ;;  %1497 = vmatmul.f32.gmra.mxu1 %v4672_v48 }
 0x4fa   :  { %1538 = vmatmul.f32.gmra.mxu2 %v4672_v48  ;;  %1579 = vmatmul.f32.gmra.mxu3 %v4672_v48  ;;  %v4827_v48 = vld [vmem:[#allocation5 + $0x1c8] sm:$0xff] }
 0x4fb   :  { %6212 = vst [vmem:[#allocation9_spill] sm:$0xff] %v4827_v48  ;;  %1713 = vmatpush.msrb.mxu1 %v4827_v48 }
 0x4fd   :  { %1714 = vmatpush.msrb.mxu1 %v4838_v44 }
 0x4ff   :  { %1715 = vmatpush.msrb.mxu1 %v4852_v38 }
 0x501   :  { %1459 = vmatmul.f32.gmra.mxu0 %v4758_v34  ;;  %1500 = vmatmul.f32.gmra.mxu1 %v4758_v34 }
 0x502   :  { %1541 = vmatmul.f32.gmra.mxu2 %v4758_v34  ;;  %1582 = vmatmul.f32.gmra.mxu3 %v4758_v34  ;;  %v4834_v34 = vld [vmem:[#allocation5 + $0x1d8] sm:$0xff] }
 0x503   :  { %6214 = vst [vmem:[#allocation23_spill] sm:$0xff] %v4834_v34  ;;  %1753 = vmatpush.msrb.mxu3 %v4834_v34  ;;  %1716 = vmatpush.msrb.mxu1 %v4868_v11 }
 0x505   :  { %1754 = vmatpush.msrb.mxu3 %v4846_v60  ;;  %1717 = vmatpush.msrb.mxu1 %v4880_v19 }
 0x507   :  { %1755 = vmatpush.msrb.mxu3 %v4864_v54  ;;  %1718 = vmatpush.msrb.mxu1 %v4892_v1 }
 0x509   :  { %1462 = vmatmul.f32.gmra.mxu0 %v1189_v47  ;;  %1503 = vmatmul.f32.gmra.mxu1 %v1189_v47 }
 0x50a   :  { %1544 = vmatmul.f32.gmra.mxu2 %v1189_v47  ;;  %1585 = vmatmul.f32.gmra.mxu3 %v1189_v47  ;;  %v4955_v47 = vld [vmem:[#allocation5 + $0x60] sm:$0xff] }
 0x50b   :  { %1756 = vmatpush.msrb.mxu3 %v4876_v42  ;;  %1719 = vmatpush.msrb.mxu1 %v4904_v37  ;;  %6223 = vst [vmem:[#allocation17_spill] sm:$0xff] %v4955_v47 }
 0x50c   :  { %1704 = vmatpush.msrb.mxu0 %v4955_v47 }
 0x50d   :  { %1757 = vmatpush.msrb.mxu3 %v4888_v17  ;;  %1720 = vmatpush.msrb.mxu1 %v4919_v50 }
 0x50f   :  { %1758 = vmatpush.msrb.mxu3 %v4900_v13  ;;  %1721 = vmatpush.msrb.mxu1 %v4931_v25 }
 0x511   :  { %1759 = vmatpush.msrb.mxu3 %v4915_v49  ;;  %1722 = vmatpush.msrb.mxu1 %v4943_v32 }
 0x513   :  { %1760 = vmatpush.msrb.mxu3 %v4927_v22  ;;  %1723 = vmatpush.msrb.mxu1 %v4953_v43 }
 0x515   :  { %1761 = vmatpush.msrb.mxu3 %v4939_v27  ;;  %1724 = vmatpush.msrb.mxu1 %v4960_v14 }
 0x54e   :  { %v1214_v15 = vpop.f32.mrf.mxu0  ;;  %v1234_v6 = vpop.f32.mrf.mxu1 }
 0x54f   :  { %v1277_v16 = vadd.f32 %v2968_v58, %v1214_v15  ;;  %v1278_v3 = vadd.f32 %v2969_v52, %v1234_v6  ;;  %v4964_v58 = vld [vmem:[#allocation5 + $0xb8] sm:$0xff]  ;;  %v4974_v6 = vld [vmem:[#allocation5 + $0x70] sm:$0xff] }
 0x550   :  { %6226 = vst [vmem:[#allocation32_spill] sm:$0xff] %v4964_v58  ;;  %v4970_v15 = vld [vmem:[#allocation5 + $0x98] sm:$0xff]  ;;  %1762 = vmatpush.msrb.mxu3 %v4964_v58  ;;  %1744 = vmatpush.msrb.mxu2 %v4974_v6 }
 0x551   :  { %v2972_v46 = vmul.f32 -1.442695, %v1277_v16  ;;  %v2973_v18 = vmul.f32 -1.442695, %v1278_v3  ;;  %6227 = vst [vmem:[#allocation20_spill] sm:$0xff] %v4970_v15  ;;  %v2971_v16 = vld [vmem:[%s5808_s0 + $0xf8] sm:$0xff] }
 0x552   :  { %6228 = vst [vmem:[#allocation21_spill] sm:$0xff] %v4974_v6  ;;  %v4983_v3 = vld [vmem:[#allocation5 + $0x78] sm:$0xff]  ;;  %1763 = vmatpush.msrb.mxu3 %v4970_v15  ;;  %v5003_v6 = vld [vmem:[#allocation5 + $0x30] sm:$0xff]  ;;  %v5012_v15 = vld [vmem:[#allocation5] sm:$0xff] }
 0x553   :  { %3124 = vpow2.f32 %v2972_v46  ;;  %6229 = vst [vmem:[#allocation22_spill] sm:$0xff] %v4983_v3  ;;  %v4985_v46 = vld [vmem:[#allocation5 + $0x40] sm:$0xff] }
 0x554   :  { %3126 = vpow2.f32 %v2973_v18  ;;  %6230 = vst [vmem:[#allocation33_spill] sm:$0xff] %v4985_v46  ;;  %v4987_v18 = vld [vmem:[#allocation5 + $0x48] sm:$0xff]  ;;  %1705 = vmatpush.msrb.mxu0 %v4985_v46  ;;  %1764 = vmatpush.msrb.mxu3 %v4983_v3 }
 0x555   :  { %v1254_v21 = vpop.f32.mrf.mxu2  ;;  %6231 = vst [vmem:[#allocation24_spill] sm:$0xff] %v4987_v18  ;;  %1725 = vmatpush.msrb.mxu1 %v4987_v18  ;;  %v5009_v18 = vld [vmem:[#allocation5 + $0x38] sm:$0xff] }
 0x556   :  { %v1279_v23 = vadd.f32 %v2970_v12, %v1254_v21  ;;  %v4991_v12 = vld [vmem:[#allocation5 + $0x50] sm:$0xff]  ;;  %v1274_v21 = vpop.f32.mrf.mxu3  ;;  %6236 = vst [vmem:[#allocation29_spill] sm:$0xff] %v5003_v6 }
 0x557   :  { %6232 = vst [vmem:[#allocation25_spill] sm:$0xff] %v4991_v12  ;;  %1745 = vmatpush.msrb.mxu2 %v4991_v12  ;;  %v1280_v47 = vadd.f32 %v2971_v16, %v1274_v21  ;;  %v5017_v12 = vld [vmem:[#allocation5 + $0x10] sm:$0xff]  ;;  %v5023_v16 = vld [vmem:[#allocation5 + $0x18] sm:$0xff] }
 0x558   :  { %v2974_v29 = vmul.f32 -1.442695, %v1279_v23  ;;  %v4995_v23 = vld [vmem:[#allocation5 + $0x20] sm:$0xff]  ;;  %6237 = vst [vmem:[#allocation30_spill] sm:$0xff] %v5009_v18 }
 0x559   :  { %v3125_v35 = vpop.eup %3124  ;;  %6233 = vst [vmem:[#allocation26_spill] sm:$0xff] %v4995_v23  ;;  %1706 = vmatpush.msrb.mxu0 %v4995_v23  ;;  %1746 = vmatpush.msrb.mxu2 %v5003_v6 }
 0x55a   :  { %v3127_v31 = vpop.eup %3126  ;;  %v4957_v63 = vadd.f32 1.0, %v3125_v35  ;;  %3128 = vpow2.f32 %v2974_v29  ;;  %v4997_v29 = vld [vmem:[#allocation5 + $0x28] sm:$0xff]  ;;  %v4999_v35 = vld [vmem:[#allocation5 + $0x58] sm:$0xff]  ;;  %6238 = vst [vmem:[#allocation36_spill] sm:$0xff] %v5012_v15 }
 0x55b   :  { %v4966_v52 = vadd.f32 1.0, %v3127_v31  ;;  %6234 = vst [vmem:[#allocation34_spill] sm:$0xff] %v4997_v29  ;;  %1726 = vmatpush.msrb.mxu1 %v4997_v29  ;;  %1765 = vmatpush.msrb.mxu3 %v4999_v35 }
 0x55c   :  { %3130 = vrcp.f32 %v4957_v63  ;;  %6235 = vst [vmem:[#allocation28_spill] sm:$0xff] %v4999_v35  ;;  %1707 = vmatpush.msrb.mxu0 %v5012_v15  ;;  %1747 = vmatpush.msrb.mxu2 %v5017_v12  ;;  %v1304_v23 = vand.u32 2147483648, %v4957_v63  ;;  %vm1298_vm6 = vweird.f32 %v4957_v63 }
 0x55d   :  { %3132 = vrcp.f32 %v4966_v52  ;;  %6240 = vst [vmem:[#allocation38_spill] sm:$0xff] %v5017_v12  ;;  %1727 = vmatpush.msrb.mxu1 %v5014_v56  ;;  %1766 = vmatpush.msrb.mxu3 %v5009_v18  ;;  %v1319_v56 = vand.u32 2147483648, %v4966_v52  ;;  %v1302_v18 = vand.u32 2147483647, %v4957_v63  ;;  %vm1313_vm7 = vweird.f32 %v4966_v52 }
 0x55e   :  { %6241 = vst [vmem:[#allocation39_spill] sm:$0xff] %v5023_v16  ;;  %1845 = vmatpush.msra.mxu0 %v4803_v36  ;;  %1885 = vmatpush.msra.mxu2 %v4820_v45 }
 0x55f   :  { %1865 = vmatpush.msra.mxu1 %v4805_v40  ;;  %1767 = vmatpush.msrb.mxu3 %v5023_v16  ;;  %vm1303_vm10 = vcmp.eq.f32.partialorder %v1302_v18, 8.507059e+37 }
 0x560   :  { %v3129_v31 = vpop.eup %3128  ;;  %1846 = vmatpush.msra.mxu0 %v4825_v53  ;;  %1886 = vmatpush.msra.mxu2 %v4829_v61 }
 0x561   :  { %v5005_v14 = vadd.f32 1.0, %v3129_v31  ;;  %1905 = vmatpush.msra.mxu3 %v4823_v59  ;;  %1866 = vmatpush.msra.mxu1 %v4827_v48 }
 0x562   :  { %v3131_v46 = vpop.eup %3130  ;;  %1847 = vmatpush.msra.mxu0 %v4836_v62  ;;  %1887 = vmatpush.msra.mxu2 %v4844_v57 }
 0x563   :  { %v3133_v31 = vpop.eup %3132  ;;  %v1294_v3 = vmul.f32 %v3131_v46, %v4957_v63  ;;  %3134 = vrcp.f32 %v5005_v14  ;;  %vm1299_vm4 = vweird.f32 %v3131_v46  ;;  %1906 = vmatpush.msra.mxu3 %v4834_v34  ;;  %1867 = vmatpush.msra.mxu1 %v4838_v44  ;;  %v1320_v63 = vor.u32 1.1754944e-38, %v1319_v56 }
 0x564   :  { %v1309_v21 = vmul.f32 %v3133_v31, %v4966_v52  ;;  %3136 = vtanh.f32 %v1280_v47  ;;  %vm1314_vm5 = vweird.f32 %v3133_v31  ;;  %vm1300_vm8 = vmor %vm1298_vm6, %vm1299_vm4  ;;  %1848 = vmatpush.msra.mxu0 %v4850_v55  ;;  %1888 = vmatpush.msra.mxu2 %v4854_v41  ;;  %vm1328_vm13 = vweird.f32 %v5005_v14 }
 0x565   :  { %v1295_v6 = vsub.f32 1.0, %v1294_v3  ;;  %vm1315_vm9 = vmor %vm1313_vm7, %vm1314_vm5  ;;  %1907 = vmatpush.msra.mxu3 %v4846_v60  ;;  %1868 = vmatpush.msra.mxu1 %v4852_v38 }
 0x566   :  { %v1310_v29 = vsub.f32 1.0, %v1309_v21  ;;  %v1317_v21 = vand.u32 2147483647, %v4966_v52  ;;  %1849 = vmatpush.msra.mxu0 %v4866_v4  ;;  %1889 = vmatpush.msra.mxu2 %v4871_v51 }
 0x567   :  { %v1296_v15 = vmul.f32 %v3131_v46, %v1295_v6  ;;  %1908 = vmatpush.msra.mxu3 %v4864_v54  ;;  %1869 = vmatpush.msra.mxu1 %v4868_v11 }
 0x568   :  { %v1311_v3 = vmul.f32 %v3133_v31, %v1310_v29  ;;  %v1305_v29 = vor.u32 1.1754944e-38, %v1304_v23  ;;  %vm1318_vm11 = vcmp.eq.f32.partialorder %v1317_v21, 8.507059e+37  ;;  %1850 = vmatpush.msra.mxu0 %v4878_v2  ;;  %1890 = vmatpush.msra.mxu2 %v4883_v7  ;;  %v6242_v21 = vld [vmem:[#allocation19_spill] sm:$0xff] }
 0x569   :  { %v5040_v47 = vpop.eup %3134  ;;  %v1297_v45 = vadd.f32 %v3131_v46, %v1296_v15  ;;  %1909 = vmatpush.msra.mxu3 %v4876_v42  ;;  %1870 = vmatpush.msra.mxu1 %v4880_v19 }
 0x56a   :  { %v1324_v6 = vmul.f32 %v5040_v47, %v5005_v14  ;;  %v1312_v48 = vadd.f32 %v3133_v31, %v1311_v3  ;;  %v3137_v52 = vpop.eup %3136  ;;  %vm1329_vm12 = vweird.f32 %v5040_v47  ;;  %1851 = vmatpush.msra.mxu0 %v4890_v9  ;;  %1891 = vmatpush.msra.mxu2 %v4895_v0 }
 0x56b   :  { %v1301_v15 = vsel %vm1300_vm8, %v3131_v46, %v1297_v45  ;;  %1910 = vmatpush.msra.mxu3 %v4888_v17  ;;  %1871 = vmatpush.msra.mxu1 %v4892_v1  ;;  %vm1330_vm14 = vmor %vm1328_vm13, %vm1329_vm12 }
 0x56c   :  { %v1325_v62 = vsub.f32 1.0, %v1324_v6  ;;  %v1306_v34 = vsel %vm1303_vm10, %v1305_v29, %v1301_v15  ;;  %v1316_v61 = vsel %vm1315_vm9, %v3133_v31, %v1312_v48  ;;  %1852 = vmatpush.msra.mxu0 %v4902_v8  ;;  %1892 = vmatpush.msra.mxu2 %v4907_v5  ;;  %v6244_v6 = vld [vmem:[#allocation17_spill] sm:$0xff]  ;;  %v6245_v29 = vld [vmem:[#allocation18_spill] sm:$0xff] }
 0x56d   :  { %v1321_v23 = vsel %vm1318_vm11, %v1320_v63, %v1316_v61  ;;  %v1340_v3 = vmul.f32 %v3137_v52, %v1306_v34  ;;  %v1332_v34 = vand.u32 2147483647, %v5005_v14  ;;  %1911 = vmatpush.msra.mxu3 %v4900_v13  ;;  %1872 = vmatpush.msra.mxu1 %v4904_v37  ;;  %v6246_v63 = vld [vmem:[#allocation21_spill] sm:$0xff]  ;;  %v6247_v15 = vld [vmem:[#allocation22_spill] sm:$0xff] }
 0x56e   :  { %v1326_v45 = vmul.f32 %v5040_v47, %v1325_v62  ;;  %v1339_v56 = vmul.f32 %v1321_v23, %v4791_v28  ;;  %v1334_v28 = vand.u32 2147483648, %v5005_v14  ;;  %1853 = vmatpush.msra.mxu0 %v4917_v10  ;;  %1893 = vmatpush.msra.mxu2 %v4922_v20  ;;  %v6248_v52 = vld [vmem:[#allocation33_spill] sm:$0xff]  ;;  %v6249_v23 = vld [vmem:[#allocation24_spill] sm:$0xff] }
 0x56f   :  { %1912 = vmatpush.msra.mxu3 %v4915_v49  ;;  %1873 = vmatpush.msra.mxu1 %v4919_v50  ;;  %vm1333_vm15 = vcmp.eq.f32.partialorder %v1332_v34, 8.507059e+37  ;;  %v6256_v34 = vld [vmem:[#allocation36_spill] sm:$0xff] }
 0x570   :  { %v1341_v48 = vadd.f32 %v1340_v3, %v1339_v56  ;;  %v1327_v61 = vadd.f32 %v5040_v47, %v1326_v45  ;;  %v1335_v46 = vor.u32 1.1754944e-38, %v1334_v28  ;;  %1854 = vmatpush.msra.mxu0 %v4929_v24  ;;  %1894 = vmatpush.msra.mxu2 %v4934_v26  ;;  %v6250_v3 = vmov 0.0   ;;  %v6251_v45 = vld [vmem:[#allocation25_spill] sm:$0xff]  ;;  %v6252_v56 = vld [vmem:[#allocation26_spill] sm:$0xff] }
 0x571   :  { %1913 = vmatpush.msra.mxu3 %v4927_v22  ;;  %1874 = vmatpush.msra.mxu1 %v4931_v25  ;;  %v6255_v28 = vld [vmem:[#allocation30_spill] sm:$0xff] }
 0x572   :  { %3138 = vtanh.f32 %v1341_v48  ;;  %v1331_v62 = vsel %vm1330_vm14, %v5040_v47, %v1327_v61  ;;  %1855 = vmatpush.msra.mxu0 %v4941_v30  ;;  %1895 = vmatpush.msra.mxu2 %v4946_v33  ;;  %v6243_v47 = vld [vmem:[#allocation20_spill] sm:$0xff]  ;;  %v6253_v48 = vld [vmem:[#allocation34_spill] sm:$0xff]  ;;  %v6254_v61 = vld [vmem:[#allocation29_spill] sm:$0xff] }
 0x573   :  { %v1336_v18 = vsel %vm1333_vm15, %v1335_v46, %v1331_v62  ;;  %1914 = vmatpush.msra.mxu3 %v4939_v27  ;;  %1875 = vmatpush.msra.mxu1 %v4943_v32  ;;  %v6257_v62 = vld [vmem:[#allocation37_spill] sm:$0xff]  ;;  %v6258_v46 = vld [vmem:[#allocation35_spill] sm:$0xff] }
 0x574   :  { %1856 = vmatpush.msra.mxu0 %v4951_v39  ;;  %1896 = vmatpush.msra.mxu2 %v6242_v21 }
 0x575   :  { %1915 = vmatpush.msra.mxu3 %v4964_v58  ;;  %1876 = vmatpush.msra.mxu1 %v4953_v43 }
 0x576   :  { %1857 = vmatpush.msra.mxu0 %v6244_v6  ;;  %1897 = vmatpush.msra.mxu2 %v6246_v63 }
 0x577   :  { %1916 = vmatpush.msra.mxu3 %v6243_v47  ;;  %1877 = vmatpush.msra.mxu1 %v6245_v29 }
 0x578   :  { %v3139_v14 = vpop.eup %3138  ;;  %1858 = vmatpush.msra.mxu0 %v6248_v52  ;;  %1898 = vmatpush.msra.mxu2 %v6251_v45 }
 0x579   :  { %v1343_v31 = vmul.f32 %v3139_v14, %v1336_v18  ;;  %1917 = vmatpush.msra.mxu3 %v6247_v15  ;;  %1878 = vmatpush.msra.mxu1 %v6249_v23  ;;  %v6259_v14 = vld [vmem:[#allocation9_spill] sm:$0xff]  ;;  %v6260_v18 = vld [vmem:[#allocation10_spill] sm:$0xff] }
 0x57a   :  { %1859 = vmatpush.msra.mxu0 %v6252_v56  ;;  %1899 = vmatpush.msra.mxu2 %v6254_v61 }
 0x57b   :  { %1465 = vmatmul.f32.gmra.mxu0 %v1343_v31  ;;  %1506 = vmatmul.f32.gmra.mxu1 %v1343_v31 }
 0x57c   :  { %1547 = vmatmul.f32.gmra.mxu2 %v1343_v31  ;;  %1588 = vmatmul.f32.gmra.mxu3 %v1343_v31  ;;  %v6261_v31 = vld [vmem:[#allocation23_spill] sm:$0xff] }
 0x57d   :  { %1918 = vmatpush.msra.mxu3 %v4999_v35  ;;  %1879 = vmatpush.msra.mxu1 %v6253_v48 }
 0x57e   :  { %1860 = vmatpush.msra.mxu0 %v6256_v34  ;;  %1900 = vmatpush.msra.mxu2 %v5017_v12 }
 0x57f   :  { %1919 = vmatpush.msra.mxu3 %v6255_v28  ;;  %1880 = vmatpush.msra.mxu1 %v6257_v62 }
 0x581   :  { %1920 = vmatpush.msra.mxu3 %v5023_v16 }
 0x583   :  { %1708 = vmatmul.f32.vlgmr.msrb.gmra.mxu0 %v6250_v3  ;;  %1728 = vmatmul.f32.vlgmr.msrb.gmra.mxu1 %v6250_v3 }
 0x584   :  { %1748 = vmatmul.f32.vlgmr.msrb.gmra.mxu2 %v6250_v3  ;;  %1768 = vmatmul.f32.vlgmr.msrb.gmra.mxu3 %v6250_v3  ;;  %v6262_v3 = vld [vmem:[#allocation11_spill] sm:$0xff] }
 0x585   :  { %1998 = vmatpush.msrb.mxu0 %v4803_v36  ;;  %2018 = vmatpush.msrb.mxu1 %v4805_v40 }
 0x586   :  { %2038 = vmatpush.msrb.mxu2 %v6258_v46  ;;  %2058 = vmatpush.msrb.mxu3 %v4823_v59 }
 0x587   :  { %1999 = vmatpush.msrb.mxu0 %v4825_v53  ;;  %2019 = vmatpush.msrb.mxu1 %v6259_v14 }
 0x588   :  { %2039 = vmatpush.msrb.mxu2 %v6260_v18  ;;  %2059 = vmatpush.msrb.mxu3 %v6261_v31 }
 0x589   :  { %2000 = vmatpush.msrb.mxu0 %v6262_v3  ;;  %2020 = vmatpush.msrb.mxu1 %v4838_v44 }
 0x58a   :  { %2040 = vmatpush.msrb.mxu2 %v4844_v57  ;;  %2060 = vmatpush.msrb.mxu3 %v4846_v60 }
 0x58b   :  { %2001 = vmatpush.msrb.mxu0 %v4850_v55  ;;  %2021 = vmatpush.msrb.mxu1 %v4852_v38 }
 0x58c   :  { %2041 = vmatpush.msrb.mxu2 %v4854_v41  ;;  %2061 = vmatpush.msrb.mxu3 %v4864_v54 }
 0x58d   :  { %2002 = vmatpush.msrb.mxu0 %v4866_v4  ;;  %2022 = vmatpush.msrb.mxu1 %v4868_v11 }
 0x58e   :  { %2042 = vmatpush.msrb.mxu2 %v4871_v51  ;;  %2062 = vmatpush.msrb.mxu3 %v4876_v42 }
 0x58f   :  { %2003 = vmatpush.msrb.mxu0 %v4878_v2  ;;  %2023 = vmatpush.msrb.mxu1 %v4880_v19 }
 0x590   :  { %2043 = vmatpush.msrb.mxu2 %v4883_v7  ;;  %2063 = vmatpush.msrb.mxu3 %v4888_v17 }
 0x591   :  { %2004 = vmatpush.msrb.mxu0 %v4890_v9  ;;  %2024 = vmatpush.msrb.mxu1 %v4892_v1 }
 0x592   :  { %2044 = vmatpush.msrb.mxu2 %v4895_v0  ;;  %2064 = vmatpush.msrb.mxu3 %v4900_v13 }
 0x593   :  { %2005 = vmatpush.msrb.mxu0 %v4902_v8  ;;  %2025 = vmatpush.msrb.mxu1 %v4904_v37 }
 0x594   :  { %2045 = vmatpush.msrb.mxu2 %v4907_v5  ;;  %2065 = vmatpush.msrb.mxu3 %v4915_v49 }
 0x595   :  { %2006 = vmatpush.msrb.mxu0 %v4917_v10  ;;  %2026 = vmatpush.msrb.mxu1 %v4919_v50 }
 0x596   :  { %2046 = vmatpush.msrb.mxu2 %v4922_v20  ;;  %2066 = vmatpush.msrb.mxu3 %v4927_v22 }
 0x597   :  { %2007 = vmatpush.msrb.mxu0 %v4929_v24  ;;  %2027 = vmatpush.msrb.mxu1 %v4931_v25 }
 0x598   :  { %2047 = vmatpush.msrb.mxu2 %v4934_v26  ;;  %2067 = vmatpush.msrb.mxu3 %v4939_v27 }
 0x599   :  { %2008 = vmatpush.msrb.mxu0 %v4941_v30  ;;  %2028 = vmatpush.msrb.mxu1 %v4943_v32 }
 0x59a   :  { %2048 = vmatpush.msrb.mxu2 %v4946_v33  ;;  %2068 = vmatpush.msrb.mxu3 %v4964_v58 }
 0x59b   :  { %2009 = vmatpush.msrb.mxu0 %v4951_v39  ;;  %2029 = vmatpush.msrb.mxu1 %v4953_v43 }
 0x59c   :  { %2049 = vmatpush.msrb.mxu2 %v6242_v21  ;;  %2069 = vmatpush.msrb.mxu3 %v6243_v47 }
 0x59d   :  { %2010 = vmatpush.msrb.mxu0 %v6244_v6  ;;  %2030 = vmatpush.msrb.mxu1 %v6245_v29 }
 0x59e   :  { %2050 = vmatpush.msrb.mxu2 %v6246_v63  ;;  %2070 = vmatpush.msrb.mxu3 %v6247_v15 }
 0x59f   :  { %2011 = vmatpush.msrb.mxu0 %v6248_v52  ;;  %2031 = vmatpush.msrb.mxu1 %v6249_v23  ;;  %v1445_v23 = vpop.f32.mrf.mxu0  ;;  %v1527_v52 = vpop.f32.mrf.mxu2 }
 0x5a0   :  { %2051 = vmatpush.msrb.mxu2 %v6251_v45  ;;  %2071 = vmatpush.msrb.mxu3 %v4999_v35  ;;  %v1486_v45 = vpop.f32.mrf.mxu1 }
 0x5a1   :  { %2012 = vmatpush.msrb.mxu0 %v6252_v56  ;;  %2032 = vmatpush.msrb.mxu1 %v6253_v48  ;;  %v1568_v48 = vpop.f32.mrf.mxu3 }
 0x5a2   :  { %2052 = vmatpush.msrb.mxu2 %v6254_v61  ;;  %2072 = vmatpush.msrb.mxu3 %v6255_v28 }
 0x5a3   :  { %2013 = vmatpush.msrb.mxu0 %v6256_v34  ;;  %2033 = vmatpush.msrb.mxu1 %v6257_v62 }
 0x5a4   :  { %2053 = vmatpush.msrb.mxu2 %v5017_v12  ;;  %2073 = vmatpush.msrb.mxu3 %v5023_v16 }
 0x5a7   :  { %v5181_v35 = vpop.f32.mrf.mxu0  ;;  %v5185_v15 = vpop.f32.mrf.mxu2 }
 0x5a8   :  { %6263 = vst [vmem:[#allocation35_spill] sm:$0xff] %v5181_v35  ;;  %v5183_v56 = vpop.f32.mrf.mxu1 }
 0x5a9   :  { %6264 = vst [vmem:[#allocation9_spill] sm:$0xff] %v5183_v56  ;;  %v5191_v34 = vpop.f32.mrf.mxu3 }
 0x5aa   :  { %6265 = vst [vmem:[#allocation10_spill] sm:$0xff] %v5185_v15 }
 0x5ab   :  { %6268 = vst [vmem:[#allocation40_spill] sm:$0xff] %v5191_v34 }
 0x5af   :  { %v5187_v61 = vpop.f32.mrf.mxu0  ;;  %v5193_v62 = vpop.f32.mrf.mxu2 }
 0x5b0   :  { %6266 = vst [vmem:[#allocation23_spill] sm:$0xff] %v5187_v61  ;;  %v5189_v28 = vpop.f32.mrf.mxu1 }
 0x5b1   :  { %6267 = vst [vmem:[#allocation11_spill] sm:$0xff] %v5189_v28  ;;  %v5199_v63 = vpop.f32.mrf.mxu3 }
 0x5b2   :  { %6269 = vst [vmem:[#allocation41_spill] sm:$0xff] %v5193_v62 }
 0x5b3   :  { %6272 = vst [vmem:[#allocation44_spill] sm:$0xff] %v5199_v63 }
 0x5b7   :  { %v5195_v12 = vpop.f32.mrf.mxu0  ;;  %v5201_v35 = vpop.f32.mrf.mxu2 }
 0x5b8   :  { %6270 = vst [vmem:[#allocation42_spill] sm:$0xff] %v5195_v12  ;;  %v5197_v16 = vpop.f32.mrf.mxu1 }
 0x5b9   :  { %6271 = vst [vmem:[#allocation43_spill] sm:$0xff] %v5197_v16  ;;  %v5207_v15 = vpop.f32.mrf.mxu3 }
 0x5ba   :  { %6273 = vst [vmem:[#allocation45_spill] sm:$0xff] %v5201_v35 }
 0x5bb   :  { %6276 = vst [vmem:[#allocation48_spill] sm:$0xff] %v5207_v15 }
 0x5bf   :  { %v5203_v56 = vpop.f32.mrf.mxu0  ;;  %v5209_v61 = vpop.f32.mrf.mxu2 }
 0x5c0   :  { %6274 = vst [vmem:[#allocation46_spill] sm:$0xff] %v5203_v56  ;;  %v5205_v29 = vpop.f32.mrf.mxu1 }
 0x5c1   :  { %6275 = vst [vmem:[#allocation47_spill] sm:$0xff] %v5205_v29  ;;  %v5215_v62 = vpop.f32.mrf.mxu3 }
 0x5c2   :  { %6277 = vst [vmem:[#allocation49_spill] sm:$0xff] %v5209_v61  ;;  %v1418_v61 = vld [vmem:[%s5812_s4] sm:$0xf] }
 0x5c3   :  { %6280 = vst [vmem:[#allocation52_spill] sm:$0xff] %v5215_v62  ;;  %v5236_v62 = vperm.slane %v1418_v61, 1  ;;  %v5244_v21 = vperm.slane %v1418_v61, 2 }
 0x5c5   :  { %6289 = vst [vmem:[#allocation61_spill] sm:$0xff] %v5236_v62  ;;  %v1528_v43 = vadd.f32 %v1527_v52, %v5244_v21 }
 0x5c6   :  { %6292 = vst [vmem:[#allocation64_spill] sm:$0xff] %v5244_v21 }
 0x5c7   :  { %v5211_v28 = vpop.f32.mrf.mxu0  ;;  %v5217_v12 = vpop.f32.mrf.mxu2 }
 0x5c8   :  { %6278 = vst [vmem:[#allocation50_spill] sm:$0xff] %v5211_v28  ;;  %v5213_v34 = vpop.f32.mrf.mxu1 }
 0x5c9   :  { %6279 = vst [vmem:[#allocation51_spill] sm:$0xff] %v5213_v34  ;;  %v5223_v35 = vpop.f32.mrf.mxu3  ;;  %v5234_v34 = vperm.slane %v1418_v61, 0 }
 0x5ca   :  { %6281 = vst [vmem:[#allocation53_spill] sm:$0xff] %v5217_v12 }
 0x5cb   :  { %6284 = vst [vmem:[#allocation56_spill] sm:$0xff] %v5223_v35 }
 0x5cc   :  { %6288 = vst [vmem:[#allocation60_spill] sm:$0xff] %v5234_v34 }
 0x5cf   :  { %v5219_v16 = vpop.f32.mrf.mxu0  ;;  %v5225_v56 = vpop.f32.mrf.mxu2 }
 0x5d0   :  { %6282 = vst [vmem:[#allocation54_spill] sm:$0xff] %v5219_v16  ;;  %v5221_v63 = vpop.f32.mrf.mxu1  ;;  %v1446_v16 = vadd.f32 %v1445_v23, %v5234_v34 }
 0x5d1   :  { %6283 = vst [vmem:[#allocation55_spill] sm:$0xff] %v5221_v63  ;;  %v1487_v63 = vadd.f32 %v1486_v45, %v5236_v62  ;;  %v5240_v12 = vpop.f32.mrf.mxu3 }
 0x5d2   :  { %6285 = vst [vmem:[#allocation57_spill] sm:$0xff] %v5225_v56 }
 0x5d3   :  { %6290 = vst [vmem:[#allocation62_spill] sm:$0xff] %v5240_v12 }
 0x5f8   :  { %v5230_v29 = vpop.f32.mrf.mxu0  ;;  %v5232_v28 = vpop.f32.mrf.mxu1 }
 0x5f9   :  { %6286 = vst [vmem:[#allocation58_spill] sm:$0xff] %v5230_v29 }
 0x5fa   :  { %6287 = vst [vmem:[#allocation59_spill] sm:$0xff] %v5232_v28 }
 0x5ff   :  { %v5242_v35 = vpop.f32.mrf.mxu2  ;;  %v5247_v39 = vpop.f32.mrf.mxu3 }
 0x600   :  { %6291 = vst [vmem:[#allocation63_spill] sm:$0xff] %v5242_v35  ;;  %v1709_v56 = vpop.f32.mrf.mxu0  ;;  %v1729_v15 = vpop.f32.mrf.mxu1 }
 0x601   :  { %v1772_v6 = vadd.f32 %v1709_v56, %v1446_v16  ;;  %v1773_v47 = vadd.f32 %v1729_v15, %v1487_v63  ;;  %6293 = vst [vmem:[#allocation65_spill] sm:$0xff] %v5247_v39  ;;  %v5249_v16 = vperm.slane %v1418_v61, 3 }
 0x603   :  { %v2976_v29 = vmul.f32 -1.442695, %v1772_v6  ;;  %v2977_v28 = vmul.f32 -1.442695, %v1773_v47  ;;  %6294 = vst [vmem:[#allocation66_spill] sm:$0xff] %v5249_v16 }
 0x605   :  { %3140 = vpow2.f32 %v2976_v29  ;;  %v1569_v29 = vadd.f32 %v1568_v48, %v5249_v16 }
 0x606   :  { %3142 = vpow2.f32 %v2977_v28 }
 0x607   :  { %v1749_v23 = vpop.f32.mrf.mxu2  ;;  %v1769_v6 = vpop.f32.mrf.mxu3 }
 0x608   :  { %v1774_v45 = vadd.f32 %v1749_v23, %v1528_v43  ;;  %v1775_v52 = vadd.f32 %v1769_v6, %v1569_v29 }
 0x60a   :  { %v2978_v62 = vmul.f32 -1.442695, %v1774_v45 }
 0x60b   :  { %v3141_v12 = vpop.eup %3140 }
 0x60c   :  { %v3143_v34 = vpop.eup %3142  ;;  %v1785_v35 = vadd.f32 1.0, %v3141_v12  ;;  %3144 = vpow2.f32 %v2978_v62 }
 0x60d   :  { %v1786_v58 = vadd.f32 1.0, %v3143_v34 }
 0x60e   :  { %3146 = vrcp.f32 %v1785_v35  ;;  %v1799_v12 = vand.u32 2147483648, %v1785_v35  ;;  %v1797_v62 = vand.u32 2147483647, %v1785_v35  ;;  %vm1793_vm2 = vweird.f32 %v1785_v35 }
 0x60f   :  { %3148 = vrcp.f32 %v1786_v58  ;;  %v1814_v34 = vand.u32 2147483648, %v1786_v58  ;;  %v1812_v21 = vand.u32 2147483647, %v1786_v58  ;;  %vm1808_vm3 = vweird.f32 %v1786_v58 }
 0x610   :  { %vm1798_vm5 = vcmp.eq.f32.partialorder %v1797_v62, 8.507059e+37 }
 0x611   :  { %v1815_v16 = vor.u32 1.1754944e-38, %v1814_v34  ;;  %vm1813_vm7 = vcmp.eq.f32.partialorder %v1812_v21, 8.507059e+37 }
 0x612   :  { %v3145_v47 = vpop.eup %3144 }
 0x613   :  { %v1787_v63 = vadd.f32 1.0, %v3145_v47  ;;  %v1800_v47 = vor.u32 1.1754944e-38, %v1799_v12 }
 0x614   :  { %v3147_v15 = vpop.eup %3146 }
 0x615   :  { %v3149_v56 = vpop.eup %3148  ;;  %v1789_v28 = vmul.f32 %v3147_v15, %v1785_v35  ;;  %3150 = vrcp.f32 %v1787_v63  ;;  %vm1794_vm0 = vweird.f32 %v3147_v15  ;;  %v1829_v35 = vand.u32 2147483648, %v1787_v63 }
 0x616   :  { %v1804_v43 = vmul.f32 %v3149_v56, %v1786_v58  ;;  %3152 = vtanh.f32 %v1775_v52  ;;  %vm1809_vm1 = vweird.f32 %v3149_v56  ;;  %vm1795_vm4 = vmor %vm1793_vm2, %vm1794_vm0  ;;  %vm1823_vm9 = vweird.f32 %v1787_v63 }
 0x617   :  { %v1790_v23 = vsub.f32 1.0, %v1789_v28  ;;  %vm1810_vm6 = vmor %vm1808_vm3, %vm1809_vm1  ;;  %v1830_v12 = vor.u32 1.1754944e-38, %v1829_v35 }
 0x618   :  { %v1805_v45 = vsub.f32 1.0, %v1804_v43 }
 0x619   :  { %v1791_v61 = vmul.f32 %v3147_v15, %v1790_v23 }
 0x61a   :  { %v1806_v39 = vmul.f32 %v3149_v56, %v1805_v45 }
 0x61b   :  { %v3151_v33 = vpop.eup %3150  ;;  %v1792_v48 = vadd.f32 %v3147_v15, %v1791_v61 }
 0x61c   :  { %v1819_v6 = vmul.f32 %v3151_v33, %v1787_v63  ;;  %v1807_v29 = vadd.f32 %v3149_v56, %v1806_v39  ;;  %v3153_v52 = vpop.eup %3152  ;;  %vm1824_vm8 = vweird.f32 %v3151_v33  ;;  %v1827_v39 = vand.u32 2147483647, %v1787_v63 }
 0x61d   :  { %v1796_v28 = vsel %vm1795_vm4, %v3147_v15, %v1792_v48  ;;  %vm1825_vm10 = vmor %vm1823_vm9, %vm1824_vm8 }
 0x61e   :  { %v1820_v43 = vsub.f32 1.0, %v1819_v6  ;;  %v1801_v23 = vsel %vm1798_vm5, %v1800_v47, %v1796_v28  ;;  %v1811_v32 = vsel %vm1810_vm6, %v3149_v56, %v1807_v29  ;;  %vm1828_vm11 = vcmp.eq.f32.partialorder %v1827_v39, 8.507059e+37  ;;  %v6327_v28 = vld [vmem:[#allocation66_spill] sm:$0xff] }
 0x61f   :  { %v1816_v45 = vsel %vm1813_vm7, %v1815_v16, %v1811_v32  ;;  %v1835_v30 = vmul.f32 %v3153_v52, %v1801_v23  ;;  %v6328_v52 = vld [vmem:[#allocation40_spill] sm:$0xff] }
 0x620   :  { %v1821_v27 = vmul.f32 %v3151_v33, %v1820_v43  ;;  %v1834_v26 = vmul.f32 0.0, %v1816_v45  ;;  %v1572_v43 = vadd.f32 %v6328_v52, %v6327_v28  ;;  %v5397_v52 = vld [vmem:[#allocation5 + $0x140] sm:$0xff] }
 0x622   :  { %v5252_v61 = vadd.f32 %v1835_v30, %v1834_v26  ;;  %v1822_v58 = vadd.f32 %v3151_v33, %v1821_v27 }
 0x624   :  { %3154 = vtanh.f32 %v5252_v61  ;;  %v1826_v15 = vsel %vm1825_vm10, %v3151_v33, %v1822_v58 }
 0x625   :  { %v1831_v56 = vsel %vm1828_vm11, %v1830_v12, %v1826_v15 }
 0x62a   :  { %v3155_v34 = vpop.eup %3154 }
 0x62b   :  { %v1838_v21 = vmul.f32 %v3155_v34, %v1831_v56 }
 0x62d   :  { %1839 = vst [vmem:[%s5813_s5] sm:$0xff] %v1838_v21  ;;  %1861 = vmatmul.f32.vlgmr.msra.gmra.mxu0 %v1838_v21  ;;  %1881 = vmatmul.f32.vlgmr.msra.gmra.mxu1 %v1838_v21 }
 0x62e   :  { %1901 = vmatmul.f32.vlgmr.msra.gmra.mxu2 %v1838_v21  ;;  %1921 = vmatmul.f32.vlgmr.msra.gmra.mxu3 %v1838_v21 }
 0x62f   :  { %2151 = vmatpush.msra.mxu0 %v4803_v36  ;;  %2171 = vmatpush.msra.mxu1 %v4805_v40  ;;  %v6295_v36 = vld [vmem:[#allocation12_spill] sm:$0xff]  ;;  %v6296_v40 = vld [vmem:[#allocation13_spill] sm:$0xff] }
 0x630   :  { %2191 = vmatpush.msra.mxu2 %v6258_v46  ;;  %2211 = vmatpush.msra.mxu3 %v4823_v59  ;;  %v6297_v59 = vld [vmem:[#allocation27_spill] sm:$0xff]  ;;  %v6325_v46 = vld [vmem:[#allocation64_spill] sm:$0xff] }
 0x631   :  { %2152 = vmatpush.msra.mxu0 %v4825_v53  ;;  %2172 = vmatpush.msra.mxu1 %v6259_v14  ;;  %v6298_v53 = vld [vmem:[#allocation14_spill] sm:$0xff] }
 0x632   :  { %2192 = vmatpush.msra.mxu2 %v6260_v18  ;;  %2212 = vmatpush.msra.mxu3 %v6261_v31  ;;  %v6326_v14 = vld [vmem:[#allocation10_spill] sm:$0xff] }
 0x633   :  { %2153 = vmatpush.msra.mxu0 %v6262_v3  ;;  %2173 = vmatpush.msra.mxu1 %v4838_v44  ;;  %v6299_v44 = vld [vmem:[#allocation15_spill] sm:$0xff]  ;;  %v1531_v18 = vadd.f32 %v6326_v14, %v6325_v46  ;;  %v5364_v14 = vld [vmem:[#allocation5 + $0x1a8] sm:$0xff] }
 0x634   :  { %2193 = vmatpush.msra.mxu2 %v4844_v57  ;;  %2213 = vmatpush.msra.mxu3 %v4846_v60  ;;  %v6300_v57 = vld [vmem:[#allocation32_spill] sm:$0xff] }
 0x635   :  { %2154 = vmatpush.msra.mxu0 %v4850_v55  ;;  %2174 = vmatpush.msra.mxu1 %v4852_v38  ;;  %v6301_v60 = vld [vmem:[#allocation16_spill] sm:$0xff]  ;;  %v6302_v55 = vld [vmem:[#allocation31_spill] sm:$0xff] }
 0x636   :  { %2194 = vmatpush.msra.mxu2 %v4854_v41  ;;  %2214 = vmatpush.msra.mxu3 %v4864_v54  ;;  %v6303_v38 = vld [vmem:[#allocation19_spill] sm:$0xff]  ;;  %v6304_v41 = vld [vmem:[#allocation20_spill] sm:$0xff]  ;;  %v6305_v54 = vld [vmem:[#allocation17_spill] sm:$0xff] }
 0x637   :  { %2155 = vmatpush.msra.mxu0 %v4866_v4  ;;  %2175 = vmatpush.msra.mxu1 %v4868_v11  ;;  %v6306_v4 = vld [vmem:[#allocation18_spill] sm:$0xff]  ;;  %v6307_v11 = vld [vmem:[#allocation21_spill] sm:$0xff] }
 0x638   :  { %2195 = vmatpush.msra.mxu2 %v4871_v51  ;;  %2215 = vmatpush.msra.mxu3 %v4876_v42  ;;  %v6308_v51 = vld [vmem:[#allocation22_spill] sm:$0xff]  ;;  %v6309_v42 = vld [vmem:[#allocation33_spill] sm:$0xff] }
 0x639   :  { %2156 = vmatpush.msra.mxu0 %v4878_v2  ;;  %2176 = vmatpush.msra.mxu1 %v4880_v19  ;;  %v6310_v2 = vld [vmem:[#allocation24_spill] sm:$0xff]  ;;  %v6311_v19 = vld [vmem:[#allocation25_spill] sm:$0xff] }
 0x63a   :  { %2196 = vmatpush.msra.mxu2 %v4883_v7  ;;  %2216 = vmatpush.msra.mxu3 %v4888_v17  ;;  %v6312_v7 = vld [vmem:[#allocation28_spill] sm:$0xff]  ;;  %v6313_v17 = vld [vmem:[#allocation26_spill] sm:$0xff] }
 0x63b   :  { %2157 = vmatpush.msra.mxu0 %v4890_v9  ;;  %2177 = vmatpush.msra.mxu1 %v4892_v1  ;;  %v6314_v9 = vld [vmem:[#allocation34_spill] sm:$0xff]  ;;  %v6315_v1 = vld [vmem:[#allocation29_spill] sm:$0xff] }
 0x63c   :  { %2197 = vmatpush.msra.mxu2 %v4895_v0  ;;  %2217 = vmatpush.msra.mxu3 %v4900_v13  ;;  %v6316_v0 = vld [vmem:[#allocation30_spill] sm:$0xff]  ;;  %v6317_v13 = vld [vmem:[#allocation36_spill] sm:$0xff] }
 0x63d   :  { %2158 = vmatpush.msra.mxu0 %v4902_v8  ;;  %2178 = vmatpush.msra.mxu1 %v4904_v37  ;;  %v6318_v8 = vld [vmem:[#allocation37_spill] sm:$0xff]  ;;  %v6319_v37 = vld [vmem:[#allocation38_spill] sm:$0xff] }
 0x63e   :  { %2198 = vmatpush.msra.mxu2 %v4907_v5  ;;  %2218 = vmatpush.msra.mxu3 %v4915_v49  ;;  %v6320_v5 = vld [vmem:[#allocation39_spill] sm:$0xff]  ;;  %v6321_v49 = vld [vmem:[#allocation60_spill] sm:$0xff] }
 0x63f   :  { %2159 = vmatpush.msra.mxu0 %v4917_v10  ;;  %2179 = vmatpush.msra.mxu1 %v4919_v50  ;;  %v6322_v10 = vld [vmem:[#allocation35_spill] sm:$0xff] }
 0x640   :  { %2199 = vmatpush.msra.mxu2 %v4922_v20  ;;  %2219 = vmatpush.msra.mxu3 %v4927_v22  ;;  %v1449_v50 = vadd.f32 %v6322_v10, %v6321_v49  ;;  %v6323_v20 = vld [vmem:[#allocation61_spill] sm:$0xff] }
 0x641   :  { %2160 = vmatpush.msra.mxu0 %v4929_v24  ;;  %2180 = vmatpush.msra.mxu1 %v4931_v25  ;;  %v6324_v22 = vld [vmem:[#allocation9_spill] sm:$0xff] }
 0x642   :  { %2200 = vmatpush.msra.mxu2 %v6295_v36  ;;  %2220 = vmatpush.msra.mxu3 %v6296_v40  ;;  %v1490_v24 = vadd.f32 %v6324_v22, %v6323_v20  ;;  %v5340_v22 = vld [vmem:[#allocation5 + $0x1e8] sm:$0xff] }
 0x643   :  { %2161 = vmatpush.msra.mxu0 %v6297_v59  ;;  %2181 = vmatpush.msra.mxu1 %v6298_v53 }
 0x644   :  { %2201 = vmatpush.msra.mxu2 %v6299_v44  ;;  %2221 = vmatpush.msra.mxu3 %v6300_v57 }
 0x645   :  { %2162 = vmatpush.msra.mxu0 %v6301_v60  ;;  %2182 = vmatpush.msra.mxu1 %v6302_v55 }
 0x646   :  { %2202 = vmatpush.msra.mxu2 %v6303_v38  ;;  %2222 = vmatpush.msra.mxu3 %v6304_v41 }
 0x647   :  { %2163 = vmatpush.msra.mxu0 %v6305_v54  ;;  %2183 = vmatpush.msra.mxu1 %v6306_v4 }
 0x648   :  { %2203 = vmatpush.msra.mxu2 %v6307_v11  ;;  %2223 = vmatpush.msra.mxu3 %v6308_v51 }
 0x649   :  { %2164 = vmatpush.msra.mxu0 %v6309_v42  ;;  %2184 = vmatpush.msra.mxu1 %v6310_v2 }
 0x64a   :  { %2204 = vmatpush.msra.mxu2 %v6311_v19  ;;  %2224 = vmatpush.msra.mxu3 %v6312_v7 }
 0x64b   :  { %2165 = vmatpush.msra.mxu0 %v6313_v17  ;;  %2185 = vmatpush.msra.mxu1 %v6314_v9 }
 0x64c   :  { %2205 = vmatpush.msra.mxu2 %v6315_v1  ;;  %2225 = vmatpush.msra.mxu3 %v6316_v0 }
 0x64d   :  { %2166 = vmatpush.msra.mxu0 %v6317_v13  ;;  %2186 = vmatpush.msra.mxu1 %v6318_v8 }
 0x64e   :  { %2206 = vmatpush.msra.mxu2 %v6319_v37  ;;  %2226 = vmatpush.msra.mxu3 %v6320_v5 }
 0x6aa   :  { %v1862_v25 = vpop.f32.mrf.mxu0  ;;  %v1882_v26 = vpop.f32.mrf.mxu1 }
 0x6ab   :  { %v1925_v27 = vadd.f32 %v1862_v25, %v1449_v50  ;;  %v1926_v30 = vadd.f32 %v1882_v26, %v1490_v24  ;;  %v5343_v24 = vld [vmem:[#allocation5 + $0x1f0] sm:$0xff]  ;;  %v5346_v25 = vld [vmem:[#allocation5 + $0x1f8] sm:$0xff]  ;;  %v5349_v26 = vld [vmem:[#allocation5 + $0x1c0] sm:$0xff] }
 0x6ad   :  { %v2979_v32 = vmul.f32 -1.442695, %v1925_v27  ;;  %v2980_v33 = vmul.f32 -1.442695, %v1926_v30  ;;  %v5352_v27 = vld [vmem:[#allocation5 + $0x1c8] sm:$0xff]  ;;  %v5355_v30 = vld [vmem:[#allocation5 + $0x1d0] sm:$0xff] }
 0x6af   :  { %3156 = vpow2.f32 %v2979_v32  ;;  %v5358_v32 = vld [vmem:[#allocation5 + $0x1d8] sm:$0xff] }
 0x6b0   :  { %3158 = vpow2.f32 %v2980_v33  ;;  %v5361_v33 = vld [vmem:[#allocation5 + $0x1a0] sm:$0xff] }
 0x6b1   :  { %v1902_v31 = vpop.f32.mrf.mxu2  ;;  %v1922_v47 = vpop.f32.mrf.mxu3 }
 0x6b2   :  { %v1927_v3 = vadd.f32 %v1902_v31, %v1531_v18  ;;  %v1928_v58 = vadd.f32 %v1922_v47, %v1572_v43  ;;  %v5367_v18 = vld [vmem:[#allocation5 + $0x1b0] sm:$0xff]  ;;  %v5370_v31 = vld [vmem:[#allocation5 + $0x1b8] sm:$0xff]  ;;  %v5400_v43 = vld [vmem:[#allocation5 + $0x148] sm:$0xff] }
 0x6b3   :  { %v5391_v47 = vld [vmem:[#allocation5 + $0x170] sm:$0xff] }
 0x6b4   :  { %v2981_v16 = vmul.f32 -1.442695, %v1927_v3  ;;  %v5373_v3 = vld [vmem:[#allocation5 + $0x180] sm:$0xff] }
 0x6b5   :  { %v3157_v63 = vpop.eup %3156 }
 0x6b6   :  { %v3159_v62 = vpop.eup %3158  ;;  %v1938_v48 = vadd.f32 1.0, %v3157_v63  ;;  %3160 = vpow2.f32 %v2981_v16  ;;  %v5376_v16 = vld [vmem:[#allocation5 + $0x188] sm:$0xff]  ;;  %v5379_v63 = vld [vmem:[#allocation5 + $0x190] sm:$0xff] }
 0x6b7   :  { %v1939_v6 = vadd.f32 1.0, %v3159_v62  ;;  %v5382_v62 = vld [vmem:[#allocation5 + $0x198] sm:$0xff] }
 0x6b8   :  { %3162 = vrcp.f32 %v1938_v48  ;;  %v1952_v56 = vand.u32 2147483648, %v1938_v48  ;;  %v1950_v40 = vand.u32 2147483647, %v1938_v48  ;;  %vm1946_vm14 = vweird.f32 %v1938_v48 }
 0x6b9   :  { %3164 = vrcp.f32 %v1939_v6  ;;  %v1967_v21 = vand.u32 2147483648, %v1939_v6  ;;  %v1965_v53 = vand.u32 2147483647, %v1939_v6  ;;  %vm1961_vm15 = vweird.f32 %v1939_v6 }
 0x6ba   :  { %v1953_v55 = vor.u32 1.1754944e-38, %v1952_v56  ;;  %vm1951_vm2 = vcmp.eq.f32.partialorder %v1950_v40, 8.507059e+37  ;;  %v5427_v56 = vld [vmem:[#allocation5 + $0x110] sm:$0xff]  ;;  %v5436_v40 = vld [vmem:[#allocation5 + $0xe8] sm:$0xff] }
 0x6bb   :  { %v1968_v41 = vor.u32 1.1754944e-38, %v1967_v21  ;;  %vm1966_vm3 = vcmp.eq.f32.partialorder %v1965_v53, 8.507059e+37  ;;  %v5430_v21 = vld [vmem:[#allocation5 + $0x118] sm:$0xff] }
 0x6bc   :  { %v3161_v29 = vpop.eup %3160  ;;  %v5442_v53 = vld [vmem:[#allocation5 + $0xf8] sm:$0xff] }
 0x6bd   :  { %v1940_v23 = vadd.f32 1.0, %v3161_v29  ;;  %v5394_v29 = vld [vmem:[#allocation5 + $0x178] sm:$0xff] }
 0x6be   :  { %v3163_v45 = vpop.eup %3162 }
 0x6bf   :  { %v3165_v35 = vpop.eup %3164  ;;  %v1942_v39 = vmul.f32 %v3163_v45, %v1938_v48  ;;  %3166 = vrcp.f32 %v1940_v23  ;;  %vm1947_vm12 = vweird.f32 %v3163_v45  ;;  %v1982_v0 = vand.u32 2147483648, %v1940_v23  ;;  %v5385_v48 = vld [vmem:[#allocation5 + $0x160] sm:$0xff] }
 0x6c0   :  { %v1957_v15 = vmul.f32 %v3165_v35, %v1939_v6  ;;  %3168 = vtanh.f32 %v1928_v58  ;;  %vm1962_vm13 = vweird.f32 %v3165_v35  ;;  %vm1948_vm0 = vmor %vm1946_vm14, %vm1947_vm12  ;;  %vm1976_vm5 = vweird.f32 %v1940_v23  ;;  %v5388_v6 = vld [vmem:[#allocation5 + $0x168] sm:$0xff]  ;;  %v5409_v58 = vld [vmem:[#allocation5 + $0x120] sm:$0xff] }
 0x6c1   :  { %v1943_v12 = vsub.f32 1.0, %v1942_v39  ;;  %vm1963_vm1 = vmor %vm1961_vm15, %vm1962_vm13  ;;  %v1980_v13 = vand.u32 2147483647, %v1940_v23  ;;  %v1983_v37 = vor.u32 1.1754944e-38, %v1982_v0  ;;  %v5415_v39 = vld [vmem:[#allocation5 + $0x130] sm:$0xff]  ;;  %v5493_v0 = vld [vmem:[#allocation5 + $0x40] sm:$0xff] }
 0x6c2   :  { %v1958_v34 = vsub.f32 1.0, %v1957_v15  ;;  %v5418_v15 = vld [vmem:[#allocation5 + $0x138] sm:$0xff]  ;;  %6343 = vst [vmem:[#allocation33_spill] sm:$0xff] %v5493_v0 }
 0x6c3   :  { %v1944_v36 = vmul.f32 %v3163_v45, %v1943_v12  ;;  %vm1981_vm7 = vcmp.eq.f32.partialorder %v1980_v13, 8.507059e+37  ;;  %v5421_v12 = vld [vmem:[#allocation5 + $0x100] sm:$0xff]  ;;  %v5496_v13 = vld [vmem:[#allocation5 + $0x48] sm:$0xff] }
 0x6c4   :  { %v1959_v59 = vmul.f32 %v3165_v35, %v1958_v34  ;;  %v5424_v34 = vld [vmem:[#allocation5 + $0x108] sm:$0xff]  ;;  %6344 = vst [vmem:[#allocation24_spill] sm:$0xff] %v5496_v13 }
 0x6c5   :  { %v3167_v44 = vpop.eup %3166  ;;  %v1945_v57 = vadd.f32 %v3163_v45, %v1944_v36  ;;  %v5433_v36 = vld [vmem:[#allocation5 + $0xe0] sm:$0xff] }
 0x6c6   :  { %v1972_v60 = vmul.f32 %v3167_v44, %v1940_v23  ;;  %v1960_v38 = vadd.f32 %v3165_v35, %v1959_v59  ;;  %v3169_v4 = vpop.eup %3168  ;;  %vm1977_vm4 = vweird.f32 %v3167_v44  ;;  %v5403_v23 = vld [vmem:[#allocation5 + $0x150] sm:$0xff] }
 0x6c7   :  { %v1949_v54 = vsel %vm1948_vm0, %v3163_v45, %v1945_v57  ;;  %vm1978_vm6 = vmor %vm1976_vm5, %vm1977_vm4  ;;  %v5406_v45 = vld [vmem:[#allocation5 + $0x158] sm:$0xff]  ;;  %v5439_v59 = vld [vmem:[#allocation5 + $0xf0] sm:$0xff] }
 0x6c8   :  { %v1973_v11 = vsub.f32 1.0, %v1972_v60  ;;  %v1954_v51 = vsel %vm1951_vm2, %v1953_v55, %v1949_v54  ;;  %v1964_v42 = vsel %vm1963_vm1, %v3165_v35, %v1960_v38  ;;  %v5412_v35 = vld [vmem:[#allocation5 + $0x128] sm:$0xff]  ;;  %v5451_v60 = vld [vmem:[#allocation5 + $0xd0] sm:$0xff]  ;;  %v5454_v55 = vld [vmem:[#allocation5 + $0xd8] sm:$0xff] }
 0x6c9   :  { %v1969_v2 = vsel %vm1966_vm3, %v1968_v41, %v1964_v42  ;;  %v1988_v19 = vmul.f32 %v3169_v4, %v1954_v51  ;;  %v5448_v57 = vld [vmem:[#allocation5 + $0xc8] sm:$0xff]  ;;  %6329 = vst [vmem:[#allocation12_spill] sm:$0xff] %v5451_v60  ;;  %v5457_v38 = vld [vmem:[#allocation5 + $0xa0] sm:$0xff]  ;;  %v5463_v54 = vld [vmem:[#allocation5 + $0xb0] sm:$0xff] }
 0x6ca   :  { %v1974_v7 = vmul.f32 %v3167_v44, %v1973_v11  ;;  %v1987_v17 = vmul.f32 %v1969_v2, %v5252_v61  ;;  %v5337_v61 = vld [vmem:[#allocation5 + $0x1e0] sm:$0xff]  ;;  %6330 = vst [vmem:[#allocation13_spill] sm:$0xff] %v5454_v55  ;;  %v5460_v41 = vld [vmem:[#allocation5 + $0xa8] sm:$0xff]  ;;  %v5466_v4 = vld [vmem:[#allocation5 + $0xb8] sm:$0xff] }
 0x6cb   :  { %6331 = vst [vmem:[#allocation27_spill] sm:$0xff] %v5457_v38  ;;  %v5469_v11 = vld [vmem:[#allocation5 + $0x80] sm:$0xff]  ;;  %v5472_v51 = vld [vmem:[#allocation5 + $0x88] sm:$0xff]  ;;  %v5475_v42 = vld [vmem:[#allocation5 + $0x90] sm:$0xff] }
 0x6cc   :  { %v5331_v9 = vadd.f32 %v1988_v19, %v1987_v17  ;;  %v1975_v1 = vadd.f32 %v3167_v44, %v1974_v7  ;;  %6332 = vst [vmem:[#allocation14_spill] sm:$0xff] %v5460_v41  ;;  %v5478_v2 = vld [vmem:[#allocation5 + $0x98] sm:$0xff]  ;;  %v5481_v19 = vld [vmem:[#allocation5 + $0x60] sm:$0xff]  ;;  %v5484_v7 = vld [vmem:[#allocation5 + $0x68] sm:$0xff] }
 0x6cd   :  { %6333 = vst [vmem:[#allocation15_spill] sm:$0xff] %v5463_v54  ;;  %v5487_v17 = vld [vmem:[#allocation5 + $0x70] sm:$0xff] }
 0x6ce   :  { %3170 = vtanh.f32 %v5331_v9  ;;  %v1979_v8 = vsel %vm1978_vm6, %v3167_v44, %v1975_v1  ;;  %v5445_v44 = vld [vmem:[#allocation5 + $0xc0] sm:$0xff]  ;;  %6334 = vst [vmem:[#allocation32_spill] sm:$0xff] %v5466_v4  ;;  %v5490_v1 = vld [vmem:[#allocation5 + $0x78] sm:$0xff] }
 0x6cf   :  { %v1984_v10 = vsel %vm1981_vm7, %v1983_v37, %v1979_v8  ;;  %6335 = vst [vmem:[#allocation16_spill] sm:$0xff] %v5469_v11  ;;  %v5499_v8 = vld [vmem:[#allocation5 + $0x50] sm:$0xff]  ;;  %v5502_v37 = vld [vmem:[#allocation5 + $0x58] sm:$0xff] }
 0x6d0   :  { %6336 = vst [vmem:[#allocation31_spill] sm:$0xff] %v5472_v51 }
 0x6d1   :  { %6337 = vst [vmem:[#allocation19_spill] sm:$0xff] %v5475_v42 }
 0x6d2   :  { %6338 = vst [vmem:[#allocation20_spill] sm:$0xff] %v5478_v2 }
 0x6d3   :  { %6339 = vst [vmem:[#allocation17_spill] sm:$0xff] %v5481_v19 }
 0x6d4   :  { %v3171_v5 = vpop.eup %3170  ;;  %6340 = vst [vmem:[#allocation18_spill] sm:$0xff] %v5484_v7 }
 0x6d5   :  { %v1991_v50 = vmul.f32 %v3171_v5, %v1984_v10  ;;  %6341 = vst [vmem:[#allocation21_spill] sm:$0xff] %v5487_v17  ;;  %v5505_v5 = vld [vmem:[#allocation5 + $0x20] sm:$0xff]  ;;  %v5508_v10 = vld [vmem:[#allocation5 + $0x28] sm:$0xff] }
 0x6d6   :  { %6342 = vst [vmem:[#allocation22_spill] sm:$0xff] %v5490_v1 }
 0x6d7   :  { %2982 = vst [vmem:[%s5813_s5 + $0x8] sm:$0xff] %v1991_v50  ;;  %2014 = vmatmul.f32.vlgmr.msrb.gmra.mxu0 %v1991_v50  ;;  %2034 = vmatmul.f32.vlgmr.msrb.gmra.mxu1 %v1991_v50 }
 0x6d8   :  { %2054 = vmatmul.f32.vlgmr.msrb.gmra.mxu2 %v1991_v50  ;;  %2074 = vmatmul.f32.vlgmr.msrb.gmra.mxu3 %v1991_v50  ;;  %6345 = vst [vmem:[#allocation25_spill] sm:$0xff] %v5499_v8  ;;  %v5511_v50 = vld [vmem:[#allocation5 + $0x30] sm:$0xff] }
 0x6d9   :  { %2304 = vmatpush.msrb.mxu0 %v5337_v61  ;;  %2324 = vmatpush.msrb.mxu1 %v5340_v22  ;;  %6346 = vst [vmem:[#allocation28_spill] sm:$0xff] %v5502_v37 }
 0x6da   :  { %2344 = vmatpush.msrb.mxu2 %v5343_v24  ;;  %2364 = vmatpush.msrb.mxu3 %v5346_v25  ;;  %6347 = vst [vmem:[#allocation26_spill] sm:$0xff] %v5505_v5 }
 0x6db   :  { %2305 = vmatpush.msrb.mxu0 %v5349_v26  ;;  %2325 = vmatpush.msrb.mxu1 %v5352_v27  ;;  %6348 = vst [vmem:[#allocation34_spill] sm:$0xff] %v5508_v10 }
 0x6dc   :  { %2345 = vmatpush.msrb.mxu2 %v5355_v30  ;;  %2365 = vmatpush.msrb.mxu3 %v5358_v32  ;;  %6349 = vst [vmem:[#allocation29_spill] sm:$0xff] %v5511_v50 }
 0x6dd   :  { %2306 = vmatpush.msrb.mxu0 %v5361_v33  ;;  %2326 = vmatpush.msrb.mxu1 %v5364_v14 }
 0x6de   :  { %2346 = vmatpush.msrb.mxu2 %v5367_v18  ;;  %2366 = vmatpush.msrb.mxu3 %v5370_v31 }
 0x6df   :  { %2307 = vmatpush.msrb.mxu0 %v5373_v3  ;;  %2327 = vmatpush.msrb.mxu1 %v5376_v16 }
 0x6e0   :  { %2347 = vmatpush.msrb.mxu2 %v5379_v63  ;;  %2367 = vmatpush.msrb.mxu3 %v5382_v62 }
 0x6e1   :  { %2308 = vmatpush.msrb.mxu0 %v5385_v48  ;;  %2328 = vmatpush.msrb.mxu1 %v5388_v6 }
 0x6e2   :  { %2348 = vmatpush.msrb.mxu2 %v5391_v47  ;;  %2368 = vmatpush.msrb.mxu3 %v5394_v29 }
 0x6e3   :  { %2309 = vmatpush.msrb.mxu0 %v5397_v52  ;;  %2329 = vmatpush.msrb.mxu1 %v5400_v43 }
 0x6e4   :  { %2349 = vmatpush.msrb.mxu2 %v5403_v23  ;;  %2369 = vmatpush.msrb.mxu3 %v5406_v45 }
 0x6e5   :  { %2310 = vmatpush.msrb.mxu0 %v5409_v58  ;;  %2330 = vmatpush.msrb.mxu1 %v5412_v35 }
 0x6e6   :  { %2350 = vmatpush.msrb.mxu2 %v5415_v39  ;;  %2370 = vmatpush.msrb.mxu3 %v5418_v15 }
 0x6e7   :  { %2311 = vmatpush.msrb.mxu0 %v5421_v12  ;;  %2331 = vmatpush.msrb.mxu1 %v5424_v34 }
 0x6e8   :  { %2351 = vmatpush.msrb.mxu2 %v5427_v56  ;;  %2371 = vmatpush.msrb.mxu3 %v5430_v21 }
 0x6e9   :  { %2312 = vmatpush.msrb.mxu0 %v5433_v36  ;;  %2332 = vmatpush.msrb.mxu1 %v5436_v40 }
 0x6ea   :  { %2352 = vmatpush.msrb.mxu2 %v5439_v59  ;;  %2372 = vmatpush.msrb.mxu3 %v5442_v53 }
 0x6eb   :  { %2313 = vmatpush.msrb.mxu0 %v5445_v44  ;;  %2333 = vmatpush.msrb.mxu1 %v5448_v57 }
 0x6ec   :  { %2353 = vmatpush.msrb.mxu2 %v5451_v60  ;;  %2373 = vmatpush.msrb.mxu3 %v5454_v55 }
 0x6ed   :  { %2314 = vmatpush.msrb.mxu0 %v5457_v38  ;;  %2334 = vmatpush.msrb.mxu1 %v5460_v41 }
 0x6ee   :  { %2354 = vmatpush.msrb.mxu2 %v5463_v54  ;;  %2374 = vmatpush.msrb.mxu3 %v5466_v4 }
 0x6ef   :  { %2315 = vmatpush.msrb.mxu0 %v5469_v11  ;;  %2335 = vmatpush.msrb.mxu1 %v5472_v51 }
 0x6f0   :  { %2355 = vmatpush.msrb.mxu2 %v5475_v42  ;;  %2375 = vmatpush.msrb.mxu3 %v5478_v2  ;;  %v6357_v42 = vld [vmem:[#allocation41_spill] sm:$0xff] }
 0x6f1   :  { %2316 = vmatpush.msrb.mxu0 %v5481_v19  ;;  %2336 = vmatpush.msrb.mxu1 %v5484_v7 }
 0x6f2   :  { %2356 = vmatpush.msrb.mxu2 %v5487_v17  ;;  %2376 = vmatpush.msrb.mxu3 %v5490_v1 }
 0x6f3   :  { %2317 = vmatpush.msrb.mxu0 %v5493_v0  ;;  %2337 = vmatpush.msrb.mxu1 %v5496_v13  ;;  %v5514_v13 = vld [vmem:[#allocation5 + $0x38] sm:$0xff] }
 0x6f4   :  { %2357 = vmatpush.msrb.mxu2 %v5499_v8  ;;  %2377 = vmatpush.msrb.mxu3 %v5502_v37  ;;  %6350 = vst [vmem:[#allocation30_spill] sm:$0xff] %v5514_v13  ;;  %v5517_v8 = vld [vmem:[#allocation5] sm:$0xff]  ;;  %v5520_v37 = vld [vmem:[#allocation5 + $0x8] sm:$0xff] }
 0x6f5   :  { %2318 = vmatpush.msrb.mxu0 %v5505_v5  ;;  %2338 = vmatpush.msrb.mxu1 %v5508_v10  ;;  %6351 = vst [vmem:[#allocation36_spill] sm:$0xff] %v5517_v8  ;;  %v5523_v5 = vld [vmem:[#allocation5 + $0x10] sm:$0xff]  ;;  %v5526_v10 = vld [vmem:[#allocation5 + $0x18] sm:$0xff] }
 0x6f6   :  { %2358 = vmatpush.msrb.mxu2 %v5511_v50  ;;  %2378 = vmatpush.msrb.mxu3 %v5514_v13  ;;  %6352 = vst [vmem:[#allocation37_spill] sm:$0xff] %v5520_v37  ;;  %v6355_v50 = vld [vmem:[#allocation23_spill] sm:$0xff] }
 0x6f7   :  { %2319 = vmatpush.msrb.mxu0 %v5517_v8  ;;  %2339 = vmatpush.msrb.mxu1 %v5520_v37  ;;  %6353 = vst [vmem:[#allocation38_spill] sm:$0xff] %v5523_v5  ;;  %v1452_v0 = vadd.f32 %v6355_v50, %v6321_v49  ;;  %v6356_v13 = vld [vmem:[#allocation11_spill] sm:$0xff] }
 0x6f8   :  { %2359 = vmatpush.msrb.mxu2 %v5523_v5  ;;  %6354 = vst [vmem:[#allocation39_spill] sm:$0xff] %v5526_v10  ;;  %2379 = vmatpush.msrb.mxu3 %v5526_v10  ;;  %v1493_v1 = vadd.f32 %v6356_v13, %v6323_v20  ;;  %v1534_v5 = vadd.f32 %v6357_v42, %v6325_v46 }
 0x754   :  { %v2015_v17 = vpop.f32.mrf.mxu0  ;;  %v2035_v8 = vpop.f32.mrf.mxu1 }
 0x755   :  { %v2078_v7 = vadd.f32 %v2015_v17, %v1452_v0  ;;  %v2079_v19 = vadd.f32 %v2035_v8, %v1493_v1 }
 0x757   :  { %v2983_v2 = vmul.f32 -1.442695, %v2078_v7  ;;  %v2984_v37 = vmul.f32 -1.442695, %v2079_v19  ;;  %v6358_v7 = vld [vmem:[#allocation44_spill] sm:$0xff] }
 0x758   :  { %v1575_v19 = vadd.f32 %v6358_v7, %v6327_v28 }
 0x759   :  { %3172 = vpow2.f32 %v2983_v2 }
 0x75a   :  { %3174 = vpow2.f32 %v2984_v37 }
 0x75b   :  { %v2055_v51 = vpop.f32.mrf.mxu2  ;;  %v2075_v13 = vpop.f32.mrf.mxu3 }
 0x75c   :  { %v2080_v11 = vadd.f32 %v2055_v51, %v1534_v5  ;;  %v2081_v0 = vadd.f32 %v2075_v13, %v1575_v19 }
 0x75e   :  { %v2985_v10 = vmul.f32 -1.442695, %v2080_v11 }
 0x75f   :  { %v3173_v4 = vpop.eup %3172 }
 0x760   :  { %v3175_v54 = vpop.eup %3174  ;;  %v2091_v50 = vadd.f32 1.0, %v3173_v4  ;;  %3176 = vpow2.f32 %v2985_v10 }
 0x761   :  { %v2092_v49 = vadd.f32 1.0, %v3175_v54 }
 0x762   :  { %3178 = vrcp.f32 %v2091_v50  ;;  %v2105_v5 = vand.u32 2147483648, %v2091_v50  ;;  %v2103_v10 = vand.u32 2147483647, %v2091_v50  ;;  %vm2099_vm10 = vweird.f32 %v2091_v50 }
 0x763   :  { %3180 = vrcp.f32 %v2092_v49  ;;  %v2120_v4 = vand.u32 2147483648, %v2092_v49  ;;  %v2118_v20 = vand.u32 2147483647, %v2092_v49  ;;  %vm2114_vm11 = vweird.f32 %v2092_v49 }
 0x764   :  { %vm2104_vm14 = vcmp.eq.f32.partialorder %v2103_v10, 8.507059e+37  ;;  %v6365_v10 = vld [vmem:[#allocation16_spill] sm:$0xff] }
 0x765   :  { %vm2119_vm15 = vcmp.eq.f32.partialorder %v2118_v20, 8.507059e+37 }
 0x766   :  { %v3177_v17 = vpop.eup %3176 }
 0x767   :  { %v2093_v2 = vadd.f32 1.0, %v3177_v17  ;;  %v2106_v17 = vor.u32 1.1754944e-38, %v2105_v5 }
 0x768   :  { %v3179_v1 = vpop.eup %3178 }
 0x769   :  { %v3181_v42 = vpop.eup %3180  ;;  %v2095_v8 = vmul.f32 %v3179_v1, %v2091_v50  ;;  %3182 = vrcp.f32 %v2093_v2  ;;  %vm2100_vm8 = vweird.f32 %v3179_v1  ;;  %v2135_v5 = vand.u32 2147483648, %v2093_v2 }
 0x76a   :  { %v2110_v51 = vmul.f32 %v3181_v42, %v2092_v49  ;;  %3184 = vtanh.f32 %v2081_v0  ;;  %vm2115_vm9 = vweird.f32 %v3181_v42  ;;  %vm2101_vm12 = vmor %vm2099_vm10, %vm2100_vm8  ;;  %vm2129_vm1 = vweird.f32 %v2093_v2 }
 0x76b   :  { %v2096_v11 = vsub.f32 1.0, %v2095_v8  ;;  %vm2116_vm13 = vmor %vm2114_vm11, %vm2115_vm9  ;;  %v2121_v8 = vor.u32 1.1754944e-38, %v2120_v4  ;;  %v2136_v4 = vor.u32 1.1754944e-38, %v2135_v5  ;;  %v6377_v5 = vld [vmem:[#allocation26_spill] sm:$0xff] }
 0x76c   :  { %v2111_v37 = vsub.f32 1.0, %v2110_v51 }
 0x76d   :  { %v2097_v54 = vmul.f32 %v3179_v1, %v2096_v11 }
 0x76e   :  { %v2112_v46 = vmul.f32 %v3181_v42, %v2111_v37 }
 0x76f   :  { %v3183_v41 = vpop.eup %3182  ;;  %v2098_v7 = vadd.f32 %v3179_v1, %v2097_v54 }
 0x770   :  { %v2125_v13 = vmul.f32 %v3183_v41, %v2093_v2  ;;  %v2113_v19 = vadd.f32 %v3181_v42, %v2112_v46  ;;  %v3185_v0 = vpop.eup %3184  ;;  %vm2130_vm0 = vweird.f32 %v3183_v41  ;;  %v2133_v46 = vand.u32 2147483647, %v2093_v2  ;;  %v6364_v2 = vld [vmem:[#allocation32_spill] sm:$0xff] }
 0x771   :  { %v2102_v51 = vsel %vm2101_vm12, %v3179_v1, %v2098_v7  ;;  %vm2131_vm2 = vmor %vm2129_vm1, %vm2130_vm0  ;;  %v6366_v7 = vld [vmem:[#allocation31_spill] sm:$0xff] }
 0x772   :  { %v2126_v28 = vsub.f32 1.0, %v2125_v13  ;;  %v2107_v11 = vsel %vm2104_vm14, %v2106_v17, %v2102_v51  ;;  %v2117_v38 = vsel %vm2116_vm13, %v3181_v42, %v2113_v19  ;;  %vm2134_vm3 = vcmp.eq.f32.partialorder %v2133_v46, 8.507059e+37  ;;  %v6367_v13 = vld [vmem:[#allocation19_spill] sm:$0xff]  ;;  %v6368_v17 = vld [vmem:[#allocation20_spill] sm:$0xff]  ;;  %v6369_v19 = vld [vmem:[#allocation17_spill] sm:$0xff] }
 0x773   :  { %v2122_v37 = vsel %vm2119_vm15, %v2121_v8, %v2117_v38  ;;  %v2141_v55 = vmul.f32 %v3185_v0, %v2107_v11  ;;  %v6370_v8 = vld [vmem:[#allocation18_spill] sm:$0xff]  ;;  %v6371_v51 = vld [vmem:[#allocation21_spill] sm:$0xff] }
 0x774   :  { %v2127_v60 = vmul.f32 %v3183_v41, %v2126_v28  ;;  %v2140_v54 = vmul.f32 %v2122_v37, %v5331_v9  ;;  %v6359_v28 = vld [vmem:[#allocation12_spill] sm:$0xff]  ;;  %v6360_v9 = vld [vmem:[#allocation13_spill] sm:$0xff]  ;;  %v6372_v0 = vld [vmem:[#allocation22_spill] sm:$0xff] }
 0x775   :  { %v6373_v11 = vld [vmem:[#allocation33_spill] sm:$0xff]  ;;  %v6374_v37 = vld [vmem:[#allocation24_spill] sm:$0xff]  ;;  %v6378_v46 = vld [vmem:[#allocation34_spill] sm:$0xff] }
 0x776   :  { %v5538_v50 = vadd.f32 %v2141_v55, %v2140_v54  ;;  %v2128_v49 = vadd.f32 %v3183_v41, %v2127_v60  ;;  %v6361_v60 = vld [vmem:[#allocation27_spill] sm:$0xff]  ;;  %v6362_v55 = vld [vmem:[#allocation14_spill] sm:$0xff]  ;;  %v6375_v54 = vld [vmem:[#allocation25_spill] sm:$0xff] }
 0x778   :  { %3186 = vtanh.f32 %v5538_v50  ;;  %v2132_v1 = vsel %vm2131_vm2, %v3183_v41, %v2128_v49  ;;  %v6363_v41 = vld [vmem:[#allocation15_spill] sm:$0xff]  ;;  %v6376_v49 = vld [vmem:[#allocation28_spill] sm:$0xff] }
 0x779   :  { %v2137_v20 = vsel %vm2134_vm3, %v2136_v4, %v2132_v1  ;;  %v6379_v1 = vld [vmem:[#allocation29_spill] sm:$0xff]  ;;  %v6380_v4 = vld [vmem:[#allocation30_spill] sm:$0xff] }
 0x77e   :  { %v3187_v42 = vpop.eup %3186 }
 0x77f   :  { %v2144_v38 = vmul.f32 %v3187_v42, %v2137_v20  ;;  %v6381_v42 = vld [vmem:[#allocation36_spill] sm:$0xff]  ;;  %v6382_v20 = vld [vmem:[#allocation37_spill] sm:$0xff] }
 0x781   :  { %2986 = vst [vmem:[%s5813_s5 + $0x10] sm:$0xff] %v2144_v38  ;;  %2167 = vmatmul.f32.vlgmr.msra.gmra.mxu0 %v2144_v38  ;;  %2187 = vmatmul.f32.vlgmr.msra.gmra.mxu1 %v2144_v38 }
 0x782   :  { %2207 = vmatmul.f32.vlgmr.msra.gmra.mxu2 %v2144_v38  ;;  %2227 = vmatmul.f32.vlgmr.msra.gmra.mxu3 %v2144_v38  ;;  %v6383_v38 = vld [vmem:[#allocation38_spill] sm:$0xff] }
 0x783   :  { %2457 = vmatpush.msra.mxu0 %v5337_v61  ;;  %2477 = vmatpush.msra.mxu1 %v5340_v22 }
 0x784   :  { %2497 = vmatpush.msra.mxu2 %v5343_v24  ;;  %2517 = vmatpush.msra.mxu3 %v5346_v25 }
 0x785   :  { %2458 = vmatpush.msra.mxu0 %v5349_v26  ;;  %2478 = vmatpush.msra.mxu1 %v5352_v27 }
 0x786   :  { %2498 = vmatpush.msra.mxu2 %v5355_v30  ;;  %2518 = vmatpush.msra.mxu3 %v5358_v32 }
 0x787   :  { %2459 = vmatpush.msra.mxu0 %v5361_v33  ;;  %2479 = vmatpush.msra.mxu1 %v5364_v14 }
 0x788   :  { %2499 = vmatpush.msra.mxu2 %v5367_v18  ;;  %2519 = vmatpush.msra.mxu3 %v5370_v31 }
 0x789   :  { %2460 = vmatpush.msra.mxu0 %v5373_v3  ;;  %2480 = vmatpush.msra.mxu1 %v5376_v16 }
 0x78a   :  { %2500 = vmatpush.msra.mxu2 %v5379_v63  ;;  %2520 = vmatpush.msra.mxu3 %v5382_v62 }
 0x78b   :  { %2461 = vmatpush.msra.mxu0 %v5385_v48  ;;  %2481 = vmatpush.msra.mxu1 %v5388_v6 }
 0x78c   :  { %2501 = vmatpush.msra.mxu2 %v5391_v47  ;;  %2521 = vmatpush.msra.mxu3 %v5394_v29 }
 0x78d   :  { %2462 = vmatpush.msra.mxu0 %v5397_v52  ;;  %2482 = vmatpush.msra.mxu1 %v5400_v43 }
 0x78e   :  { %2502 = vmatpush.msra.mxu2 %v5403_v23  ;;  %2522 = vmatpush.msra.mxu3 %v5406_v45 }
 0x78f   :  { %2463 = vmatpush.msra.mxu0 %v5409_v58  ;;  %2483 = vmatpush.msra.mxu1 %v5412_v35 }
 0x790   :  { %2503 = vmatpush.msra.mxu2 %v5415_v39  ;;  %2523 = vmatpush.msra.mxu3 %v5418_v15 }
 0x791   :  { %2464 = vmatpush.msra.mxu0 %v5421_v12  ;;  %2484 = vmatpush.msra.mxu1 %v5424_v34 }
 0x792   :  { %2504 = vmatpush.msra.mxu2 %v5427_v56  ;;  %2524 = vmatpush.msra.mxu3 %v5430_v21 }
 0x793   :  { %2465 = vmatpush.msra.mxu0 %v5433_v36  ;;  %2485 = vmatpush.msra.mxu1 %v5436_v40 }
 0x794   :  { %2505 = vmatpush.msra.mxu2 %v5439_v59  ;;  %2525 = vmatpush.msra.mxu3 %v5442_v53 }
 0x795   :  { %2466 = vmatpush.msra.mxu0 %v5445_v44  ;;  %2486 = vmatpush.msra.mxu1 %v5448_v57 }
 0x796   :  { %2506 = vmatpush.msra.mxu2 %v6359_v28  ;;  %2526 = vmatpush.msra.mxu3 %v6360_v9 }
 0x797   :  { %2467 = vmatpush.msra.mxu0 %v6361_v60  ;;  %2487 = vmatpush.msra.mxu1 %v6362_v55 }
 0x798   :  { %2507 = vmatpush.msra.mxu2 %v6363_v41  ;;  %2527 = vmatpush.msra.mxu3 %v6364_v2 }
 0x799   :  { %2468 = vmatpush.msra.mxu0 %v6365_v10  ;;  %2488 = vmatpush.msra.mxu1 %v6366_v7 }
 0x79a   :  { %2508 = vmatpush.msra.mxu2 %v6367_v13  ;;  %2528 = vmatpush.msra.mxu3 %v6368_v17  ;;  %v6390_v13 = vld [vmem:[#allocation45_spill] sm:$0xff] }
 0x79b   :  { %2469 = vmatpush.msra.mxu0 %v6369_v19  ;;  %2489 = vmatpush.msra.mxu1 %v6370_v8 }
 0x79c   :  { %2509 = vmatpush.msra.mxu2 %v6371_v51  ;;  %2529 = vmatpush.msra.mxu3 %v6372_v0  ;;  %v6388_v51 = vld [vmem:[#allocation43_spill] sm:$0xff] }
 0x79d   :  { %2470 = vmatpush.msra.mxu0 %v6373_v11  ;;  %2490 = vmatpush.msra.mxu1 %v6374_v37  ;;  %v6384_v11 = vld [vmem:[#allocation39_spill] sm:$0xff]  ;;  %v6385_v37 = vld [vmem:[#allocation60_spill] sm:$0xff] }
 0x79e   :  { %2510 = vmatpush.msra.mxu2 %v6375_v54  ;;  %2530 = vmatpush.msra.mxu3 %v6376_v49  ;;  %v6386_v54 = vld [vmem:[#allocation42_spill] sm:$0xff]  ;;  %v6387_v49 = vld [vmem:[#allocation61_spill] sm:$0xff] }
 0x79f   :  { %2471 = vmatpush.msra.mxu0 %v6377_v5  ;;  %2491 = vmatpush.msra.mxu1 %v6378_v46  ;;  %v1455_v0 = vadd.f32 %v6386_v54, %v6385_v37  ;;  %v1496_v5 = vadd.f32 %v6388_v51, %v6387_v49 }
 0x7a0   :  { %2511 = vmatpush.msra.mxu2 %v6379_v1  ;;  %2531 = vmatpush.msra.mxu3 %v6380_v4 }
 0x7a1   :  { %2472 = vmatpush.msra.mxu0 %v6381_v42  ;;  %2492 = vmatpush.msra.mxu1 %v6382_v20  ;;  %v6389_v42 = vld [vmem:[#allocation64_spill] sm:$0xff] }
 0x7a2   :  { %2512 = vmatpush.msra.mxu2 %v6383_v38  ;;  %2532 = vmatpush.msra.mxu3 %v6384_v11  ;;  %v1537_v20 = vadd.f32 %v6390_v13, %v6389_v42 }
 0x7fe   :  { %v2168_v8 = vpop.f32.mrf.mxu0  ;;  %v2188_v46 = vpop.f32.mrf.mxu1 }
 0x7ff   :  { %v2231_v19 = vadd.f32 %v2168_v8, %v1455_v0  ;;  %v2232_v1 = vadd.f32 %v2188_v46, %v1496_v5  ;;  %v6391_v0 = vld [vmem:[#allocation66_spill] sm:$0xff] }
 0x801   :  { %v2987_v17 = vmul.f32 -1.442695, %v2231_v19  ;;  %v2988_v4 = vmul.f32 -1.442695, %v2232_v1  ;;  %v6392_v19 = vld [vmem:[#allocation48_spill] sm:$0xff] }
 0x802   :  { %v1578_v5 = vadd.f32 %v6392_v19, %v6391_v0 }
 0x803   :  { %3188 = vpow2.f32 %v2987_v17 }
 0x804   :  { %3190 = vpow2.f32 %v2988_v4 }
 0x805   :  { %v2208_v38 = vpop.f32.mrf.mxu2  ;;  %v2228_v51 = vpop.f32.mrf.mxu3 }
 0x806   :  { %v2233_v7 = vadd.f32 %v2208_v38, %v1537_v20  ;;  %v2234_v1 = vadd.f32 %v2228_v51, %v1578_v5 }
 0x808   :  { %v2989_v11 = vmul.f32 -1.442695, %v2233_v7 }
 0x809   :  { %v3189_v10 = vpop.eup %3188 }
 0x80a   :  { %v3191_v2 = vpop.eup %3190  ;;  %v2244_v54 = vadd.f32 1.0, %v3189_v10  ;;  %3192 = vpow2.f32 %v2989_v11 }
 0x80b   :  { %v2245_v37 = vadd.f32 1.0, %v3191_v2 }
 0x80c   :  { %3194 = vrcp.f32 %v2244_v54  ;;  %v2258_v42 = vand.u32 2147483648, %v2244_v54  ;;  %v2256_v11 = vand.u32 2147483647, %v2244_v54  ;;  %vm2252_vm6 = vweird.f32 %v2244_v54 }
 0x80d   :  { %3196 = vrcp.f32 %v2245_v37  ;;  %v2273_v10 = vand.u32 2147483648, %v2245_v37  ;;  %v2271_v41 = vand.u32 2147483647, %v2245_v37  ;;  %vm2267_vm7 = vweird.f32 %v2245_v37 }
 0x80e   :  { %vm2257_vm10 = vcmp.eq.f32.partialorder %v2256_v11, 8.507059e+37  ;;  %v6399_v11 = vld [vmem:[#allocation16_spill] sm:$0xff] }
 0x80f   :  { %vm2272_vm11 = vcmp.eq.f32.partialorder %v2271_v41, 8.507059e+37 }
 0x810   :  { %v3193_v8 = vpop.eup %3192 }
 0x811   :  { %v2246_v17 = vadd.f32 1.0, %v3193_v8  ;;  %v2259_v8 = vor.u32 1.1754944e-38, %v2258_v42 }
 0x812   :  { %v3195_v46 = vpop.eup %3194 }
 0x813   :  { %v3197_v13 = vpop.eup %3196  ;;  %v2248_v4 = vmul.f32 %v3195_v46, %v2244_v54  ;;  %3198 = vrcp.f32 %v2246_v17  ;;  %vm2253_vm4 = vweird.f32 %v3195_v46  ;;  %v2288_v42 = vand.u32 2147483648, %v2246_v17 }
 0x814   :  { %v2263_v20 = vmul.f32 %v3197_v13, %v2245_v37  ;;  %3200 = vtanh.f32 %v2234_v1  ;;  %vm2268_vm5 = vweird.f32 %v3197_v13  ;;  %vm2254_vm8 = vmor %vm2252_vm6, %vm2253_vm4  ;;  %vm2282_vm13 = vweird.f32 %v2246_v17 }
 0x815   :  { %v2249_v7 = vsub.f32 1.0, %v2248_v4  ;;  %vm2269_vm9 = vmor %vm2267_vm7, %vm2268_vm5  ;;  %v2274_v4 = vor.u32 1.1754944e-38, %v2273_v10  ;;  %v2289_v10 = vor.u32 1.1754944e-38, %v2288_v42  ;;  %v6411_v42 = vld [vmem:[#allocation26_spill] sm:$0xff] }
 0x816   :  { %v2264_v38 = vsub.f32 1.0, %v2263_v20 }
 0x817   :  { %v2250_v2 = vmul.f32 %v3195_v46, %v2249_v7 }
 0x818   :  { %v2265_v49 = vmul.f32 %v3197_v13, %v2264_v38 }
 0x819   :  { %v3199_v55 = vpop.eup %3198  ;;  %v2251_v19 = vadd.f32 %v3195_v46, %v2250_v2 }
 0x81a   :  { %v2278_v51 = vmul.f32 %v3199_v55, %v2246_v17  ;;  %v2266_v5 = vadd.f32 %v3197_v13, %v2265_v49  ;;  %v3201_v1 = vpop.eup %3200  ;;  %vm2283_vm12 = vweird.f32 %v3199_v55  ;;  %v2286_v49 = vand.u32 2147483647, %v2246_v17  ;;  %v6398_v17 = vld [vmem:[#allocation32_spill] sm:$0xff] }
 0x81b   :  { %v2255_v20 = vsel %vm2254_vm8, %v3195_v46, %v2251_v19  ;;  %vm2284_vm14 = vmor %vm2282_vm13, %vm2283_vm12  ;;  %v6400_v19 = vld [vmem:[#allocation31_spill] sm:$0xff] }
 0x81c   :  { %v2279_v0 = vsub.f32 1.0, %v2278_v51  ;;  %v2260_v7 = vsel %vm2257_vm10, %v2259_v8, %v2255_v20  ;;  %v2270_v60 = vsel %vm2269_vm9, %v3197_v13, %v2266_v5  ;;  %vm2287_vm15 = vcmp.eq.f32.partialorder %v2286_v49, 8.507059e+37  ;;  %v6401_v51 = vld [vmem:[#allocation19_spill] sm:$0xff]  ;;  %v6402_v8 = vld [vmem:[#allocation20_spill] sm:$0xff]  ;;  %v6403_v5 = vld [vmem:[#allocation17_spill] sm:$0xff] }
 0x81d   :  { %v2275_v38 = vsel %vm2272_vm11, %v2274_v4, %v2270_v60  ;;  %v2294_v9 = vmul.f32 %v3201_v1, %v2260_v7  ;;  %v6404_v4 = vld [vmem:[#allocation18_spill] sm:$0xff]  ;;  %v6405_v20 = vld [vmem:[#allocation21_spill] sm:$0xff] }
 0x81e   :  { %v2280_v28 = vmul.f32 %v3199_v55, %v2279_v0  ;;  %v2293_v2 = vmul.f32 %v2275_v38, %v5538_v50  ;;  %v6393_v50 = vld [vmem:[#allocation12_spill] sm:$0xff]  ;;  %v6397_v0 = vld [vmem:[#allocation15_spill] sm:$0xff]  ;;  %v6406_v1 = vld [vmem:[#allocation22_spill] sm:$0xff] }
 0x81f   :  { %v6407_v7 = vld [vmem:[#allocation33_spill] sm:$0xff]  ;;  %v6408_v38 = vld [vmem:[#allocation24_spill] sm:$0xff]  ;;  %v6412_v49 = vld [vmem:[#allocation34_spill] sm:$0xff] }
 0x820   :  { %v5617_v54 = vadd.f32 %v2294_v9, %v2293_v2  ;;  %v2281_v37 = vadd.f32 %v3199_v55, %v2280_v28  ;;  %v6394_v28 = vld [vmem:[#allocation13_spill] sm:$0xff]  ;;  %v6395_v9 = vld [vmem:[#allocation27_spill] sm:$0xff] }
 0x821   :  { %v6409_v2 = vld [vmem:[#allocation25_spill] sm:$0xff] }
 0x822   :  { %3202 = vtanh.f32 %v5617_v54  ;;  %v2285_v46 = vsel %vm2284_vm14, %v3199_v55, %v2281_v37  ;;  %v6396_v55 = vld [vmem:[#allocation14_spill] sm:$0xff]  ;;  %v6410_v37 = vld [vmem:[#allocation28_spill] sm:$0xff] }
 0x823   :  { %v2290_v41 = vsel %vm2287_vm15, %v2289_v10, %v2285_v46  ;;  %v6413_v46 = vld [vmem:[#allocation29_spill] sm:$0xff]  ;;  %v6414_v10 = vld [vmem:[#allocation30_spill] sm:$0xff] }
 0x828   :  { %v3203_v13 = vpop.eup %3202 }
 0x829   :  { %v2297_v60 = vmul.f32 %v3203_v13, %v2290_v41  ;;  %v6415_v13 = vld [vmem:[#allocation36_spill] sm:$0xff]  ;;  %v6416_v41 = vld [vmem:[#allocation37_spill] sm:$0xff] }
 0x82b   :  { %2990 = vst [vmem:[%s5813_s5 + $0x18] sm:$0xff] %v2297_v60  ;;  %2320 = vmatmul.f32.vlgmr.msrb.gmra.mxu0 %v2297_v60  ;;  %2340 = vmatmul.f32.vlgmr.msrb.gmra.mxu1 %v2297_v60 }
 0x82c   :  { %2360 = vmatmul.f32.vlgmr.msrb.gmra.mxu2 %v2297_v60  ;;  %2380 = vmatmul.f32.vlgmr.msrb.gmra.mxu3 %v2297_v60  ;;  %v6417_v60 = vld [vmem:[#allocation38_spill] sm:$0xff] }
 0x82d   :  { %2610 = vmatpush.msrb.mxu0 %v5337_v61  ;;  %2630 = vmatpush.msrb.mxu1 %v5340_v22 }
 0x82e   :  { %2650 = vmatpush.msrb.mxu2 %v5343_v24  ;;  %2670 = vmatpush.msrb.mxu3 %v5346_v25 }
 0x82f   :  { %2611 = vmatpush.msrb.mxu0 %v5349_v26  ;;  %2631 = vmatpush.msrb.mxu1 %v5352_v27 }
 0x830   :  { %2651 = vmatpush.msrb.mxu2 %v5355_v30  ;;  %2671 = vmatpush.msrb.mxu3 %v5358_v32 }
 0x831   :  { %2612 = vmatpush.msrb.mxu0 %v5361_v33  ;;  %2632 = vmatpush.msrb.mxu1 %v5364_v14 }
 0x832   :  { %2652 = vmatpush.msrb.mxu2 %v5367_v18  ;;  %2672 = vmatpush.msrb.mxu3 %v5370_v31 }
 0x833   :  { %2613 = vmatpush.msrb.mxu0 %v5373_v3  ;;  %2633 = vmatpush.msrb.mxu1 %v5376_v16 }
 0x834   :  { %2653 = vmatpush.msrb.mxu2 %v5379_v63  ;;  %2673 = vmatpush.msrb.mxu3 %v5382_v62 }
 0x835   :  { %2614 = vmatpush.msrb.mxu0 %v5385_v48  ;;  %2634 = vmatpush.msrb.mxu1 %v5388_v6 }
 0x836   :  { %2654 = vmatpush.msrb.mxu2 %v5391_v47  ;;  %2674 = vmatpush.msrb.mxu3 %v5394_v29 }
 0x837   :  { %2615 = vmatpush.msrb.mxu0 %v5397_v52  ;;  %2635 = vmatpush.msrb.mxu1 %v5400_v43 }
 0x838   :  { %2655 = vmatpush.msrb.mxu2 %v5403_v23  ;;  %2675 = vmatpush.msrb.mxu3 %v5406_v45 }
 0x839   :  { %2616 = vmatpush.msrb.mxu0 %v5409_v58  ;;  %2636 = vmatpush.msrb.mxu1 %v5412_v35 }
 0x83a   :  { %2656 = vmatpush.msrb.mxu2 %v5415_v39  ;;  %2676 = vmatpush.msrb.mxu3 %v5418_v15 }
 0x83b   :  { %2617 = vmatpush.msrb.mxu0 %v5421_v12  ;;  %2637 = vmatpush.msrb.mxu1 %v5424_v34 }
 0x83c   :  { %2657 = vmatpush.msrb.mxu2 %v5427_v56  ;;  %2677 = vmatpush.msrb.mxu3 %v5430_v21 }
 0x83d   :  { %2618 = vmatpush.msrb.mxu0 %v5433_v36  ;;  %2638 = vmatpush.msrb.mxu1 %v5436_v40 }
 0x83e   :  { %2658 = vmatpush.msrb.mxu2 %v5439_v59  ;;  %2678 = vmatpush.msrb.mxu3 %v5442_v53 }
 0x83f   :  { %2619 = vmatpush.msrb.mxu0 %v5445_v44  ;;  %2639 = vmatpush.msrb.mxu1 %v5448_v57 }
 0x840   :  { %2659 = vmatpush.msrb.mxu2 %v6393_v50  ;;  %2679 = vmatpush.msrb.mxu3 %v6394_v28 }
 0x841   :  { %2620 = vmatpush.msrb.mxu0 %v6395_v9  ;;  %2640 = vmatpush.msrb.mxu1 %v6396_v55 }
 0x842   :  { %2660 = vmatpush.msrb.mxu2 %v6397_v0  ;;  %2680 = vmatpush.msrb.mxu3 %v6398_v17 }
 0x843   :  { %2621 = vmatpush.msrb.mxu0 %v6399_v11  ;;  %2641 = vmatpush.msrb.mxu1 %v6400_v19 }
 0x844   :  { %2661 = vmatpush.msrb.mxu2 %v6401_v51  ;;  %2681 = vmatpush.msrb.mxu3 %v6402_v8  ;;  %v6424_v51 = vld [vmem:[#allocation49_spill] sm:$0xff] }
 0x845   :  { %2622 = vmatpush.msrb.mxu0 %v6403_v5  ;;  %2642 = vmatpush.msrb.mxu1 %v6404_v4 }
 0x846   :  { %2662 = vmatpush.msrb.mxu2 %v6405_v20  ;;  %2682 = vmatpush.msrb.mxu3 %v6406_v1  ;;  %v6422_v20 = vld [vmem:[#allocation47_spill] sm:$0xff] }
 0x847   :  { %2623 = vmatpush.msrb.mxu0 %v6407_v7  ;;  %2643 = vmatpush.msrb.mxu1 %v6408_v38  ;;  %v6418_v7 = vld [vmem:[#allocation39_spill] sm:$0xff]  ;;  %v6419_v38 = vld [vmem:[#allocation60_spill] sm:$0xff] }
 0x848   :  { %2663 = vmatpush.msrb.mxu2 %v6409_v2  ;;  %2683 = vmatpush.msrb.mxu3 %v6410_v37  ;;  %v6420_v2 = vld [vmem:[#allocation46_spill] sm:$0xff]  ;;  %v6421_v37 = vld [vmem:[#allocation61_spill] sm:$0xff] }
 0x849   :  { %2624 = vmatpush.msrb.mxu0 %v6411_v42  ;;  %2644 = vmatpush.msrb.mxu1 %v6412_v49  ;;  %v1458_v1 = vadd.f32 %v6420_v2, %v6419_v38  ;;  %v1499_v42 = vadd.f32 %v6422_v20, %v6421_v37 }
 0x84a   :  { %2664 = vmatpush.msrb.mxu2 %v6413_v46  ;;  %2684 = vmatpush.msrb.mxu3 %v6414_v10 }
 0x84b   :  { %2625 = vmatpush.msrb.mxu0 %v6415_v13  ;;  %2645 = vmatpush.msrb.mxu1 %v6416_v41  ;;  %v6423_v13 = vld [vmem:[#allocation64_spill] sm:$0xff] }
 0x84c   :  { %2665 = vmatpush.msrb.mxu2 %v6417_v60  ;;  %2685 = vmatpush.msrb.mxu3 %v6418_v7  ;;  %v1540_v41 = vadd.f32 %v6424_v51, %v6423_v13 }
 0x8a8   :  { %v2321_v4 = vpop.f32.mrf.mxu0  ;;  %v2341_v49 = vpop.f32.mrf.mxu1 }
 0x8a9   :  { %v2384_v5 = vadd.f32 %v2321_v4, %v1458_v1  ;;  %v2385_v46 = vadd.f32 %v2341_v49, %v1499_v42  ;;  %v6425_v1 = vld [vmem:[#allocation66_spill] sm:$0xff] }
 0x8ab   :  { %v2991_v8 = vmul.f32 -1.442695, %v2384_v5  ;;  %v2992_v10 = vmul.f32 -1.442695, %v2385_v46  ;;  %v6426_v5 = vld [vmem:[#allocation52_spill] sm:$0xff] }
 0x8ac   :  { %v1581_v42 = vadd.f32 %v6426_v5, %v6425_v1 }
 0x8ad   :  { %3204 = vpow2.f32 %v2991_v8 }
 0x8ae   :  { %3206 = vpow2.f32 %v2992_v10 }
 0x8af   :  { %v2361_v60 = vpop.f32.mrf.mxu2  ;;  %v2381_v20 = vpop.f32.mrf.mxu3 }
 0x8b0   :  { %v2386_v19 = vadd.f32 %v2361_v60, %v1540_v41  ;;  %v2387_v46 = vadd.f32 %v2381_v20, %v1581_v42 }
 0x8b2   :  { %v2993_v7 = vmul.f32 -1.442695, %v2386_v19 }
 0x8b3   :  { %v3205_v11 = vpop.eup %3204 }
 0x8b4   :  { %v3207_v17 = vpop.eup %3206  ;;  %v2397_v2 = vadd.f32 1.0, %v3205_v11  ;;  %3208 = vpow2.f32 %v2993_v7 }
 0x8b5   :  { %v2398_v38 = vadd.f32 1.0, %v3207_v17 }
 0x8b6   :  { %3210 = vrcp.f32 %v2397_v2  ;;  %v2411_v13 = vand.u32 2147483648, %v2397_v2  ;;  %v2409_v7 = vand.u32 2147483647, %v2397_v2  ;;  %vm2405_vm2 = vweird.f32 %v2397_v2 }
 0x8b7   :  { %3212 = vrcp.f32 %v2398_v38  ;;  %v2426_v11 = vand.u32 2147483648, %v2398_v38  ;;  %v2424_v0 = vand.u32 2147483647, %v2398_v38  ;;  %vm2420_vm3 = vweird.f32 %v2398_v38 }
 0x8b8   :  { %vm2410_vm6 = vcmp.eq.f32.partialorder %v2409_v7, 8.507059e+37 }
 0x8b9   :  { %vm2425_vm7 = vcmp.eq.f32.partialorder %v2424_v0, 8.507059e+37 }
 0x8ba   :  { %v3209_v4 = vpop.eup %3208 }
 0x8bb   :  { %v2399_v8 = vadd.f32 1.0, %v3209_v4  ;;  %v2412_v4 = vor.u32 1.1754944e-38, %v2411_v13 }
 0x8bc   :  { %v3211_v49 = vpop.eup %3210 }
 0x8bd   :  { %v3213_v51 = vpop.eup %3212  ;;  %v2401_v10 = vmul.f32 %v3211_v49, %v2397_v2  ;;  %3214 = vrcp.f32 %v2399_v8  ;;  %vm2406_vm0 = vweird.f32 %v3211_v49  ;;  %v2441_v13 = vand.u32 2147483648, %v2399_v8 }
 0x8be   :  { %v2416_v41 = vmul.f32 %v3213_v51, %v2398_v38  ;;  %3216 = vtanh.f32 %v2387_v46  ;;  %vm2421_vm1 = vweird.f32 %v3213_v51  ;;  %vm2407_vm4 = vmor %vm2405_vm2, %vm2406_vm0  ;;  %vm2435_vm9 = vweird.f32 %v2399_v8 }
 0x8bf   :  { %v2402_v19 = vsub.f32 1.0, %v2401_v10  ;;  %vm2422_vm5 = vmor %vm2420_vm3, %vm2421_vm1  ;;  %v2427_v10 = vor.u32 1.1754944e-38, %v2426_v11  ;;  %v2442_v11 = vor.u32 1.1754944e-38, %v2441_v13 }
 0x8c0   :  { %v2417_v60 = vsub.f32 1.0, %v2416_v41 }
 0x8c1   :  { %v2403_v17 = vmul.f32 %v3211_v49, %v2402_v19 }
 0x8c2   :  { %v2418_v37 = vmul.f32 %v3213_v51, %v2417_v60 }
 0x8c3   :  { %v3215_v55 = vpop.eup %3214  ;;  %v2404_v5 = vadd.f32 %v3211_v49, %v2403_v17 }
 0x8c4   :  { %v2431_v20 = vmul.f32 %v3215_v55, %v2399_v8  ;;  %v2419_v42 = vadd.f32 %v3213_v51, %v2418_v37  ;;  %v3217_v46 = vpop.eup %3216  ;;  %vm2436_vm8 = vweird.f32 %v3215_v55  ;;  %v2439_v37 = vand.u32 2147483647, %v2399_v8 }
 0x8c5   :  { %v2408_v41 = vsel %vm2407_vm4, %v3211_v49, %v2404_v5  ;;  %vm2437_vm10 = vmor %vm2435_vm9, %vm2436_vm8 }
 0x8c6   :  { %v2432_v1 = vsub.f32 1.0, %v2431_v20  ;;  %v2413_v19 = vsel %vm2410_vm6, %v2412_v4, %v2408_v41  ;;  %v2423_v9 = vsel %vm2422_vm5, %v3213_v51, %v2419_v42  ;;  %vm2440_vm11 = vcmp.eq.f32.partialorder %v2439_v37, 8.507059e+37  ;;  %v6459_v41 = vld [vmem:[#allocation66_spill] sm:$0xff] }
 0x8c7   :  { %v2428_v60 = vsel %vm2425_vm7, %v2427_v10, %v2423_v9  ;;  %v2447_v28 = vmul.f32 %v3217_v46, %v2413_v19  ;;  %v6460_v46 = vld [vmem:[#allocation56_spill] sm:$0xff] }
 0x8c8   :  { %v2433_v50 = vmul.f32 %v3215_v55, %v2432_v1  ;;  %v2446_v17 = vmul.f32 %v2428_v60, %v5617_v54  ;;  %v6457_v54 = vld [vmem:[#allocation64_spill] sm:$0xff]  ;;  %v1584_v19 = vadd.f32 %v6460_v46, %v6459_v41 }
 0x8ca   :  { %v5696_v2 = vadd.f32 %v2447_v28, %v2446_v17  ;;  %v2434_v38 = vadd.f32 %v3215_v55, %v2433_v50  ;;  %v6458_v50 = vld [vmem:[#allocation53_spill] sm:$0xff] }
 0x8cb   :  { %v1543_v28 = vadd.f32 %v6458_v50, %v6457_v54 }
 0x8cc   :  { %3218 = vtanh.f32 %v5696_v2  ;;  %v2438_v49 = vsel %vm2437_vm10, %v3215_v55, %v2434_v38 }
 0x8cd   :  { %v2443_v0 = vsel %vm2440_vm11, %v2442_v11, %v2438_v49 }
 0x8d2   :  { %v3219_v51 = vpop.eup %3218 }
 0x8d3   :  { %v2450_v9 = vmul.f32 %v3219_v51, %v2443_v0 }
 0x8d5   :  { %2994 = vst [vmem:[%s5813_s5 + $0x20] sm:$0xff] %v2450_v9  ;;  %2473 = vmatmul.f32.vlgmr.msra.gmra.mxu0 %v2450_v9  ;;  %2493 = vmatmul.f32.vlgmr.msra.gmra.mxu1 %v2450_v9 }
 0x8d6   :  { %2513 = vmatmul.f32.vlgmr.msra.gmra.mxu2 %v2450_v9  ;;  %2533 = vmatmul.f32.vlgmr.msra.gmra.mxu3 %v2450_v9 }
 0x8d7   :  { %2763 = vmatpush.msra.mxu0 %v5337_v61  ;;  %2783 = vmatpush.msra.mxu1 %v5340_v22  ;;  %v6427_v61 = vld [vmem:[#allocation12_spill] sm:$0xff]  ;;  %v6428_v22 = vld [vmem:[#allocation13_spill] sm:$0xff] }
 0x8d8   :  { %2803 = vmatpush.msra.mxu2 %v5343_v24  ;;  %2823 = vmatpush.msra.mxu3 %v5346_v25  ;;  %v6429_v24 = vld [vmem:[#allocation27_spill] sm:$0xff]  ;;  %v6430_v25 = vld [vmem:[#allocation14_spill] sm:$0xff] }
 0x8d9   :  { %2764 = vmatpush.msra.mxu0 %v5349_v26  ;;  %2784 = vmatpush.msra.mxu1 %v5352_v27  ;;  %v6431_v26 = vld [vmem:[#allocation15_spill] sm:$0xff]  ;;  %v6432_v27 = vld [vmem:[#allocation32_spill] sm:$0xff] }
 0x8da   :  { %2804 = vmatpush.msra.mxu2 %v5355_v30  ;;  %2824 = vmatpush.msra.mxu3 %v5358_v32  ;;  %v6433_v30 = vld [vmem:[#allocation16_spill] sm:$0xff]  ;;  %v6434_v32 = vld [vmem:[#allocation31_spill] sm:$0xff] }
 0x8db   :  { %2765 = vmatpush.msra.mxu0 %v5361_v33  ;;  %2785 = vmatpush.msra.mxu1 %v5364_v14  ;;  %v6435_v33 = vld [vmem:[#allocation19_spill] sm:$0xff]  ;;  %v6436_v14 = vld [vmem:[#allocation20_spill] sm:$0xff] }
 0x8dc   :  { %2805 = vmatpush.msra.mxu2 %v5367_v18  ;;  %2825 = vmatpush.msra.mxu3 %v5370_v31  ;;  %v6437_v18 = vld [vmem:[#allocation17_spill] sm:$0xff]  ;;  %v6438_v31 = vld [vmem:[#allocation18_spill] sm:$0xff] }
 0x8dd   :  { %2766 = vmatpush.msra.mxu0 %v5373_v3  ;;  %2786 = vmatpush.msra.mxu1 %v5376_v16  ;;  %v6439_v3 = vld [vmem:[#allocation21_spill] sm:$0xff]  ;;  %v6440_v16 = vld [vmem:[#allocation22_spill] sm:$0xff] }
 0x8de   :  { %2806 = vmatpush.msra.mxu2 %v5379_v63  ;;  %2826 = vmatpush.msra.mxu3 %v5382_v62  ;;  %v6441_v63 = vld [vmem:[#allocation33_spill] sm:$0xff]  ;;  %v6442_v62 = vld [vmem:[#allocation24_spill] sm:$0xff] }
 0x8df   :  { %2767 = vmatpush.msra.mxu0 %v5385_v48  ;;  %2787 = vmatpush.msra.mxu1 %v5388_v6  ;;  %v6443_v48 = vld [vmem:[#allocation25_spill] sm:$0xff]  ;;  %v6444_v6 = vld [vmem:[#allocation28_spill] sm:$0xff] }
 0x8e0   :  { %2807 = vmatpush.msra.mxu2 %v5391_v47  ;;  %2827 = vmatpush.msra.mxu3 %v5394_v29  ;;  %v6445_v47 = vld [vmem:[#allocation26_spill] sm:$0xff] }
 0x8e1   :  { %2768 = vmatpush.msra.mxu0 %v5397_v52  ;;  %2788 = vmatpush.msra.mxu1 %v5400_v43  ;;  %v6446_v29 = vld [vmem:[#allocation34_spill] sm:$0xff]  ;;  %v6447_v52 = vld [vmem:[#allocation29_spill] sm:$0xff] }
 0x8e2   :  { %2808 = vmatpush.msra.mxu2 %v5403_v23  ;;  %2828 = vmatpush.msra.mxu3 %v5406_v45  ;;  %v6448_v43 = vld [vmem:[#allocation30_spill] sm:$0xff]  ;;  %v6449_v23 = vld [vmem:[#allocation36_spill] sm:$0xff]  ;;  %v6450_v45 = vld [vmem:[#allocation37_spill] sm:$0xff] }
 0x8e3   :  { %2769 = vmatpush.msra.mxu0 %v5409_v58  ;;  %2789 = vmatpush.msra.mxu1 %v5412_v35  ;;  %v6451_v58 = vld [vmem:[#allocation38_spill] sm:$0xff]  ;;  %v6452_v35 = vld [vmem:[#allocation39_spill] sm:$0xff] }
 0x8e4   :  { %2809 = vmatpush.msra.mxu2 %v5415_v39  ;;  %2829 = vmatpush.msra.mxu3 %v5418_v15  ;;  %v6453_v39 = vld [vmem:[#allocation60_spill] sm:$0xff]  ;;  %v6454_v15 = vld [vmem:[#allocation50_spill] sm:$0xff] }
 0x8e5   :  { %2770 = vmatpush.msra.mxu0 %v5421_v12  ;;  %2790 = vmatpush.msra.mxu1 %v5424_v34  ;;  %v1461_v12 = vadd.f32 %v6454_v15, %v6453_v39  ;;  %v6455_v34 = vld [vmem:[#allocation61_spill] sm:$0xff] }
 0x8e6   :  { %2810 = vmatpush.msra.mxu2 %v5427_v56  ;;  %2830 = vmatpush.msra.mxu3 %v5430_v21  ;;  %v6456_v56 = vld [vmem:[#allocation51_spill] sm:$0xff] }
 0x8e7   :  { %2771 = vmatpush.msra.mxu0 %v5433_v36  ;;  %2791 = vmatpush.msra.mxu1 %v5436_v40  ;;  %v1502_v21 = vadd.f32 %v6456_v56, %v6455_v34 }
 0x8e8   :  { %2811 = vmatpush.msra.mxu2 %v5439_v59  ;;  %2831 = vmatpush.msra.mxu3 %v5442_v53 }
 0x8e9   :  { %2772 = vmatpush.msra.mxu0 %v5445_v44  ;;  %2792 = vmatpush.msra.mxu1 %v5448_v57 }
 0x8ea   :  { %2812 = vmatpush.msra.mxu2 %v6427_v61  ;;  %2832 = vmatpush.msra.mxu3 %v6428_v22 }
 0x8eb   :  { %2773 = vmatpush.msra.mxu0 %v6429_v24  ;;  %2793 = vmatpush.msra.mxu1 %v6430_v25 }
 0x8ec   :  { %2813 = vmatpush.msra.mxu2 %v6431_v26  ;;  %2833 = vmatpush.msra.mxu3 %v6432_v27 }
 0x8ed   :  { %2774 = vmatpush.msra.mxu0 %v6433_v30  ;;  %2794 = vmatpush.msra.mxu1 %v6434_v32 }
 0x8ee   :  { %2814 = vmatpush.msra.mxu2 %v6435_v33  ;;  %2834 = vmatpush.msra.mxu3 %v6436_v14 }
 0x8ef   :  { %2775 = vmatpush.msra.mxu0 %v6437_v18  ;;  %2795 = vmatpush.msra.mxu1 %v6438_v31 }
 0x8f0   :  { %2815 = vmatpush.msra.mxu2 %v6439_v3  ;;  %2835 = vmatpush.msra.mxu3 %v6440_v16 }
 0x8f1   :  { %2776 = vmatpush.msra.mxu0 %v6441_v63  ;;  %2796 = vmatpush.msra.mxu1 %v6442_v62 }
 0x8f2   :  { %2816 = vmatpush.msra.mxu2 %v6443_v48  ;;  %2836 = vmatpush.msra.mxu3 %v6444_v6 }
 0x8f3   :  { %2777 = vmatpush.msra.mxu0 %v6445_v47  ;;  %2797 = vmatpush.msra.mxu1 %v6446_v29 }
 0x8f4   :  { %2817 = vmatpush.msra.mxu2 %v6447_v52  ;;  %2837 = vmatpush.msra.mxu3 %v6448_v43 }
 0x8f5   :  { %2778 = vmatpush.msra.mxu0 %v6449_v23  ;;  %2798 = vmatpush.msra.mxu1 %v6450_v45 }
 0x8f6   :  { %2818 = vmatpush.msra.mxu2 %v6451_v58  ;;  %2838 = vmatpush.msra.mxu3 %v6452_v35 }
 0x952   :  { %v2474_v36 = vpop.f32.mrf.mxu0  ;;  %v2494_v40 = vpop.f32.mrf.mxu1 }
 0x953   :  { %v2537_v59 = vadd.f32 %v2474_v36, %v1461_v12  ;;  %v2538_v53 = vadd.f32 %v2494_v40, %v1502_v21  ;;  %v6462_v21 = vld [vmem:[#allocation55_spill] sm:$0xff] }
 0x954   :  { %v1505_v36 = vadd.f32 %v6462_v21, %v6455_v34 }
 0x955   :  { %v2995_v44 = vmul.f32 -1.442695, %v2537_v59  ;;  %v2996_v57 = vmul.f32 -1.442695, %v2538_v53 }
 0x957   :  { %3220 = vpow2.f32 %v2995_v44 }
 0x958   :  { %3222 = vpow2.f32 %v2996_v57 }
 0x959   :  { %v2514_v55 = vpop.f32.mrf.mxu2  ;;  %v2534_v42 = vpop.f32.mrf.mxu3 }
 0x95a   :  { %v2539_v1 = vadd.f32 %v2514_v55, %v1543_v28  ;;  %v2540_v38 = vadd.f32 %v2534_v42, %v1584_v19  ;;  %v6463_v28 = vld [vmem:[#allocation57_spill] sm:$0xff]  ;;  %v6464_v19 = vld [vmem:[#allocation62_spill] sm:$0xff] }
 0x95b   :  { %v1546_v55 = vadd.f32 %v6463_v28, %v6457_v54 }
 0x95c   :  { %v2997_v8 = vmul.f32 -1.442695, %v2539_v1 }
 0x95d   :  { %v3221_v7 = vpop.eup %3220 }
 0x95e   :  { %v3223_v5 = vpop.eup %3222  ;;  %v2550_v20 = vadd.f32 1.0, %v3221_v7  ;;  %3224 = vpow2.f32 %v2997_v8 }
 0x95f   :  { %v2551_v4 = vadd.f32 1.0, %v3223_v5 }
 0x960   :  { %3226 = vrcp.f32 %v2550_v20  ;;  %v2564_v0 = vand.u32 2147483648, %v2550_v20  ;;  %v2562_v22 = vand.u32 2147483647, %v2550_v20  ;;  %vm2558_vm14 = vweird.f32 %v2550_v20 }
 0x961   :  { %3228 = vrcp.f32 %v2551_v4  ;;  %v2579_v9 = vand.u32 2147483648, %v2551_v4  ;;  %v2577_v25 = vand.u32 2147483647, %v2551_v4  ;;  %vm2573_vm15 = vweird.f32 %v2551_v4 }
 0x962   :  { %v2565_v32 = vor.u32 1.1754944e-38, %v2564_v0  ;;  %vm2563_vm2 = vcmp.eq.f32.partialorder %v2562_v22, 8.507059e+37 }
 0x963   :  { %v2580_v14 = vor.u32 1.1754944e-38, %v2579_v9  ;;  %vm2578_vm3 = vcmp.eq.f32.partialorder %v2577_v25, 8.507059e+37 }
 0x964   :  { %v3225_v10 = vpop.eup %3224 }
 0x965   :  { %v2552_v60 = vadd.f32 1.0, %v3225_v10 }
 0x966   :  { %v3227_v17 = vpop.eup %3226 }
 0x967   :  { %v3229_v13 = vpop.eup %3228  ;;  %v2554_v37 = vmul.f32 %v3227_v17, %v2550_v20  ;;  %3230 = vrcp.f32 %v2552_v60  ;;  %vm2559_vm12 = vweird.f32 %v3227_v17  ;;  %v2594_v43 = vand.u32 2147483648, %v2552_v60 }
 0x968   :  { %v2569_v49 = vmul.f32 %v3229_v13, %v2551_v4  ;;  %3232 = vtanh.f32 %v2540_v38  ;;  %vm2574_vm13 = vweird.f32 %v3229_v13  ;;  %vm2560_vm0 = vmor %vm2558_vm14, %vm2559_vm12  ;;  %vm2588_vm5 = vweird.f32 %v2552_v60 }
 0x969   :  { %v2555_v11 = vsub.f32 1.0, %v2554_v37  ;;  %vm2575_vm1 = vmor %vm2573_vm15, %vm2574_vm13  ;;  %v2592_v23 = vand.u32 2147483647, %v2552_v60  ;;  %v2595_v58 = vor.u32 1.1754944e-38, %v2594_v43 }
 0x96a   :  { %v2570_v51 = vsub.f32 1.0, %v2569_v49 }
 0x96b   :  { %v2556_v61 = vmul.f32 %v3227_v17, %v2555_v11  ;;  %vm2593_vm7 = vcmp.eq.f32.partialorder %v2592_v23, 8.507059e+37 }
 0x96c   :  { %v2571_v24 = vmul.f32 %v3229_v13, %v2570_v51 }
 0x96d   :  { %v3231_v26 = vpop.eup %3230  ;;  %v2557_v27 = vadd.f32 %v3227_v17, %v2556_v61 }
 0x96e   :  { %v2584_v30 = vmul.f32 %v3231_v26, %v2552_v60  ;;  %v2572_v33 = vadd.f32 %v3229_v13, %v2571_v24  ;;  %v3233_v31 = vpop.eup %3232  ;;  %vm2589_vm4 = vweird.f32 %v3231_v26  ;;  %v1587_v60 = vadd.f32 %v6464_v19, %v6459_v41 }
 0x96f   :  { %v2561_v18 = vsel %vm2560_vm0, %v3227_v17, %v2557_v27  ;;  %vm2590_vm6 = vmor %vm2588_vm5, %vm2589_vm4 }
 0x970   :  { %v2585_v3 = vsub.f32 1.0, %v2584_v30  ;;  %v2566_v16 = vsel %vm2563_vm2, %v2565_v32, %v2561_v18  ;;  %v2576_v63 = vsel %vm2575_vm1, %v3229_v13, %v2572_v33 }
 0x971   :  { %v2581_v62 = vsel %vm2578_vm3, %v2580_v14, %v2576_v63  ;;  %v2600_v48 = vmul.f32 %v3233_v31, %v2566_v16 }
 0x972   :  { %v2586_v6 = vmul.f32 %v3231_v26, %v2585_v3  ;;  %v2599_v47 = vmul.f32 %v2581_v62, %v5696_v2  ;;  %v6461_v2 = vld [vmem:[#allocation54_spill] sm:$0xff] }
 0x973   :  { %v1464_v56 = vadd.f32 %v6461_v2, %v6453_v39 }
 0x974   :  { %v5775_v29 = vadd.f32 %v2600_v48, %v2599_v47  ;;  %v2587_v52 = vadd.f32 %v3231_v26, %v2586_v6 }
 0x976   :  { %3234 = vtanh.f32 %v5775_v29  ;;  %v2591_v45 = vsel %vm2590_vm6, %v3231_v26, %v2587_v52 }
 0x977   :  { %v2596_v15 = vsel %vm2593_vm7, %v2595_v58, %v2591_v45 }
 0x97c   :  { %v3235_v35 = vpop.eup %3234 }
 0x97d   :  { %v2603_v12 = vmul.f32 %v3235_v35, %v2596_v15 }
 0x97f   :  { %2998 = vst [vmem:[%s5813_s5 + $0x28] sm:$0xff] %v2603_v12  ;;  %2626 = vmatmul.f32.vlgmr.msrb.gmra.mxu0 %v2603_v12  ;;  %2646 = vmatmul.f32.vlgmr.msrb.gmra.mxu1 %v2603_v12 }
 0x980   :  { %2666 = vmatmul.f32.vlgmr.msrb.gmra.mxu2 %v2603_v12  ;;  %2686 = vmatmul.f32.vlgmr.msrb.gmra.mxu3 %v2603_v12 }
 0x9fc   :  { %v2627_v40 = vpop.f32.mrf.mxu0  ;;  %v2647_v59 = vpop.f32.mrf.mxu1 }
 0x9fd   :  { %v2690_v53 = vadd.f32 %v2627_v40, %v1464_v56  ;;  %v2691_v44 = vadd.f32 %v2647_v59, %v1505_v36  ;;  %v6466_v36 = vld [vmem:[#allocation59_spill] sm:$0xff] }
 0x9fe   :  { %v1508_v40 = vadd.f32 %v6466_v36, %v6455_v34 }
 0x9ff   :  { %v2999_v57 = vmul.f32 -1.442695, %v2690_v53  ;;  %v3000_v50 = vmul.f32 -1.442695, %v2691_v44 }
 0xa01   :  { %3236 = vpow2.f32 %v2999_v57 }
 0xa02   :  { %3238 = vpow2.f32 %v3000_v50 }
 0xa03   :  { %v2667_v1 = vpop.f32.mrf.mxu2  ;;  %v2687_v10 = vpop.f32.mrf.mxu3 }
 0xa04   :  { %v2692_v8 = vadd.f32 %v2667_v1, %v1546_v55  ;;  %v2693_v13 = vadd.f32 %v2687_v10, %v1587_v60  ;;  %v6467_v55 = vld [vmem:[#allocation63_spill] sm:$0xff] }
 0xa05   :  { %v1549_v1 = vadd.f32 %v6467_v55, %v6457_v54 }
 0xa06   :  { %v3001_v7 = vmul.f32 -1.442695, %v2692_v8 }
 0xa07   :  { %v3237_v5 = vpop.eup %3236 }
 0xa08   :  { %v3239_v20 = vpop.eup %3238  ;;  %v2703_v4 = vadd.f32 1.0, %v3237_v5  ;;  %3240 = vpow2.f32 %v3001_v7 }
 0xa09   :  { %v2704_v42 = vadd.f32 1.0, %v3239_v20 }
 0xa0a   :  { %3242 = vrcp.f32 %v2703_v4  ;;  %v2717_v9 = vand.u32 2147483648, %v2703_v4  ;;  %v2715_v24 = vand.u32 2147483647, %v2703_v4  ;;  %vm2711_vm10 = vweird.f32 %v2703_v4 }
 0xa0b   :  { %3244 = vrcp.f32 %v2704_v42  ;;  %v2732_v61 = vand.u32 2147483648, %v2704_v42  ;;  %v2730_v26 = vand.u32 2147483647, %v2704_v42  ;;  %vm2726_vm11 = vweird.f32 %v2704_v42 }
 0xa0c   :  { %v2718_v33 = vor.u32 1.1754944e-38, %v2717_v9  ;;  %vm2716_vm14 = vcmp.eq.f32.partialorder %v2715_v24, 8.507059e+37 }
 0xa0d   :  { %v2733_v18 = vor.u32 1.1754944e-38, %v2732_v61  ;;  %vm2731_vm15 = vcmp.eq.f32.partialorder %v2730_v26, 8.507059e+37 }
 0xa0e   :  { %v3241_v46 = vpop.eup %3240 }
 0xa0f   :  { %v2705_v17 = vadd.f32 1.0, %v3241_v46  ;;  %v6468_v46 = vld [vmem:[#allocation65_spill] sm:$0xff] }
 0xa10   :  { %v3243_v38 = vpop.eup %3242  ;;  %v1590_v19 = vadd.f32 %v6468_v46, %v6459_v41 }
 0xa11   :  { %v3245_v37 = vpop.eup %3244  ;;  %v2707_v49 = vmul.f32 %v3243_v38, %v2703_v4  ;;  %3246 = vrcp.f32 %v2705_v17  ;;  %vm2712_vm8 = vweird.f32 %v3243_v38  ;;  %v2747_v45 = vand.u32 2147483648, %v2705_v17 }
 0xa12   :  { %v2722_v11 = vmul.f32 %v3245_v37, %v2704_v42  ;;  %3248 = vtanh.f32 %v2693_v13  ;;  %vm2727_vm9 = vweird.f32 %v3245_v37  ;;  %vm2713_vm12 = vmor %vm2711_vm10, %vm2712_vm8  ;;  %vm2741_vm1 = vweird.f32 %v2705_v17 }
 0xa13   :  { %v2708_v51 = vsub.f32 1.0, %v2707_v49  ;;  %vm2728_vm13 = vmor %vm2726_vm11, %vm2727_vm9  ;;  %v2745_v58 = vand.u32 2147483647, %v2705_v17  ;;  %v2748_v15 = vor.u32 1.1754944e-38, %v2747_v45 }
 0xa14   :  { %v2723_v0 = vsub.f32 1.0, %v2722_v11 }
 0xa15   :  { %v2709_v22 = vmul.f32 %v3243_v38, %v2708_v51  ;;  %vm2746_vm3 = vcmp.eq.f32.partialorder %v2745_v58, 8.507059e+37 }
 0xa16   :  { %v2724_v25 = vmul.f32 %v3245_v37, %v2723_v0 }
 0xa17   :  { %v3247_v27 = vpop.eup %3246  ;;  %v2710_v30 = vadd.f32 %v3243_v38, %v2709_v22 }
 0xa18   :  { %v2737_v32 = vmul.f32 %v3247_v27, %v2705_v17  ;;  %v2725_v14 = vadd.f32 %v3245_v37, %v2724_v25  ;;  %v3249_v3 = vpop.eup %3248  ;;  %vm2742_vm0 = vweird.f32 %v3247_v27 }
 0xa19   :  { %v2714_v31 = vsel %vm2713_vm12, %v3243_v38, %v2710_v30  ;;  %vm2743_vm2 = vmor %vm2741_vm1, %vm2742_vm0 }
 0xa1a   :  { %v2738_v16 = vsub.f32 1.0, %v2737_v32  ;;  %v2719_v63 = vsel %vm2716_vm14, %v2718_v33, %v2714_v31  ;;  %v2729_v62 = vsel %vm2728_vm13, %v3245_v37, %v2725_v14 }
 0xa1b   :  { %v2734_v48 = vsel %vm2731_vm15, %v2733_v18, %v2729_v62  ;;  %v2753_v6 = vmul.f32 %v3249_v3, %v2719_v63 }
 0xa1c   :  { %v2739_v47 = vmul.f32 %v3247_v27, %v2738_v16  ;;  %v2752_v52 = vmul.f32 %v2734_v48, %v5775_v29  ;;  %v6465_v29 = vld [vmem:[#allocation58_spill] sm:$0xff] }
 0xa1d   :  { %v1467_v21 = vadd.f32 %v6465_v29, %v6453_v39 }
 0xa1e   :  { %v5790_v43 = vadd.f32 %v2753_v6, %v2752_v52  ;;  %v2740_v23 = vadd.f32 %v3247_v27, %v2739_v47 }
 0xa20   :  { %3250 = vtanh.f32 %v5790_v43  ;;  %v2744_v35 = vsel %vm2743_vm2, %v3247_v27, %v2740_v23 }
 0xa21   :  { %v2749_v2 = vsel %vm2746_vm3, %v2748_v15, %v2744_v35 }
 0xa26   :  { %v3251_v12 = vpop.eup %3250 }
 0xa27   :  { %v2756_v56 = vmul.f32 %v3251_v12, %v2749_v2 }
 0xa29   :  { %3002 = vst [vmem:[%s5813_s5 + $0x30] sm:$0xff] %v2756_v56  ;;  %2779 = vmatmul.f32.vlgmr.msra.gmra.mxu0 %v2756_v56  ;;  %2799 = vmatmul.f32.vlgmr.msra.gmra.mxu1 %v2756_v56 }
 0xa2a   :  { %2819 = vmatmul.f32.vlgmr.msra.gmra.mxu2 %v2756_v56  ;;  %2839 = vmatmul.f32.vlgmr.msra.gmra.mxu3 %v2756_v56 }
 0xaa6   :  { %v2780_v59 = vpop.f32.mrf.mxu0  ;;  %v2800_v53 = vpop.f32.mrf.mxu1 }
 0xaa7   :  { %v2843_v44 = vadd.f32 %v2780_v59, %v1467_v21  ;;  %v2844_v57 = vadd.f32 %v2800_v53, %v1508_v40 }
 0xaa9   :  { %v3003_v50 = vmul.f32 -1.442695, %v2843_v44  ;;  %v3004_v28 = vmul.f32 -1.442695, %v2844_v57 }
 0xaab   :  { %3252 = vpow2.f32 %v3003_v50 }
 0xaac   :  { %3254 = vpow2.f32 %v3004_v28 }
 0xaad   :  { %v2820_v8 = vpop.f32.mrf.mxu2  ;;  %v2840_v34 = vpop.f32.mrf.mxu3 }
 0xaae   :  { %v2845_v7 = vadd.f32 %v2820_v8, %v1549_v1  ;;  %v2846_v38 = vadd.f32 %v2840_v34, %v1590_v19 }
 0xab0   :  { %v3005_v5 = vmul.f32 -1.442695, %v2845_v7 }
 0xab1   :  { %v3253_v20 = vpop.eup %3252 }
 0xab2   :  { %v3255_v4 = vpop.eup %3254  ;;  %v2856_v39 = vadd.f32 1.0, %v3253_v20  ;;  %3256 = vpow2.f32 %v3005_v5 }
 0xab3   :  { %v2857_v42 = vadd.f32 1.0, %v3255_v4 }
 0xab4   :  { %3258 = vrcp.f32 %v2856_v39  ;;  %v2870_v51 = vand.u32 2147483648, %v2856_v39  ;;  %v2868_v61 = vand.u32 2147483647, %v2856_v39  ;;  %vm2864_vm6 = vweird.f32 %v2856_v39 }
 0xab5   :  { %3260 = vrcp.f32 %v2857_v42  ;;  %v2885_v0 = vand.u32 2147483648, %v2857_v42  ;;  %v2883_v24 = vand.u32 2147483647, %v2857_v42  ;;  %vm2879_vm7 = vweird.f32 %v2857_v42 }
 0xab6   :  { %v2871_v27 = vor.u32 1.1754944e-38, %v2870_v51  ;;  %vm2869_vm10 = vcmp.eq.f32.partialorder %v2868_v61, 8.507059e+37 }
 0xab7   :  { %v2886_v32 = vor.u32 1.1754944e-38, %v2885_v0  ;;  %vm2884_vm11 = vcmp.eq.f32.partialorder %v2883_v24, 8.507059e+37 }
 0xab8   :  { %v3257_v10 = vpop.eup %3256 }
 0xab9   :  { %v2858_v60 = vadd.f32 1.0, %v3257_v10 }
 0xaba   :  { %v3259_v17 = vpop.eup %3258 }
 0xabb   :  { %v3261_v54 = vpop.eup %3260  ;;  %v2860_v13 = vmul.f32 %v3259_v17, %v2856_v39  ;;  %3262 = vrcp.f32 %v2858_v60  ;;  %vm2865_vm4 = vweird.f32 %v3259_v17  ;;  %v2900_v52 = vand.u32 2147483648, %v2858_v60 }
 0xabc   :  { %v2875_v37 = vmul.f32 %v3261_v54, %v2857_v42  ;;  %3264 = vtanh.f32 %v2846_v38  ;;  %vm2880_vm5 = vweird.f32 %v3261_v54  ;;  %vm2866_vm8 = vmor %vm2864_vm6, %vm2865_vm4  ;;  %vm2894_vm13 = vweird.f32 %v2858_v60 }
 0xabd   :  { %v2861_v49 = vsub.f32 1.0, %v2860_v13  ;;  %vm2881_vm9 = vmor %vm2879_vm7, %vm2880_vm5  ;;  %v2898_v23 = vand.u32 2147483647, %v2858_v60  ;;  %v2901_v58 = vor.u32 1.1754944e-38, %v2900_v52 }
 0xabe   :  { %v2876_v11 = vsub.f32 1.0, %v2875_v37 }
 0xabf   :  { %v2862_v9 = vmul.f32 %v3259_v17, %v2861_v49  ;;  %vm2899_vm15 = vcmp.eq.f32.partialorder %v2898_v23, 8.507059e+37 }
 0xac0   :  { %v2877_v22 = vmul.f32 %v3261_v54, %v2876_v11 }
 0xac1   :  { %v3263_v25 = vpop.eup %3262  ;;  %v2863_v41 = vadd.f32 %v3259_v17, %v2862_v9 }
 0xac2   :  { %v2890_v26 = vmul.f32 %v3263_v25, %v2858_v60  ;;  %v2878_v30 = vadd.f32 %v3261_v54, %v2877_v22  ;;  %v3265_v14 = vpop.eup %3264  ;;  %vm2895_vm12 = vweird.f32 %v3263_v25 }
 0xac3   :  { %v2867_v33 = vsel %vm2866_vm8, %v3259_v17, %v2863_v41  ;;  %vm2896_vm14 = vmor %vm2894_vm13, %vm2895_vm12 }
 0xac4   :  { %v2891_v18 = vsub.f32 1.0, %v2890_v26  ;;  %v2872_v31 = vsel %vm2869_vm10, %v2871_v27, %v2867_v33  ;;  %v2882_v3 = vsel %vm2881_vm9, %v3261_v54, %v2878_v30 }
 0xac5   :  { %v2887_v16 = vsel %vm2884_vm11, %v2886_v32, %v2882_v3  ;;  %v2906_v63 = vmul.f32 %v3265_v14, %v2872_v31 }
 0xac6   :  { %v2892_v62 = vmul.f32 %v3263_v25, %v2891_v18  ;;  %v2905_v48 = vmul.f32 %v2887_v16, %v5790_v43 }
 0xac8   :  { %v2907_v6 = vadd.f32 %v2906_v63, %v2905_v48  ;;  %v2893_v47 = vadd.f32 %v3263_v25, %v2892_v62 }
 0xaca   :  { %3266 = vtanh.f32 %v2907_v6  ;;  %v2897_v45 = vsel %vm2896_vm14, %v3263_v25, %v2893_v47 }
 0xacb   :  { %v2902_v15 = vsel %vm2899_vm15, %v2901_v58, %v2897_v45 }
 0xad0   :  { %v3267_v35 = vpop.eup %3266 }
 0xad1   :  { %v2909_v12 = vmul.f32 %v3267_v35, %v2902_v15 }
 0xad3   :  { %3006 = vst [vmem:[%s5813_s5 + $0x38] sm:$0xff] %v2909_v12 }
 0xad4   :  { %2915 = vsyncpa [#allocation4], 1 }
 0xad5   :  { %2916 = vsyncpa [#allocation6], 1 }

</bundles_post_ra>
